<compile_context>
chip_gen: v7x
topology: tpu7x:2x2x1
jax: 0.10.0
libtpu: 0.0.40
codegen_flags: <defaults>
</compile_context>

<pallas_src>
import functools
import math

import jax
import jax.numpy as jnp
from jax.experimental import pallas as pl
from jax.experimental.pallas import tpu as pltpu


def _round_up(x, m):
    return (x + m - 1) // m * m


# ----------------------------------------------------------------------------
# Tiled Pallas GEMM:  out = A @ W + bias  (+ fused activation),  bf16 in / f32 acc.
# ----------------------------------------------------------------------------
def _gemm_bias_act_kernel(a_ref, w_ref, b_ref, o_ref, acc_ref, *, act, n_k):
    @pl.when(pl.program_id(2) == 0)
    def _init():
        acc_ref[...] = jnp.zeros_like(acc_ref)

    acc_ref[...] += jnp.dot(a_ref[...], w_ref[...],
                            preferred_element_type=jnp.float32)

    @pl.when(pl.program_id(2) == n_k - 1)
    def _finalize():
        out = acc_ref[...] + b_ref[...]
        if act == "relu":
            out = jnp.maximum(out, 0.0)
        elif act == "leaky":
            out = jnp.where(out > 0, out, 0.2 * out)
        elif act == "tanh":
            out = jnp.tanh(out)
        o_ref[...] = out.astype(o_ref.dtype)


def pallas_gemm(a, wp, bp, n_actual, act="none"):
    """a: [M, K] (any float), wp: [Kp, Np] bf16 (pre-padded), bp: [1, Np] f32.

    Returns [M, n_actual] float32.
    """
    M, K = a.shape
    Kp, Np = wp.shape

    # Tile selection (K/N tiles are determined by the pre-padded weight).
    tk = 512 if Kp % 512 == 0 else (256 if Kp % 256 == 0 else 128)
    tn = 256 if (Np % 256 == 0) else 128
    if M >= 1024 and M % 512 == 0:
        tm = 512
    elif M >= 512:
        tm = 256
    elif M >= 128:
        tm = 128
    else:
        tm = _round_up(max(M, 16), 16)   # bf16 sublane packing needs mult-of-16
    Mp = _round_up(M, tm)

    a_bf = a.astype(jnp.bfloat16)
    if Mp != M or Kp != K:
        a_bf = jnp.pad(a_bf, ((0, Mp - M), (0, Kp - K)))
    n_k = Kp // tk
    grid = (Mp // tm, Np // tn, n_k)

    cost = pl.CostEstimate(
        flops=2 * Mp * Np * Kp,
        transcendentals=(Mp * Np) if act == "tanh" else 0,
        bytes_accessed=Mp * Kp * 2 + Kp * Np * 2 + Mp * Np * 4 + Np * 4,
    )

    out = pl.pallas_call(
        functools.partial(_gemm_bias_act_kernel, act=act, n_k=n_k),
        out_shape=jax.ShapeDtypeStruct((Mp, Np), jnp.float32),
        grid=grid,
        in_specs=[
            pl.BlockSpec((tm, tk), lambda i, j, k: (i, k)),
            pl.BlockSpec((tk, tn), lambda i, j, k: (k, j)),
            pl.BlockSpec((1, tn), lambda i, j, k: (0, j)),
        ],
        out_specs=pl.BlockSpec((tm, tn), lambda i, j, k: (i, j)),
        scratch_shapes=[pltpu.VMEM((tm, tn), jnp.float32)],
        compiler_params=pltpu.CompilerParams(
            dimension_semantics=("parallel", "parallel", "arbitrary"),
            vmem_limit_bytes=32 * 1024 * 1024,
        ),
        cost_estimate=cost,
    )(a_bf, wp, bp)
    return out[:M, :n_actual]


# ----------------------------------------------------------------------------
# im2col (NHWC, channel-last: K ordered (kh, kw, Cin)) -- slice + lane concat.
# ----------------------------------------------------------------------------
def im2col_nhwc(x, kh, kw, stride, dilation):
    N, H, W, C = x.shape
    OH = (H - dilation * (kh - 1) - 1) // stride + 1
    OW = (W - dilation * (kw - 1) - 1) // stride + 1
    cols = []
    for i in range(kh):
        for j in range(kw):
            sl = x[:,
                   i * dilation: i * dilation + (OH - 1) * stride + 1: stride,
                   j * dilation: j * dilation + (OW - 1) * stride + 1: stride,
                   :]
            cols.append(sl)
    patches = jnp.concatenate(cols, axis=-1)          # [N, OH, OW, kh*kw*C]
    return patches.reshape(N * OH * OW, kh * kw * C), OH, OW


# ----------------------------------------------------------------------------
# Norm / activation glue (per-texture-layer BN, training-mode batch stats).
# ----------------------------------------------------------------------------
def batch_norm_per_layer(x, gamma, beta, n_layers, eps=1e-5):
    LB, H, W, C = x.shape
    B = LB // n_layers
    xr = x.reshape(n_layers, B, H, W, C)
    mean = xr.mean(axis=(1, 2, 3), keepdims=True)
    var = xr.var(axis=(1, 2, 3), keepdims=True)       # biased, like PyTorch BN
    xn = (xr - mean) * jax.lax.rsqrt(var + eps)
    xn = xn * gamma + beta
    return xn.reshape(LB, H, W, C)


def apply_act(x, act):
    if act == "relu":
        return jnp.maximum(x, 0.0)
    if act == "leaky":
        return jnp.where(x > 0, x, 0.2 * x)
    if act == "tanh":
        return jnp.tanh(x)
    return x


# ----------------------------------------------------------------------------
# ConvBlock (pad='same' + crop) and transposed ConvBlock (sub-pixel), NHWC.
# ----------------------------------------------------------------------------
def conv_block(x, p, cout, ksize, stride, dil, has_norm, act, n_layers):
    N, H, W, C = x.shape
    desired_h = H // stride
    desired_w = W // stride
    pady = 0.5 * (stride * (desired_h - 1) + (ksize - 1) * (dil - 1) + ksize - H)
    padx = 0.5 * (stride * (desired_w - 1) + (ksize - 1) * (dil - 1) + ksize - W)
    pt, pb = int(math.floor(pady)), int(math.ceil(pady))
    pL, pR = int(math.floor(padx)), int(math.ceil(padx))
    x = jnp.pad(x, ((0, 0), (pt, pb), (pL, pR), (0, 0)))

    fused_act = "none" if has_norm else act
    patches, OH, OW = im2col_nhwc(x, ksize, ksize, stride, dil)
    y = pallas_gemm(patches, p["wp"], p["bp"], cout, act=fused_act)
    y = y.reshape(N, OH, OW, cout)

    if OH != desired_h or OW != desired_w:
        cropy = OH - desired_h
        cropx = OW - desired_w
        y = y[:, cropy // 2: OH - (cropy - cropy // 2),
              cropx // 2: OW - (cropx - cropx // 2), :]

    if has_norm:
        y = batch_norm_per_layer(y, p["gamma"], p["beta"], n_layers)
        y = apply_act(y, act)
    return y


def conv_transpose_block(x, p, cout, ksize, stride, has_norm, act, n_layers):
    # Sub-pixel decomposition of ConvTranspose2d(k=4, s=2, pad=0).
    assert ksize == 4 and stride == 2
    N, H, W, C = x.shape
    desired_h, desired_w = H * stride, W * stride

    xp = jnp.pad(x, ((0, 0), (1, 1), (1, 1), (0, 0)))
    patches, OH, OW = im2col_nhwc(xp, 2, 2, 1, 1)      # OH = H+1, OW = W+1

    fused_act = "none" if has_norm else act
    y = pallas_gemm(patches, p["wp"], p["bp"], 4 * cout, act=fused_act)
    y = y.reshape(N, OH, OW, 2, 2, cout)
    y = y.transpose(0, 1, 3, 2, 4, 5).reshape(N, 2 * OH, 2 * OW, cout)
    # Full transposed-conv output is (2H+2, 2W+2); crop 1 each side -> (2H, 2W).
    y = y[:, 1:1 + desired_h, 1:1 + desired_w, :]

    if has_norm:
        y = batch_norm_per_layer(y, p["gamma"], p["beta"], n_layers)
        y = apply_act(y, act)
    return y


# ----------------------------------------------------------------------------
# grid_sample(mode='bilinear', padding_mode='zeros', align_corners=False), NHWC out.
# ----------------------------------------------------------------------------
def grid_sample_bilinear_nhwc(texture, grid):
    # texture: [C, Ht, Wt] (shared across batch); grid: [N, H, W, 2] (x, y) in [-1, 1]
    C, Ht, Wt = texture.shape
    gx = grid[..., 0]
    gy = grid[..., 1]
    ix = ((gx + 1.0) * Wt - 1.0) / 2.0
    iy = ((gy + 1.0) * Ht - 1.0) / 2.0
    x0 = jnp.floor(ix)
    y0 = jnp.floor(iy)
    x1 = x0 + 1.0
    y1 = y0 + 1.0
    wx1 = ix - x0
    wx0 = 1.0 - wx1
    wy1 = iy - y0
    wy0 = 1.0 - wy1
    flat = texture.reshape(C, Ht * Wt).T               # [Ht*Wt, C]

    def gather(xi, yi):
        valid = (xi >= 0) & (xi <= Wt - 1) & (yi >= 0) & (yi <= Ht - 1)
        xc = jnp.clip(xi, 0, Wt - 1).astype(jnp.int32)
        yc = jnp.clip(yi, 0, Ht - 1).astype(jnp.int32)
        idx = yc * Wt + xc                              # [N, H, W]
        g = flat[idx]                                   # [N, H, W, C]
        return g * valid[..., None].astype(flat.dtype)

    out = (gather(x0, y0) * (wx0 * wy0)[..., None]
           + gather(x1, y0) * (wx1 * wy0)[..., None]
           + gather(x0, y1) * (wx0 * wy1)[..., None]
           + gather(x1, y1) * (wx1 * wy1)[..., None])
    return out


# ----------------------------------------------------------------------------
# Model specs, raw parameter init (PyTorch layout), and one-time weight prep.
# ----------------------------------------------------------------------------
def _enc_specs(nf, tc):
    # (Cin, Cout, k, s, d, has_norm, act)
    return [
        (tc + 1, nf,     4, 2, 1, False, "relu"),
        (nf,     nf * 2, 4, 2, 1, True,  "leaky"),
        (nf * 2, nf * 4, 4, 2, 1, True,  "leaky"),
        (nf * 4, nf * 4, 4, 2, 1, True,  "leaky"),
        (nf * 4, nf * 4, 4, 2, 1, True,  "leaky"),
        (nf * 4, nf * 4, 4, 1, 2, True,  "leaky"),
        (nf * 4, nf * 4, 4, 1, 2, True,  "leaky"),
    ]


def _dec_specs(nf):
    # (Cin, Cout, k, s, has_norm, act)
    return [
        (nf * 8, nf * 4, 4, 2, True, "relu"),
        (nf * 8, nf * 4, 4, 2, True, "relu"),
        (nf * 8, nf * 2, 4, 2, True, "relu"),
        (nf * 4, nf,     4, 2, True, "relu"),
        (nf * 2, nf,     4, 2, True, "relu"),
    ]


def init_params(key, nf, texture_channels, texture_res, n_textures):
    keys = iter(jax.random.split(key, 64))

    def conv_p(cin, cout, k, has_norm):
        p = {
            "w": 0.05 * jax.random.normal(next(keys), (cout, cin, k, k), jnp.float32),
            "b": 0.05 * jax.random.normal(next(keys), (cout,), jnp.float32),
        }
        if has_norm:
            p["gamma"] = jnp.ones((cout,), jnp.float32)
            p["beta"] = jnp.zeros((cout,), jnp.float32)
        return p

    def convT_p(cin, cout, k, has_norm):
        p = {
            "w": 0.05 * jax.random.normal(next(keys), (cin, cout, k, k), jnp.float32),
            "b": 0.05 * jax.random.normal(next(keys), (cout,), jnp.float32),
        }
        if has_norm:
            p["gamma"] = jnp.ones((cout,), jnp.float32)
            p["beta"] = jnp.zeros((cout,), jnp.float32)
        return p

    return {
        "texture": jax.random.normal(
            next(keys), (1, texture_channels, texture_res, n_textures * texture_res),
            jnp.float32),
        "encoder": [conv_p(ci, co, k, hn)
                    for (ci, co, k, s, d, hn, a) in _enc_specs(nf, texture_channels)],
        "decoder": [convT_p(ci, co, k, hn)
                    for (ci, co, k, s, hn, a) in _dec_specs(nf)],
        "final_rgba": conv_p(nf, 4, 4, False),
        # TODO(synk): upsample_block params exist in the PyTorch module but are only
        # used when uv_map_upsampled is provided; that branch is not exercised here.
    }


def _pad_gemm_weight(w2, b):
    K, N = w2.shape
    Kp = _round_up(max(K, 128), 128)
    Np = _round_up(max(N, 128), 128)
    return {
        "wp": jnp.pad(w2.astype(jnp.bfloat16), ((0, Kp - K), (0, Np - N))),
        "bp": jnp.pad(b.astype(jnp.float32), (0, Np - N)).reshape(1, Np),
    }


def _prep_conv(p, has_norm):
    w = p["w"]                                   # [Cout, Cin, k, k]
    Cout, Cin, kh, kw = w.shape
    w2 = w.transpose(2, 3, 1, 0).reshape(kh * kw * Cin, Cout)   # K = (kh, kw, Cin)
    d = _pad_gemm_weight(w2, p["b"])
    if has_norm:
        d["gamma"] = p["gamma"]
        d["beta"] = p["beta"]
    return d


def _prep_convT(p, has_norm):
    w = p["w"]                                   # [Cin, Cout, 4, 4]
    Cin, Cout = w.shape[:2]
    # ky = 2*ty + ry ; flip the ty/tx taps to turn scatter into a stride-1 conv.
    w4 = w.reshape(Cin, Cout, 2, 2, 2, 2)        # [Cin, Cout, ty, ry, tx, rx]
    w4 = w4[:, :, ::-1, :, ::-1, :]              # flip -> ty', tx'
    w2 = w4.transpose(2, 4, 0, 3, 5, 1).reshape(4 * Cin, 4 * Cout)
    #   K order = (ty', tx', Cin)   N order = (ry, rx, Cout)
    d = _pad_gemm_weight(w2, jnp.tile(p["b"], 4))
    if has_norm:
        d["gamma"] = p["gamma"]
        d["beta"] = p["beta"]
    return d


def prep_params(params, nf, tc):
    return {
        "texture": params["texture"],
        "encoder": [_prep_conv(p, spec[5])
                    for spec, p in zip(_enc_specs(nf, tc), params["encoder"])],
        "decoder": [_prep_convT(p, spec[4])
                    for spec, p in zip(_dec_specs(nf), params["decoder"])],
        "final_rgba": _prep_conv(params["final_rgba"], False),
    }


# ----------------------------------------------------------------------------
# UNet render (all texture layers batched along the leading axis) and forward.
# ----------------------------------------------------------------------------
def render(x, prepped, nf, tc, n_layers):
    skips = [x]
    for i, (spec, p) in enumerate(zip(_enc_specs(nf, tc), prepped["encoder"])):
        _, cout, k, s, d, hn, act = spec
        x = conv_block(x, p, cout, k, s, d, hn, act, n_layers)
        if i < 5:
            skips.append(x)
    for spec, p in zip(_dec_specs(nf), prepped["decoder"]):
        _, cout, k, s, hn, act = spec
        x = jnp.concatenate([x, skips.pop()], axis=-1)
        x = conv_transpose_block(x, p, cout, k, s, hn, act, n_layers)
    rgba = conv_block(x, prepped["final_rgba"], 4, 4, 1, 1, False, "tanh", n_layers)
    return rgba, x


def layered_neural_renderer_forward(prepped, uv_map, id_layers, nf, tc):
    """uv_map: [B, 2L, H, W]; id_layers: [B, L, H, W]  (NCHW, like PyTorch)."""
    B = uv_map.shape[0]
    L = uv_map.shape[1] // 2
    H, W = uv_map.shape[2], uv_map.shape[3]

    texture = prepped["texture"][0]                         # [C, Ht, Wt], shared
    # Stack all texture layers along the batch dim (layer-major: index = l*B + b).
    uv = uv_map.reshape(B, L, 2, H, W).transpose(1, 0, 3, 4, 2).reshape(L * B, H, W, 2)
    sampled = grid_sample_bilinear_nhwc(texture, uv)        # [L*B, H, W, tc]
    ids = id_layers.transpose(1, 0, 2, 3).reshape(L * B, H, W, 1)
    inputs = jnp.concatenate([sampled, ids], axis=-1)       # [L*B, H, W, tc+1]

    rgba_all, _last_feat = render(inputs, prepped, nf, tc, L)   # [L*B, H, W, 4]
    rgba_all = rgba_all.reshape(L, B, H, W, 4)

    composite = rgba_all[0]
    for i in range(1, L):
        rgba = rgba_all[i]
        alpha = rgba[..., 3:4] * 0.5 + 0.5
        composite = rgba * alpha + composite * (1.0 - alpha)

    # Back to NCHW at the module boundary.
    reconstruction = composite.transpose(0, 3, 1, 2)                    # [B, 4, H, W]
    layers = rgba_all.transpose(1, 0, 4, 2, 3)                          # [B, L, 4, H, W]
    sampled_nchw = sampled.reshape(L, B, H, W, tc).transpose(0, 1, 4, 2, 3)
    sampled_list = [sampled_nchw[i] for i in range(L)]
    return {
        "reconstruction": reconstruction,
        "layers": layers,
        "sampled texture": sampled_list,
    }


# ----------------------------------------------------------------------------
if __name__ == "__main__":
    # Small but structurally faithful config (H, W must survive 5 stride-2 downsamples).
    nf = 8
    texture_channels = 4
    texture_res = 16
    n_textures = 2
    B, L, H, W = 2, 2, 32, 32

    key = jax.random.PRNGKey(0)
    k_par, k_uv, k_id = jax.random.split(key, 3)

    raw_params = init_params(k_par, nf, texture_channels, texture_res, n_textures)
    prepped = prep_params(raw_params, nf, texture_channels)   # one-time weight prep

    uv_map = jax.random.uniform(k_uv, (B, 2 * L, H, W), jnp.float32, -1.0, 1.0)
    id_layers = jax.random.normal(k_id, (B, L, H, W), jnp.float32)

    fwd = jax.jit(functools.partial(layered_neural_renderer_forward,
                                    nf=nf, tc=texture_channels))
    out = fwd(prepped, uv_map, id_layers)
    jax.block_until_ready(out["reconstruction"])
    jax.block_until_ready(out["layers"])

    assert out["reconstruction"].shape == (B, 4, H, W)
    assert out["layers"].shape == (B, L, 4, H, W)
    assert out["sampled texture"][0].shape == (B, texture_channels, H, W)
    print("KERNEL_OK")
</pallas_src>

<mosaic_0001>
module attributes {stable_mosaic.version = 11 : i64} {
  func.func @_gemm_bias_act_kernel(%arg0: i32, %arg1: i32, %arg2: i32, %arg3: memref<16x512xbf16, #tpu.memory_space<vmem>>, %arg4: memref<512x128xbf16, #tpu.memory_space<vmem>>, %arg5: memref<1x128xf32, #tpu.memory_space<vmem>>, %arg6: memref<16x128xf32, #tpu.memory_space<vmem>>, %arg7: memref<16x128xf32, #tpu.memory_space<vmem>>) attributes {dimension_semantics = [#tpu.dimension_semantics<parallel>, #tpu.dimension_semantics<parallel>, #tpu.dimension_semantics<arbitrary>], iteration_bounds = array<i64: 1, 1, 1>, scalar_prefetch = 0 : i64, scratch_operands = 1 : i64, tpu.core_type = #tpu.core_type<tc>, window_params = [{transform_indices = @transform_0, window_bounds = array<i64: 16, 512>}, {transform_indices = @transform_1, window_bounds = array<i64: 512, 128>}, {transform_indices = @transform_2, window_bounds = array<i64: 1, 128>}, {transform_indices = @transform_3, window_bounds = array<i64: 16, 128>}]} {
    %c0_i32 = arith.constant 0 : i32
    %0 = arith.cmpi eq, %arg2, %c0_i32 : i32
    %1 = arith.extui %0 : i1 to i32
    %c0_i32_0 = arith.constant 0 : i32
    %2 = arith.cmpi ne, %1, %c0_i32_0 : i32
    scf.if %2 {
      %cst_10 = arith.constant 0.000000e+00 : f32
      %12 = vector.broadcast %cst_10 : f32 to vector<16x128xf32>
      %c0_11 = arith.constant 0 : index
      %c0_12 = arith.constant 0 : index
      %13 = vector.load %arg7[%c0_11, %c0_12] : memref<16x128xf32, #tpu.memory_space<vmem>>, vector<16x128xf32>
      tpu.vector_store %arg7[%c0_11, %c0_12], %12 {strides = array<i32>} : memref<16x128xf32, #tpu.memory_space<vmem>>, vector<16x128xf32>,
    } else {
    }
    %c0 = arith.constant 0 : index
    %c0_1 = arith.constant 0 : index
    %3 = vector.load %arg7[%c0, %c0_1] : memref<16x128xf32, #tpu.memory_space<vmem>>, vector<16x128xf32>
    %c0_2 = arith.constant 0 : index
    %c0_3 = arith.constant 0 : index
    %4 = vector.load %arg3[%c0_2, %c0_3] : memref<16x512xbf16, #tpu.memory_space<vmem>>, vector<16x512xbf16>
    %c0_4 = arith.constant 0 : index
    %c0_5 = arith.constant 0 : index
    %5 = vector.load %arg4[%c0_4, %c0_5] : memref<512x128xbf16, #tpu.memory_space<vmem>>, vector<512x128xbf16>
    %cst = arith.constant dense<0.000000e+00> : vector<16x128xf32>
    %6 = tpu.matmul %4, %5, %cst {dimension_numbers = #tpu.dot_dimension_numbers<[1], [0], [0], [1], [0, 0, 1, 1], [], []>} : vector<16x512xbf16>, vector<512x128xbf16>, vector<16x128xf32> -> vector<16x128xf32>
    %7 = arith.addf %3, %6 : vector<16x128xf32>
    %c0_6 = arith.constant 0 : index
    %c0_7 = arith.constant 0 : index
    %8 = vector.load %arg7[%c0_6, %c0_7] : memref<16x128xf32, #tpu.memory_space<vmem>>, vector<16x128xf32>
    tpu.vector_store %arg7[%c0_6, %c0_7], %7 {strides = array<i32>} : memref<16x128xf32, #tpu.memory_space<vmem>>, vector<16x128xf32>,
    %c0_i32_8 = arith.constant 0 : i32
    %9 = arith.cmpi eq, %arg2, %c0_i32_8 : i32
    %10 = arith.extui %9 : i1 to i32
    %c0_i32_9 = arith.constant 0 : i32
    %11 = arith.cmpi ne, %10, %c0_i32_9 : i32
    scf.if %11 {
      %c0_10 = arith.constant 0 : index
      %c0_11 = arith.constant 0 : index
      %12 = vector.load %arg7[%c0_10, %c0_11] : memref<16x128xf32, #tpu.memory_space<vmem>>, vector<16x128xf32>
      %c0_12 = arith.constant 0 : index
      %c0_13 = arith.constant 0 : index
      %13 = vector.load %arg5[%c0_12, %c0_13] : memref<1x128xf32, #tpu.memory_space<vmem>>, vector<1x128xf32>
      %14 = vector.broadcast %13 : vector<1x128xf32> to vector<16x128xf32>
      %15 = arith.addf %12, %14 : vector<16x128xf32>
      %c0_14 = arith.constant 0 : index
      %c0_15 = arith.constant 0 : index
      %16 = vector.load %arg6[%c0_14, %c0_15] : memref<16x128xf32, #tpu.memory_space<vmem>>, vector<16x128xf32>
      tpu.vector_store %arg6[%c0_14, %c0_15], %15 {strides = array<i32>} : memref<16x128xf32, #tpu.memory_space<vmem>>, vector<16x128xf32>,
    } else {
    }
    return
  }
  func.func @transform_0(%arg0: i32, %arg1: i32, %arg2: i32) -> (i32, i32) {
    %c0_i32 = arith.constant 0 : i32
    return %arg0, %arg2 : i32, i32
  }
  func.func @transform_1(%arg0: i32, %arg1: i32, %arg2: i32) -> (i32, i32) {
    %c0_i32 = arith.constant 0 : i32
    return %arg2, %arg1 : i32, i32
  }
  func.func @transform_2(%arg0: i32, %arg1: i32, %arg2: i32) -> (i32, i32) {
    %c0_i32 = arith.constant 0 : i32
    %c0_i32_0 = arith.constant 0 : i32
    return %c0_i32, %arg1 : i32, i32
  }
  func.func @transform_3(%arg0: i32, %arg1: i32, %arg2: i32) -> (i32, i32) {
    %c0_i32 = arith.constant 0 : i32
    return %arg0, %arg1 : i32, i32
  }
}

module attributes {stable_mosaic.version = 11 : i64} {
  func.func @_gemm_bias_act_kernel(%arg0: i32, %arg1: i32, %arg2: i32, %arg3: memref<512x128xbf16, #tpu.memory_space<vmem>>, %arg4: memref<128x128xbf16, #tpu.memory_space<vmem>>, %arg5: memref<1x128xf32, #tpu.memory_space<vmem>>, %arg6: memref<512x128xf32, #tpu.memory_space<vmem>>, %arg7: memref<512x128xf32, #tpu.memory_space<vmem>>) attributes {dimension_semantics = [#tpu.dimension_semantics<parallel>, #tpu.dimension_semantics<parallel>, #tpu.dimension_semantics<arbitrary>], iteration_bounds = array<i64: 2, 1, 1>, scalar_prefetch = 0 : i64, scratch_operands = 1 : i64, tpu.core_type = #tpu.core_type<tc>, window_params = [{transform_indices = @transform_0, window_bounds = array<i64: 512, 128>}, {transform_indices = @transform_1, window_bounds = array<i64: 128, 128>}, {transform_indices = @transform_2, window_bounds = array<i64: 1, 128>}, {transform_indices = @transform_3, window_bounds = array<i64: 512, 128>}]} {
    %c0_i32 = arith.constant 0 : i32
    %0 = arith.cmpi eq, %arg2, %c0_i32 : i32
    %1 = arith.extui %0 : i1 to i32
    %c0_i32_0 = arith.constant 0 : i32
    %2 = arith.cmpi ne, %1, %c0_i32_0 : i32
    scf.if %2 {
      %cst_10 = arith.constant 0.000000e+00 : f32
      %12 = vector.broadcast %cst_10 : f32 to vector<512x128xf32>
      %c0_11 = arith.constant 0 : index
      %c0_12 = arith.constant 0 : index
      %13 = vector.load %arg7[%c0_11, %c0_12] : memref<512x128xf32, #tpu.memory_space<vmem>>, vector<512x128xf32>
      tpu.vector_store %arg7[%c0_11, %c0_12], %12 {strides = array<i32>} : memref<512x128xf32, #tpu.memory_space<vmem>>, vector<512x128xf32>,
    } else {
    }
    %c0 = arith.constant 0 : index
    %c0_1 = arith.constant 0 : index
    %3 = vector.load %arg7[%c0, %c0_1] : memref<512x128xf32, #tpu.memory_space<vmem>>, vector<512x128xf32>
    %c0_2 = arith.constant 0 : index
    %c0_3 = arith.constant 0 : index
    %4 = vector.load %arg3[%c0_2, %c0_3] : memref<512x128xbf16, #tpu.memory_space<vmem>>, vector<512x128xbf16>
    %c0_4 = arith.constant 0 : index
    %c0_5 = arith.constant 0 : index
    %5 = vector.load %arg4[%c0_4, %c0_5] : memref<128x128xbf16, #tpu.memory_space<vmem>>, vector<128x128xbf16>
    %cst = arith.constant dense<0.000000e+00> : vector<512x128xf32>
    %6 = tpu.matmul %4, %5, %cst {dimension_numbers = #tpu.dot_dimension_numbers<[1], [0], [0], [1], [0, 0, 1, 1], [], []>} : vector<512x128xbf16>, vector<128x128xbf16>, vector<512x128xf32> -> vector<512x128xf32>
    %7 = arith.addf %3, %6 : vector<512x128xf32>
    %c0_6 = arith.constant 0 : index
    %c0_7 = arith.constant 0 : index
    %8 = vector.load %arg7[%c0_6, %c0_7] : memref<512x128xf32, #tpu.memory_space<vmem>>, vector<512x128xf32>
    tpu.vector_store %arg7[%c0_6, %c0_7], %7 {strides = array<i32>} : memref<512x128xf32, #tpu.memory_space<vmem>>, vector<512x128xf32>,
    %c0_i32_8 = arith.constant 0 : i32
    %9 = arith.cmpi eq, %arg2, %c0_i32_8 : i32
    %10 = arith.extui %9 : i1 to i32
    %c0_i32_9 = arith.constant 0 : i32
    %11 = arith.cmpi ne, %10, %c0_i32_9 : i32
    scf.if %11 {
      %c0_10 = arith.constant 0 : index
      %c0_11 = arith.constant 0 : index
      %12 = vector.load %arg7[%c0_10, %c0_11] : memref<512x128xf32, #tpu.memory_space<vmem>>, vector<512x128xf32>
      %c0_12 = arith.constant 0 : index
      %c0_13 = arith.constant 0 : index
      %13 = vector.load %arg5[%c0_12, %c0_13] : memref<1x128xf32, #tpu.memory_space<vmem>>, vector<1x128xf32>
      %14 = vector.broadcast %13 : vector<1x128xf32> to vector<512x128xf32>
      %15 = arith.addf %12, %14 : vector<512x128xf32>
      %cst_14 = arith.constant 0.000000e+00 : f32
      %16 = vector.broadcast %cst_14 : f32 to vector<512x128xf32>
      %17 = arith.maximumf %15, %16 : vector<512x128xf32>
      %c0_15 = arith.constant 0 : index
      %c0_16 = arith.constant 0 : index
      %18 = vector.load %arg6[%c0_15, %c0_16] : memref<512x128xf32, #tpu.memory_space<vmem>>, vector<512x128xf32>
      tpu.vector_store %arg6[%c0_15, %c0_16], %17 {strides = array<i32>} : memref<512x128xf32, #tpu.memory_space<vmem>>, vector<512x128xf32>,
    } else {
    }
    return
  }
  func.func @transform_0(%arg0: i32, %arg1: i32, %arg2: i32) -> (i32, i32) {
    %c0_i32 = arith.constant 0 : i32
    return %arg0, %arg2 : i32, i32
  }
  func.func @transform_1(%arg0: i32, %arg1: i32, %arg2: i32) -> (i32, i32) {
    %c0_i32 = arith.constant 0 : i32
    return %arg2, %arg1 : i32, i32
  }
  func.func @transform_2(%arg0: i32, %arg1: i32, %arg2: i32) -> (i32, i32) {
    %c0_i32 = arith.constant 0 : i32
    %c0_i32_0 = arith.constant 0 : i32
    return %c0_i32, %arg1 : i32, i32
  }
  func.func @transform_3(%arg0: i32, %arg1: i32, %arg2: i32) -> (i32, i32) {
    %c0_i32 = arith.constant 0 : i32
    return %arg0, %arg1 : i32, i32
  }
}

module attributes {stable_mosaic.version = 11 : i64} {
  func.func @_gemm_bias_act_kernel(%arg0: i32, %arg1: i32, %arg2: i32, %arg3: memref<128x128xbf16, #tpu.memory_space<vmem>>, %arg4: memref<128x128xbf16, #tpu.memory_space<vmem>>, %arg5: memref<1x128xf32, #tpu.memory_space<vmem>>, %arg6: memref<128x128xf32, #tpu.memory_space<vmem>>, %arg7: memref<128x128xf32, #tpu.memory_space<vmem>>) attributes {dimension_semantics = [#tpu.dimension_semantics<parallel>, #tpu.dimension_semantics<parallel>, #tpu.dimension_semantics<arbitrary>], iteration_bounds = array<i64: 2, 1, 1>, scalar_prefetch = 0 : i64, scratch_operands = 1 : i64, tpu.core_type = #tpu.core_type<tc>, window_params = [{transform_indices = @transform_0, window_bounds = array<i64: 128, 128>}, {transform_indices = @transform_1, window_bounds = array<i64: 128, 128>}, {transform_indices = @transform_2, window_bounds = array<i64: 1, 128>}, {transform_indices = @transform_3, window_bounds = array<i64: 128, 128>}]} {
    %c0_i32 = arith.constant 0 : i32
    %0 = arith.cmpi eq, %arg2, %c0_i32 : i32
    %1 = arith.extui %0 : i1 to i32
    %c0_i32_0 = arith.constant 0 : i32
    %2 = arith.cmpi ne, %1, %c0_i32_0 : i32
    scf.if %2 {
      %cst_10 = arith.constant 0.000000e+00 : f32
      %12 = vector.broadcast %cst_10 : f32 to vector<128x128xf32>
      %c0_11 = arith.constant 0 : index
      %c0_12 = arith.constant 0 : index
      %13 = vector.load %arg7[%c0_11, %c0_12] : memref<128x128xf32, #tpu.memory_space<vmem>>, vector<128x128xf32>
      tpu.vector_store %arg7[%c0_11, %c0_12], %12 {strides = array<i32>} : memref<128x128xf32, #tpu.memory_space<vmem>>, vector<128x128xf32>,
    } else {
    }
    %c0 = arith.constant 0 : index
    %c0_1 = arith.constant 0 : index
    %3 = vector.load %arg7[%c0, %c0_1] : memref<128x128xf32, #tpu.memory_space<vmem>>, vector<128x128xf32>
    %c0_2 = arith.constant 0 : index
    %c0_3 = arith.constant 0 : index
    %4 = vector.load %arg3[%c0_2, %c0_3] : memref<128x128xbf16, #tpu.memory_space<vmem>>, vector<128x128xbf16>
    %c0_4 = arith.constant 0 : index
    %c0_5 = arith.constant 0 : index
    %5 = vector.load %arg4[%c0_4, %c0_5] : memref<128x128xbf16, #tpu.memory_space<vmem>>, vector<128x128xbf16>
    %cst = arith.constant dense<0.000000e+00> : vector<128x128xf32>
    %6 = tpu.matmul %4, %5, %cst {dimension_numbers = #tpu.dot_dimension_numbers<[1], [0], [0], [1], [0, 0, 1, 1], [], []>} : vector<128x128xbf16>, vector<128x128xbf16>, vector<128x128xf32> -> vector<128x128xf32>
    %7 = arith.addf %3, %6 : vector<128x128xf32>
    %c0_6 = arith.constant 0 : index
    %c0_7 = arith.constant 0 : index
    %8 = vector.load %arg7[%c0_6, %c0_7] : memref<128x128xf32, #tpu.memory_space<vmem>>, vector<128x128xf32>
    tpu.vector_store %arg7[%c0_6, %c0_7], %7 {strides = array<i32>} : memref<128x128xf32, #tpu.memory_space<vmem>>, vector<128x128xf32>,
    %c0_i32_8 = arith.constant 0 : i32
    %9 = arith.cmpi eq, %arg2, %c0_i32_8 : i32
    %10 = arith.extui %9 : i1 to i32
    %c0_i32_9 = arith.constant 0 : i32
    %11 = arith.cmpi ne, %10, %c0_i32_9 : i32
    scf.if %11 {
      %c0_10 = arith.constant 0 : index
      %c0_11 = arith.constant 0 : index
      %12 = vector.load %arg7[%c0_10, %c0_11] : memref<128x128xf32, #tpu.memory_space<vmem>>, vector<128x128xf32>
      %c0_12 = arith.constant 0 : index
      %c0_13 = arith.constant 0 : index
      %13 = vector.load %arg5[%c0_12, %c0_13] : memref<1x128xf32, #tpu.memory_space<vmem>>, vector<1x128xf32>
      %14 = vector.broadcast %13 : vector<1x128xf32> to vector<128x128xf32>
      %15 = arith.addf %12, %14 : vector<128x128xf32>
      %c0_14 = arith.constant 0 : index
      %c0_15 = arith.constant 0 : index
      %16 = vector.load %arg6[%c0_14, %c0_15] : memref<128x128xf32, #tpu.memory_space<vmem>>, vector<128x128xf32>
      tpu.vector_store %arg6[%c0_14, %c0_15], %15 {strides = array<i32>} : memref<128x128xf32, #tpu.memory_space<vmem>>, vector<128x128xf32>,
    } else {
    }
    return
  }
  func.func @transform_0(%arg0: i32, %arg1: i32, %arg2: i32) -> (i32, i32) {
    %c0_i32 = arith.constant 0 : i32
    return %arg0, %arg2 : i32, i32
  }
  func.func @transform_1(%arg0: i32, %arg1: i32, %arg2: i32) -> (i32, i32) {
    %c0_i32 = arith.constant 0 : i32
    return %arg2, %arg1 : i32, i32
  }
  func.func @transform_2(%arg0: i32, %arg1: i32, %arg2: i32) -> (i32, i32) {
    %c0_i32 = arith.constant 0 : i32
    %c0_i32_0 = arith.constant 0 : i32
    return %c0_i32, %arg1 : i32, i32
  }
  func.func @transform_3(%arg0: i32, %arg1: i32, %arg2: i32) -> (i32, i32) {
    %c0_i32 = arith.constant 0 : i32
    return %arg0, %arg1 : i32, i32
  }
}

module attributes {stable_mosaic.version = 11 : i64} {
  func.func @_gemm_bias_act_kernel(%arg0: i32, %arg1: i32, %arg2: i32, %arg3: memref<64x256xbf16, #tpu.memory_space<vmem>>, %arg4: memref<256x128xbf16, #tpu.memory_space<vmem>>, %arg5: memref<1x128xf32, #tpu.memory_space<vmem>>, %arg6: memref<64x128xf32, #tpu.memory_space<vmem>>, %arg7: memref<64x128xf32, #tpu.memory_space<vmem>>) attributes {dimension_semantics = [#tpu.dimension_semantics<parallel>, #tpu.dimension_semantics<parallel>, #tpu.dimension_semantics<arbitrary>], iteration_bounds = array<i64: 1, 1, 1>, scalar_prefetch = 0 : i64, scratch_operands = 1 : i64, tpu.core_type = #tpu.core_type<tc>, window_params = [{transform_indices = @transform_0, window_bounds = array<i64: 64, 256>}, {transform_indices = @transform_1, window_bounds = array<i64: 256, 128>}, {transform_indices = @transform_2, window_bounds = array<i64: 1, 128>}, {transform_indices = @transform_3, window_bounds = array<i64: 64, 128>}]} {
    %c0_i32 = arith.constant 0 : i32
    %0 = arith.cmpi eq, %arg2, %c0_i32 : i32
    %1 = arith.extui %0 : i1 to i32
    %c0_i32_0 = arith.constant 0 : i32
    %2 = arith.cmpi ne, %1, %c0_i32_0 : i32
    scf.if %2 {
      %cst_10 = arith.constant 0.000000e+00 : f32
      %12 = vector.broadcast %cst_10 : f32 to vector<64x128xf32>
      %c0_11 = arith.constant 0 : index
      %c0_12 = arith.constant 0 : index
      %13 = vector.load %arg7[%c0_11, %c0_12] : memref<64x128xf32, #tpu.memory_space<vmem>>, vector<64x128xf32>
      tpu.vector_store %arg7[%c0_11, %c0_12], %12 {strides = array<i32>} : memref<64x128xf32, #tpu.memory_space<vmem>>, vector<64x128xf32>,
    } else {
    }
    %c0 = arith.constant 0 : index
    %c0_1 = arith.constant 0 : index
    %3 = vector.load %arg7[%c0, %c0_1] : memref<64x128xf32, #tpu.memory_space<vmem>>, vector<64x128xf32>
    %c0_2 = arith.constant 0 : index
    %c0_3 = arith.constant 0 : index
    %4 = vector.load %arg3[%c0_2, %c0_3] : memref<64x256xbf16, #tpu.memory_space<vmem>>, vector<64x256xbf16>
    %c0_4 = arith.constant 0 : index
    %c0_5 = arith.constant 0 : index
    %5 = vector.load %arg4[%c0_4, %c0_5] : memref<256x128xbf16, #tpu.memory_space<vmem>>, vector<256x128xbf16>
    %cst = arith.constant dense<0.000000e+00> : vector<64x128xf32>
    %6 = tpu.matmul %4, %5, %cst {dimension_numbers = #tpu.dot_dimension_numbers<[1], [0], [0], [1], [0, 0, 1, 1], [], []>} : vector<64x256xbf16>, vector<256x128xbf16>, vector<64x128xf32> -> vector<64x128xf32>
    %7 = arith.addf %3, %6 : vector<64x128xf32>
    %c0_6 = arith.constant 0 : index
    %c0_7 = arith.constant 0 : index
    %8 = vector.load %arg7[%c0_6, %c0_7] : memref<64x128xf32, #tpu.memory_space<vmem>>, vector<64x128xf32>
    tpu.vector_store %arg7[%c0_6, %c0_7], %7 {strides = array<i32>} : memref<64x128xf32, #tpu.memory_space<vmem>>, vector<64x128xf32>,
    %c0_i32_8 = arith.constant 0 : i32
    %9 = arith.cmpi eq, %arg2, %c0_i32_8 : i32
    %10 = arith.extui %9 : i1 to i32
    %c0_i32_9 = arith.constant 0 : i32
    %11 = arith.cmpi ne, %10, %c0_i32_9 : i32
    scf.if %11 {
      %c0_10 = arith.constant 0 : index
      %c0_11 = arith.constant 0 : index
      %12 = vector.load %arg7[%c0_10, %c0_11] : memref<64x128xf32, #tpu.memory_space<vmem>>, vector<64x128xf32>
      %c0_12 = arith.constant 0 : index
      %c0_13 = arith.constant 0 : index
      %13 = vector.load %arg5[%c0_12, %c0_13] : memref<1x128xf32, #tpu.memory_space<vmem>>, vector<1x128xf32>
      %14 = vector.broadcast %13 : vector<1x128xf32> to vector<64x128xf32>
      %15 = arith.addf %12, %14 : vector<64x128xf32>
      %c0_14 = arith.constant 0 : index
      %c0_15 = arith.constant 0 : index
      %16 = vector.load %arg6[%c0_14, %c0_15] : memref<64x128xf32, #tpu.memory_space<vmem>>, vector<64x128xf32>
      tpu.vector_store %arg6[%c0_14, %c0_15], %15 {strides = array<i32>} : memref<64x128xf32, #tpu.memory_space<vmem>>, vector<64x128xf32>,
    } else {
    }
    return
  }
  func.func @transform_0(%arg0: i32, %arg1: i32, %arg2: i32) -> (i32, i32) {
    %c0_i32 = arith.constant 0 : i32
    return %arg0, %arg2 : i32, i32
  }
  func.func @transform_1(%arg0: i32, %arg1: i32, %arg2: i32) -> (i32, i32) {
    %c0_i32 = arith.constant 0 : i32
    return %arg2, %arg1 : i32, i32
  }
  func.func @transform_2(%arg0: i32, %arg1: i32, %arg2: i32) -> (i32, i32) {
    %c0_i32 = arith.constant 0 : i32
    %c0_i32_0 = arith.constant 0 : i32
    return %c0_i32, %arg1 : i32, i32
  }
  func.func @transform_3(%arg0: i32, %arg1: i32, %arg2: i32) -> (i32, i32) {
    %c0_i32 = arith.constant 0 : i32
    return %arg0, %arg1 : i32, i32
  }
}

module attributes {stable_mosaic.version = 11 : i64} {
  func.func @_gemm_bias_act_kernel(%arg0: i32, %arg1: i32, %arg2: i32, %arg3: memref<16x512xbf16, #tpu.memory_space<vmem>>, %arg4: memref<512x128xbf16, #tpu.memory_space<vmem>>, %arg5: memref<1x128xf32, #tpu.memory_space<vmem>>, %arg6: memref<16x128xf32, #tpu.memory_space<vmem>>, %arg7: memref<16x128xf32, #tpu.memory_space<vmem>>) attributes {dimension_semantics = [#tpu.dimension_semantics<parallel>, #tpu.dimension_semantics<parallel>, #tpu.dimension_semantics<arbitrary>], iteration_bounds = array<i64: 1, 1, 1>, scalar_prefetch = 0 : i64, scratch_operands = 1 : i64, tpu.core_type = #tpu.core_type<tc>, window_params = [{transform_indices = @transform_0, window_bounds = array<i64: 16, 512>}, {transform_indices = @transform_1, window_bounds = array<i64: 512, 128>}, {transform_indices = @transform_2, window_bounds = array<i64: 1, 128>}, {transform_indices = @transform_3, window_bounds = array<i64: 16, 128>}]} {
    %c0_i32 = arith.constant 0 : i32
    %0 = arith.cmpi eq, %arg2, %c0_i32 : i32
    %1 = arith.extui %0 : i1 to i32
    %c0_i32_0 = arith.constant 0 : i32
    %2 = arith.cmpi ne, %1, %c0_i32_0 : i32
    scf.if %2 {
      %cst_10 = arith.constant 0.000000e+00 : f32
      %12 = vector.broadcast %cst_10 : f32 to vector<16x128xf32>
      %c0_11 = arith.constant 0 : index
      %c0_12 = arith.constant 0 : index
      %13 = vector.load %arg7[%c0_11, %c0_12] : memref<16x128xf32, #tpu.memory_space<vmem>>, vector<16x128xf32>
      tpu.vector_store %arg7[%c0_11, %c0_12], %12 {strides = array<i32>} : memref<16x128xf32, #tpu.memory_space<vmem>>, vector<16x128xf32>,
    } else {
    }
    %c0 = arith.constant 0 : index
    %c0_1 = arith.constant 0 : index
    %3 = vector.load %arg7[%c0, %c0_1] : memref<16x128xf32, #tpu.memory_space<vmem>>, vector<16x128xf32>
    %c0_2 = arith.constant 0 : index
    %c0_3 = arith.constant 0 : index
    %4 = vector.load %arg3[%c0_2, %c0_3] : memref<16x512xbf16, #tpu.memory_space<vmem>>, vector<16x512xbf16>
    %c0_4 = arith.constant 0 : index
    %c0_5 = arith.constant 0 : index
    %5 = vector.load %arg4[%c0_4, %c0_5] : memref<512x128xbf16, #tpu.memory_space<vmem>>, vector<512x128xbf16>
    %cst = arith.constant dense<0.000000e+00> : vector<16x128xf32>
    %6 = tpu.matmul %4, %5, %cst {dimension_numbers = #tpu.dot_dimension_numbers<[1], [0], [0], [1], [0, 0, 1, 1], [], []>} : vector<16x512xbf16>, vector<512x128xbf16>, vector<16x128xf32> -> vector<16x128xf32>
    %7 = arith.addf %3, %6 : vector<16x128xf32>
    %c0_6 = arith.constant 0 : index
    %c0_7 = arith.constant 0 : index
    %8 = vector.load %arg7[%c0_6, %c0_7] : memref<16x128xf32, #tpu.memory_space<vmem>>, vector<16x128xf32>
    tpu.vector_store %arg7[%c0_6, %c0_7], %7 {strides = array<i32>} : memref<16x128xf32, #tpu.memory_space<vmem>>, vector<16x128xf32>,
    %c0_i32_8 = arith.constant 0 : i32
    %9 = arith.cmpi eq, %arg2, %c0_i32_8 : i32
    %10 = arith.extui %9 : i1 to i32
    %c0_i32_9 = arith.constant 0 : i32
    %11 = arith.cmpi ne, %10, %c0_i32_9 : i32
    scf.if %11 {
      %c0_10 = arith.constant 0 : index
      %c0_11 = arith.constant 0 : index
      %12 = vector.load %arg7[%c0_10, %c0_11] : memref<16x128xf32, #tpu.memory_space<vmem>>, vector<16x128xf32>
      %c0_12 = arith.constant 0 : index
      %c0_13 = arith.constant 0 : index
      %13 = vector.load %arg5[%c0_12, %c0_13] : memref<1x128xf32, #tpu.memory_space<vmem>>, vector<1x128xf32>
      %14 = vector.broadcast %13 : vector<1x128xf32> to vector<16x128xf32>
      %15 = arith.addf %12, %14 : vector<16x128xf32>
      %c0_14 = arith.constant 0 : index
      %c0_15 = arith.constant 0 : index
      %16 = vector.load %arg6[%c0_14, %c0_15] : memref<16x128xf32, #tpu.memory_space<vmem>>, vector<16x128xf32>
      tpu.vector_store %arg6[%c0_14, %c0_15], %15 {strides = array<i32>} : memref<16x128xf32, #tpu.memory_space<vmem>>, vector<16x128xf32>,
    } else {
    }
    return
  }
  func.func @transform_0(%arg0: i32, %arg1: i32, %arg2: i32) -> (i32, i32) {
    %c0_i32 = arith.constant 0 : i32
    return %arg0, %arg2 : i32, i32
  }
  func.func @transform_1(%arg0: i32, %arg1: i32, %arg2: i32) -> (i32, i32) {
    %c0_i32 = arith.constant 0 : i32
    return %arg2, %arg1 : i32, i32
  }
  func.func @transform_2(%arg0: i32, %arg1: i32, %arg2: i32) -> (i32, i32) {
    %c0_i32 = arith.constant 0 : i32
    %c0_i32_0 = arith.constant 0 : i32
    return %c0_i32, %arg1 : i32, i32
  }
  func.func @transform_3(%arg0: i32, %arg1: i32, %arg2: i32) -> (i32, i32) {
    %c0_i32 = arith.constant 0 : i32
    return %arg0, %arg1 : i32, i32
  }
}

module attributes {stable_mosaic.version = 11 : i64} {
  func.func @_gemm_bias_act_kernel(%arg0: i32, %arg1: i32, %arg2: i32, %arg3: memref<16x256xbf16, #tpu.memory_space<vmem>>, %arg4: memref<256x128xbf16, #tpu.memory_space<vmem>>, %arg5: memref<1x128xf32, #tpu.memory_space<vmem>>, %arg6: memref<16x128xf32, #tpu.memory_space<vmem>>, %arg7: memref<16x128xf32, #tpu.memory_space<vmem>>) attributes {dimension_semantics = [#tpu.dimension_semantics<parallel>, #tpu.dimension_semantics<parallel>, #tpu.dimension_semantics<arbitrary>], iteration_bounds = array<i64: 1, 1, 1>, scalar_prefetch = 0 : i64, scratch_operands = 1 : i64, tpu.core_type = #tpu.core_type<tc>, window_params = [{transform_indices = @transform_0, window_bounds = array<i64: 16, 256>}, {transform_indices = @transform_1, window_bounds = array<i64: 256, 128>}, {transform_indices = @transform_2, window_bounds = array<i64: 1, 128>}, {transform_indices = @transform_3, window_bounds = array<i64: 16, 128>}]} {
    %c0_i32 = arith.constant 0 : i32
    %0 = arith.cmpi eq, %arg2, %c0_i32 : i32
    %1 = arith.extui %0 : i1 to i32
    %c0_i32_0 = arith.constant 0 : i32
    %2 = arith.cmpi ne, %1, %c0_i32_0 : i32
    scf.if %2 {
      %cst_10 = arith.constant 0.000000e+00 : f32
      %12 = vector.broadcast %cst_10 : f32 to vector<16x128xf32>
      %c0_11 = arith.constant 0 : index
      %c0_12 = arith.constant 0 : index
      %13 = vector.load %arg7[%c0_11, %c0_12] : memref<16x128xf32, #tpu.memory_space<vmem>>, vector<16x128xf32>
      tpu.vector_store %arg7[%c0_11, %c0_12], %12 {strides = array<i32>} : memref<16x128xf32, #tpu.memory_space<vmem>>, vector<16x128xf32>,
    } else {
    }
    %c0 = arith.constant 0 : index
    %c0_1 = arith.constant 0 : index
    %3 = vector.load %arg7[%c0, %c0_1] : memref<16x128xf32, #tpu.memory_space<vmem>>, vector<16x128xf32>
    %c0_2 = arith.constant 0 : index
    %c0_3 = arith.constant 0 : index
    %4 = vector.load %arg3[%c0_2, %c0_3] : memref<16x256xbf16, #tpu.memory_space<vmem>>, vector<16x256xbf16>
    %c0_4 = arith.constant 0 : index
    %c0_5 = arith.constant 0 : index
    %5 = vector.load %arg4[%c0_4, %c0_5] : memref<256x128xbf16, #tpu.memory_space<vmem>>, vector<256x128xbf16>
    %cst = arith.constant dense<0.000000e+00> : vector<16x128xf32>
    %6 = tpu.matmul %4, %5, %cst {dimension_numbers = #tpu.dot_dimension_numbers<[1], [0], [0], [1], [0, 0, 1, 1], [], []>} : vector<16x256xbf16>, vector<256x128xbf16>, vector<16x128xf32> -> vector<16x128xf32>
    %7 = arith.addf %3, %6 : vector<16x128xf32>
    %c0_6 = arith.constant 0 : index
    %c0_7 = arith.constant 0 : index
    %8 = vector.load %arg7[%c0_6, %c0_7] : memref<16x128xf32, #tpu.memory_space<vmem>>, vector<16x128xf32>
    tpu.vector_store %arg7[%c0_6, %c0_7], %7 {strides = array<i32>} : memref<16x128xf32, #tpu.memory_space<vmem>>, vector<16x128xf32>,
    %c0_i32_8 = arith.constant 0 : i32
    %9 = arith.cmpi eq, %arg2, %c0_i32_8 : i32
    %10 = arith.extui %9 : i1 to i32
    %c0_i32_9 = arith.constant 0 : i32
    %11 = arith.cmpi ne, %10, %c0_i32_9 : i32
    scf.if %11 {
      %c0_10 = arith.constant 0 : index
      %c0_11 = arith.constant 0 : index
      %12 = vector.load %arg7[%c0_10, %c0_11] : memref<16x128xf32, #tpu.memory_space<vmem>>, vector<16x128xf32>
      %c0_12 = arith.constant 0 : index
      %c0_13 = arith.constant 0 : index
      %13 = vector.load %arg5[%c0_12, %c0_13] : memref<1x128xf32, #tpu.memory_space<vmem>>, vector<1x128xf32>
      %14 = vector.broadcast %13 : vector<1x128xf32> to vector<16x128xf32>
      %15 = arith.addf %12, %14 : vector<16x128xf32>
      %c0_14 = arith.constant 0 : index
      %c0_15 = arith.constant 0 : index
      %16 = vector.load %arg6[%c0_14, %c0_15] : memref<16x128xf32, #tpu.memory_space<vmem>>, vector<16x128xf32>
      tpu.vector_store %arg6[%c0_14, %c0_15], %15 {strides = array<i32>} : memref<16x128xf32, #tpu.memory_space<vmem>>, vector<16x128xf32>,
    } else {
    }
    return
  }
  func.func @transform_0(%arg0: i32, %arg1: i32, %arg2: i32) -> (i32, i32) {
    %c0_i32 = arith.constant 0 : i32
    return %arg0, %arg2 : i32, i32
  }
  func.func @transform_1(%arg0: i32, %arg1: i32, %arg2: i32) -> (i32, i32) {
    %c0_i32 = arith.constant 0 : i32
    return %arg2, %arg1 : i32, i32
  }
  func.func @transform_2(%arg0: i32, %arg1: i32, %arg2: i32) -> (i32, i32) {
    %c0_i32 = arith.constant 0 : i32
    %c0_i32_0 = arith.constant 0 : i32
    return %c0_i32, %arg1 : i32, i32
  }
  func.func @transform_3(%arg0: i32, %arg1: i32, %arg2: i32) -> (i32, i32) {
    %c0_i32 = arith.constant 0 : i32
    return %arg0, %arg1 : i32, i32
  }
}

module attributes {stable_mosaic.version = 11 : i64} {
  func.func @_gemm_bias_act_kernel(%arg0: i32, %arg1: i32, %arg2: i32, %arg3: memref<48x256xbf16, #tpu.memory_space<vmem>>, %arg4: memref<256x128xbf16, #tpu.memory_space<vmem>>, %arg5: memref<1x128xf32, #tpu.memory_space<vmem>>, %arg6: memref<48x128xf32, #tpu.memory_space<vmem>>, %arg7: memref<48x128xf32, #tpu.memory_space<vmem>>) attributes {dimension_semantics = [#tpu.dimension_semantics<parallel>, #tpu.dimension_semantics<parallel>, #tpu.dimension_semantics<arbitrary>], iteration_bounds = array<i64: 1, 1, 1>, scalar_prefetch = 0 : i64, scratch_operands = 1 : i64, tpu.core_type = #tpu.core_type<tc>, window_params = [{transform_indices = @transform_0, window_bounds = array<i64: 48, 256>}, {transform_indices = @transform_1, window_bounds = array<i64: 256, 128>}, {transform_indices = @transform_2, window_bounds = array<i64: 1, 128>}, {transform_indices = @transform_3, window_bounds = array<i64: 48, 128>}]} {
    %c0_i32 = arith.constant 0 : i32
    %0 = arith.cmpi eq, %arg2, %c0_i32 : i32
    %1 = arith.extui %0 : i1 to i32
    %c0_i32_0 = arith.constant 0 : i32
    %2 = arith.cmpi ne, %1, %c0_i32_0 : i32
    scf.if %2 {
      %cst_10 = arith.constant 0.000000e+00 : f32
      %12 = vector.broadcast %cst_10 : f32 to vector<48x128xf32>
      %c0_11 = arith.constant 0 : index
      %c0_12 = arith.constant 0 : index
      %13 = vector.load %arg7[%c0_11, %c0_12] : memref<48x128xf32, #tpu.memory_space<vmem>>, vector<48x128xf32>
      tpu.vector_store %arg7[%c0_11, %c0_12], %12 {strides = array<i32>} : memref<48x128xf32, #tpu.memory_space<vmem>>, vector<48x128xf32>,
    } else {
    }
    %c0 = arith.constant 0 : index
    %c0_1 = arith.constant 0 : index
    %3 = vector.load %arg7[%c0, %c0_1] : memref<48x128xf32, #tpu.memory_space<vmem>>, vector<48x128xf32>
    %c0_2 = arith.constant 0 : index
    %c0_3 = arith.constant 0 : index
    %4 = vector.load %arg3[%c0_2, %c0_3] : memref<48x256xbf16, #tpu.memory_space<vmem>>, vector<48x256xbf16>
    %c0_4 = arith.constant 0 : index
    %c0_5 = arith.constant 0 : index
    %5 = vector.load %arg4[%c0_4, %c0_5] : memref<256x128xbf16, #tpu.memory_space<vmem>>, vector<256x128xbf16>
    %cst = arith.constant dense<0.000000e+00> : vector<48x128xf32>
    %6 = tpu.matmul %4, %5, %cst {dimension_numbers = #tpu.dot_dimension_numbers<[1], [0], [0], [1], [0, 0, 1, 1], [], []>} : vector<48x256xbf16>, vector<256x128xbf16>, vector<48x128xf32> -> vector<48x128xf32>
    %7 = arith.addf %3, %6 : vector<48x128xf32>
    %c0_6 = arith.constant 0 : index
    %c0_7 = arith.constant 0 : index
    %8 = vector.load %arg7[%c0_6, %c0_7] : memref<48x128xf32, #tpu.memory_space<vmem>>, vector<48x128xf32>
    tpu.vector_store %arg7[%c0_6, %c0_7], %7 {strides = array<i32>} : memref<48x128xf32, #tpu.memory_space<vmem>>, vector<48x128xf32>,
    %c0_i32_8 = arith.constant 0 : i32
    %9 = arith.cmpi eq, %arg2, %c0_i32_8 : i32
    %10 = arith.extui %9 : i1 to i32
    %c0_i32_9 = arith.constant 0 : i32
    %11 = arith.cmpi ne, %10, %c0_i32_9 : i32
    scf.if %11 {
      %c0_10 = arith.constant 0 : index
      %c0_11 = arith.constant 0 : index
      %12 = vector.load %arg7[%c0_10, %c0_11] : memref<48x128xf32, #tpu.memory_space<vmem>>, vector<48x128xf32>
      %c0_12 = arith.constant 0 : index
      %c0_13 = arith.constant 0 : index
      %13 = vector.load %arg5[%c0_12, %c0_13] : memref<1x128xf32, #tpu.memory_space<vmem>>, vector<1x128xf32>
      %14 = vector.broadcast %13 : vector<1x128xf32> to vector<48x128xf32>
      %15 = arith.addf %12, %14 : vector<48x128xf32>
      %c0_14 = arith.constant 0 : index
      %c0_15 = arith.constant 0 : index
      %16 = vector.load %arg6[%c0_14, %c0_15] : memref<48x128xf32, #tpu.memory_space<vmem>>, vector<48x128xf32>
      tpu.vector_store %arg6[%c0_14, %c0_15], %15 {strides = array<i32>} : memref<48x128xf32, #tpu.memory_space<vmem>>, vector<48x128xf32>,
    } else {
    }
    return
  }
  func.func @transform_0(%arg0: i32, %arg1: i32, %arg2: i32) -> (i32, i32) {
    %c0_i32 = arith.constant 0 : i32
    return %arg0, %arg2 : i32, i32
  }
  func.func @transform_1(%arg0: i32, %arg1: i32, %arg2: i32) -> (i32, i32) {
    %c0_i32 = arith.constant 0 : i32
    return %arg2, %arg1 : i32, i32
  }
  func.func @transform_2(%arg0: i32, %arg1: i32, %arg2: i32) -> (i32, i32) {
    %c0_i32 = arith.constant 0 : i32
    %c0_i32_0 = arith.constant 0 : i32
    return %c0_i32, %arg1 : i32, i32
  }
  func.func @transform_3(%arg0: i32, %arg1: i32, %arg2: i32) -> (i32, i32) {
    %c0_i32 = arith.constant 0 : i32
    return %arg0, %arg1 : i32, i32
  }
}

module attributes {stable_mosaic.version = 11 : i64} {
  func.func @_gemm_bias_act_kernel(%arg0: i32, %arg1: i32, %arg2: i32, %arg3: memref<112x256xbf16, #tpu.memory_space<vmem>>, %arg4: memref<256x128xbf16, #tpu.memory_space<vmem>>, %arg5: memref<1x128xf32, #tpu.memory_space<vmem>>, %arg6: memref<112x128xf32, #tpu.memory_space<vmem>>, %arg7: memref<112x128xf32, #tpu.memory_space<vmem>>) attributes {dimension_semantics = [#tpu.dimension_semantics<parallel>, #tpu.dimension_semantics<parallel>, #tpu.dimension_semantics<arbitrary>], iteration_bounds = array<i64: 1, 1, 1>, scalar_prefetch = 0 : i64, scratch_operands = 1 : i64, tpu.core_type = #tpu.core_type<tc>, window_params = [{transform_indices = @transform_0, window_bounds = array<i64: 112, 256>}, {transform_indices = @transform_1, window_bounds = array<i64: 256, 128>}, {transform_indices = @transform_2, window_bounds = array<i64: 1, 128>}, {transform_indices = @transform_3, window_bounds = array<i64: 112, 128>}]} {
    %c0_i32 = arith.constant 0 : i32
    %0 = arith.cmpi eq, %arg2, %c0_i32 : i32
    %1 = arith.extui %0 : i1 to i32
    %c0_i32_0 = arith.constant 0 : i32
    %2 = arith.cmpi ne, %1, %c0_i32_0 : i32
    scf.if %2 {
      %cst_10 = arith.constant 0.000000e+00 : f32
      %12 = vector.broadcast %cst_10 : f32 to vector<112x128xf32>
      %c0_11 = arith.constant 0 : index
      %c0_12 = arith.constant 0 : index
      %13 = vector.load %arg7[%c0_11, %c0_12] : memref<112x128xf32, #tpu.memory_space<vmem>>, vector<112x128xf32>
      tpu.vector_store %arg7[%c0_11, %c0_12], %12 {strides = array<i32>} : memref<112x128xf32, #tpu.memory_space<vmem>>, vector<112x128xf32>,
    } else {
    }
    %c0 = arith.constant 0 : index
    %c0_1 = arith.constant 0 : index
    %3 = vector.load %arg7[%c0, %c0_1] : memref<112x128xf32, #tpu.memory_space<vmem>>, vector<112x128xf32>
    %c0_2 = arith.constant 0 : index
    %c0_3 = arith.constant 0 : index
    %4 = vector.load %arg3[%c0_2, %c0_3] : memref<112x256xbf16, #tpu.memory_space<vmem>>, vector<112x256xbf16>
    %c0_4 = arith.constant 0 : index
    %c0_5 = arith.constant 0 : index
    %5 = vector.load %arg4[%c0_4, %c0_5] : memref<256x128xbf16, #tpu.memory_space<vmem>>, vector<256x128xbf16>
    %cst = arith.constant dense<0.000000e+00> : vector<112x128xf32>
    %6 = tpu.matmul %4, %5, %cst {dimension_numbers = #tpu.dot_dimension_numbers<[1], [0], [0], [1], [0, 0, 1, 1], [], []>} : vector<112x256xbf16>, vector<256x128xbf16>, vector<112x128xf32> -> vector<112x128xf32>
    %7 = arith.addf %3, %6 : vector<112x128xf32>
    %c0_6 = arith.constant 0 : index
    %c0_7 = arith.constant 0 : index
    %8 = vector.load %arg7[%c0_6, %c0_7] : memref<112x128xf32, #tpu.memory_space<vmem>>, vector<112x128xf32>
    tpu.vector_store %arg7[%c0_6, %c0_7], %7 {strides = array<i32>} : memref<112x128xf32, #tpu.memory_space<vmem>>, vector<112x128xf32>,
    %c0_i32_8 = arith.constant 0 : i32
    %9 = arith.cmpi eq, %arg2, %c0_i32_8 : i32
    %10 = arith.extui %9 : i1 to i32
    %c0_i32_9 = arith.constant 0 : i32
    %11 = arith.cmpi ne, %10, %c0_i32_9 : i32
    scf.if %11 {
      %c0_10 = arith.constant 0 : index
      %c0_11 = arith.constant 0 : index
      %12 = vector.load %arg7[%c0_10, %c0_11] : memref<112x128xf32, #tpu.memory_space<vmem>>, vector<112x128xf32>
      %c0_12 = arith.constant 0 : index
      %c0_13 = arith.constant 0 : index
      %13 = vector.load %arg5[%c0_12, %c0_13] : memref<1x128xf32, #tpu.memory_space<vmem>>, vector<1x128xf32>
      %14 = vector.broadcast %13 : vector<1x128xf32> to vector<112x128xf32>
      %15 = arith.addf %12, %14 : vector<112x128xf32>
      %c0_14 = arith.constant 0 : index
      %c0_15 = arith.constant 0 : index
      %16 = vector.load %arg6[%c0_14, %c0_15] : memref<112x128xf32, #tpu.memory_space<vmem>>, vector<112x128xf32>
      tpu.vector_store %arg6[%c0_14, %c0_15], %15 {strides = array<i32>} : memref<112x128xf32, #tpu.memory_space<vmem>>, vector<112x128xf32>,
    } else {
    }
    return
  }
  func.func @transform_0(%arg0: i32, %arg1: i32, %arg2: i32) -> (i32, i32) {
    %c0_i32 = arith.constant 0 : i32
    return %arg0, %arg2 : i32, i32
  }
  func.func @transform_1(%arg0: i32, %arg1: i32, %arg2: i32) -> (i32, i32) {
    %c0_i32 = arith.constant 0 : i32
    return %arg2, %arg1 : i32, i32
  }
  func.func @transform_2(%arg0: i32, %arg1: i32, %arg2: i32) -> (i32, i32) {
    %c0_i32 = arith.constant 0 : i32
    %c0_i32_0 = arith.constant 0 : i32
    return %c0_i32, %arg1 : i32, i32
  }
  func.func @transform_3(%arg0: i32, %arg1: i32, %arg2: i32) -> (i32, i32) {
    %c0_i32 = arith.constant 0 : i32
    return %arg0, %arg1 : i32, i32
  }
}

module attributes {stable_mosaic.version = 11 : i64} {
  func.func @_gemm_bias_act_kernel(%arg0: i32, %arg1: i32, %arg2: i32, %arg3: memref<128x128xbf16, #tpu.memory_space<vmem>>, %arg4: memref<128x128xbf16, #tpu.memory_space<vmem>>, %arg5: memref<1x128xf32, #tpu.memory_space<vmem>>, %arg6: memref<128x128xf32, #tpu.memory_space<vmem>>, %arg7: memref<128x128xf32, #tpu.memory_space<vmem>>) attributes {dimension_semantics = [#tpu.dimension_semantics<parallel>, #tpu.dimension_semantics<parallel>, #tpu.dimension_semantics<arbitrary>], iteration_bounds = array<i64: 3, 1, 1>, scalar_prefetch = 0 : i64, scratch_operands = 1 : i64, tpu.core_type = #tpu.core_type<tc>, window_params = [{transform_indices = @transform_0, window_bounds = array<i64: 128, 128>}, {transform_indices = @transform_1, window_bounds = array<i64: 128, 128>}, {transform_indices = @transform_2, window_bounds = array<i64: 1, 128>}, {transform_indices = @transform_3, window_bounds = array<i64: 128, 128>}]} {
    %c0_i32 = arith.constant 0 : i32
    %0 = arith.cmpi eq, %arg2, %c0_i32 : i32
    %1 = arith.extui %0 : i1 to i32
    %c0_i32_0 = arith.constant 0 : i32
    %2 = arith.cmpi ne, %1, %c0_i32_0 : i32
    scf.if %2 {
      %cst_10 = arith.constant 0.000000e+00 : f32
      %12 = vector.broadcast %cst_10 : f32 to vector<128x128xf32>
      %c0_11 = arith.constant 0 : index
      %c0_12 = arith.constant 0 : index
      %13 = vector.load %arg7[%c0_11, %c0_12] : memref<128x128xf32, #tpu.memory_space<vmem>>, vector<128x128xf32>
      tpu.vector_store %arg7[%c0_11, %c0_12], %12 {strides = array<i32>} : memref<128x128xf32, #tpu.memory_space<vmem>>, vector<128x128xf32>,
    } else {
    }
    %c0 = arith.constant 0 : index
    %c0_1 = arith.constant 0 : index
    %3 = vector.load %arg7[%c0, %c0_1] : memref<128x128xf32, #tpu.memory_space<vmem>>, vector<128x128xf32>
    %c0_2 = arith.constant 0 : index
    %c0_3 = arith.constant 0 : index
    %4 = vector.load %arg3[%c0_2, %c0_3] : memref<128x128xbf16, #tpu.memory_space<vmem>>, vector<128x128xbf16>
    %c0_4 = arith.constant 0 : index
    %c0_5 = arith.constant 0 : index
    %5 = vector.load %arg4[%c0_4, %c0_5] : memref<128x128xbf16, #tpu.memory_space<vmem>>, vector<128x128xbf16>
    %cst = arith.constant dense<0.000000e+00> : vector<128x128xf32>
    %6 = tpu.matmul %4, %5, %cst {dimension_numbers = #tpu.dot_dimension_numbers<[1], [0], [0], [1], [0, 0, 1, 1], [], []>} : vector<128x128xbf16>, vector<128x128xbf16>, vector<128x128xf32> -> vector<128x128xf32>
    %7 = arith.addf %3, %6 : vector<128x128xf32>
    %c0_6 = arith.constant 0 : index
    %c0_7 = arith.constant 0 : index
    %8 = vector.load %arg7[%c0_6, %c0_7] : memref<128x128xf32, #tpu.memory_space<vmem>>, vector<128x128xf32>
    tpu.vector_store %arg7[%c0_6, %c0_7], %7 {strides = array<i32>} : memref<128x128xf32, #tpu.memory_space<vmem>>, vector<128x128xf32>,
    %c0_i32_8 = arith.constant 0 : i32
    %9 = arith.cmpi eq, %arg2, %c0_i32_8 : i32
    %10 = arith.extui %9 : i1 to i32
    %c0_i32_9 = arith.constant 0 : i32
    %11 = arith.cmpi ne, %10, %c0_i32_9 : i32
    scf.if %11 {
      %c0_10 = arith.constant 0 : index
      %c0_11 = arith.constant 0 : index
      %12 = vector.load %arg7[%c0_10, %c0_11] : memref<128x128xf32, #tpu.memory_space<vmem>>, vector<128x128xf32>
      %c0_12 = arith.constant 0 : index
      %c0_13 = arith.constant 0 : index
      %13 = vector.load %arg5[%c0_12, %c0_13] : memref<1x128xf32, #tpu.memory_space<vmem>>, vector<1x128xf32>
      %14 = vector.broadcast %13 : vector<1x128xf32> to vector<128x128xf32>
      %15 = arith.addf %12, %14 : vector<128x128xf32>
      %c0_14 = arith.constant 0 : index
      %c0_15 = arith.constant 0 : index
      %16 = vector.load %arg6[%c0_14, %c0_15] : memref<128x128xf32, #tpu.memory_space<vmem>>, vector<128x128xf32>
      tpu.vector_store %arg6[%c0_14, %c0_15], %15 {strides = array<i32>} : memref<128x128xf32, #tpu.memory_space<vmem>>, vector<128x128xf32>,
    } else {
    }
    return
  }
  func.func @transform_0(%arg0: i32, %arg1: i32, %arg2: i32) -> (i32, i32) {
    %c0_i32 = arith.constant 0 : i32
    return %arg0, %arg2 : i32, i32
  }
  func.func @transform_1(%arg0: i32, %arg1: i32, %arg2: i32) -> (i32, i32) {
    %c0_i32 = arith.constant 0 : i32
    return %arg2, %arg1 : i32, i32
  }
  func.func @transform_2(%arg0: i32, %arg1: i32, %arg2: i32) -> (i32, i32) {
    %c0_i32 = arith.constant 0 : i32
    %c0_i32_0 = arith.constant 0 : i32
    return %c0_i32, %arg1 : i32, i32
  }
  func.func @transform_3(%arg0: i32, %arg1: i32, %arg2: i32) -> (i32, i32) {
    %c0_i32 = arith.constant 0 : i32
    return %arg0, %arg1 : i32, i32
  }
}

module attributes {stable_mosaic.version = 11 : i64} {
  func.func @_gemm_bias_act_kernel(%arg0: i32, %arg1: i32, %arg2: i32, %arg3: memref<256x128xbf16, #tpu.memory_space<vmem>>, %arg4: memref<128x128xbf16, #tpu.memory_space<vmem>>, %arg5: memref<1x128xf32, #tpu.memory_space<vmem>>, %arg6: memref<256x128xf32, #tpu.memory_space<vmem>>, %arg7: memref<256x128xf32, #tpu.memory_space<vmem>>) attributes {dimension_semantics = [#tpu.dimension_semantics<parallel>, #tpu.dimension_semantics<parallel>, #tpu.dimension_semantics<arbitrary>], iteration_bounds = array<i64: 5, 1, 1>, scalar_prefetch = 0 : i64, scratch_operands = 1 : i64, tpu.core_type = #tpu.core_type<tc>, window_params = [{transform_indices = @transform_0, window_bounds = array<i64: 256, 128>}, {transform_indices = @transform_1, window_bounds = array<i64: 128, 128>}, {transform_indices = @transform_2, window_bounds = array<i64: 1, 128>}, {transform_indices = @transform_3, window_bounds = array<i64: 256, 128>}]} {
    %c0_i32 = arith.constant 0 : i32
    %0 = arith.cmpi eq, %arg2, %c0_i32 : i32
    %1 = arith.extui %0 : i1 to i32
    %c0_i32_0 = arith.constant 0 : i32
    %2 = arith.cmpi ne, %1, %c0_i32_0 : i32
    scf.if %2 {
      %cst_10 = arith.constant 0.000000e+00 : f32
      %12 = vector.broadcast %cst_10 : f32 to vector<256x128xf32>
      %c0_11 = arith.constant 0 : index
      %c0_12 = arith.constant 0 : index
      %13 = vector.load %arg7[%c0_11, %c0_12] : memref<256x128xf32, #tpu.memory_space<vmem>>, vector<256x128xf32>
      tpu.vector_store %arg7[%c0_11, %c0_12], %12 {strides = array<i32>} : memref<256x128xf32, #tpu.memory_space<vmem>>, vector<256x128xf32>,
    } else {
    }
    %c0 = arith.constant 0 : index
    %c0_1 = arith.constant 0 : index
    %3 = vector.load %arg7[%c0, %c0_1] : memref<256x128xf32, #tpu.memory_space<vmem>>, vector<256x128xf32>
    %c0_2 = arith.constant 0 : index
    %c0_3 = arith.constant 0 : index
    %4 = vector.load %arg3[%c0_2, %c0_3] : memref<256x128xbf16, #tpu.memory_space<vmem>>, vector<256x128xbf16>
    %c0_4 = arith.constant 0 : index
    %c0_5 = arith.constant 0 : index
    %5 = vector.load %arg4[%c0_4, %c0_5] : memref<128x128xbf16, #tpu.memory_space<vmem>>, vector<128x128xbf16>
    %cst = arith.constant dense<0.000000e+00> : vector<256x128xf32>
    %6 = tpu.matmul %4, %5, %cst {dimension_numbers = #tpu.dot_dimension_numbers<[1], [0], [0], [1], [0, 0, 1, 1], [], []>} : vector<256x128xbf16>, vector<128x128xbf16>, vector<256x128xf32> -> vector<256x128xf32>
    %7 = arith.addf %3, %6 : vector<256x128xf32>
    %c0_6 = arith.constant 0 : index
    %c0_7 = arith.constant 0 : index
    %8 = vector.load %arg7[%c0_6, %c0_7] : memref<256x128xf32, #tpu.memory_space<vmem>>, vector<256x128xf32>
    tpu.vector_store %arg7[%c0_6, %c0_7], %7 {strides = array<i32>} : memref<256x128xf32, #tpu.memory_space<vmem>>, vector<256x128xf32>,
    %c0_i32_8 = arith.constant 0 : i32
    %9 = arith.cmpi eq, %arg2, %c0_i32_8 : i32
    %10 = arith.extui %9 : i1 to i32
    %c0_i32_9 = arith.constant 0 : i32
    %11 = arith.cmpi ne, %10, %c0_i32_9 : i32
    scf.if %11 {
      %c0_10 = arith.constant 0 : index
      %c0_11 = arith.constant 0 : index
      %12 = vector.load %arg7[%c0_10, %c0_11] : memref<256x128xf32, #tpu.memory_space<vmem>>, vector<256x128xf32>
      %c0_12 = arith.constant 0 : index
      %c0_13 = arith.constant 0 : index
      %13 = vector.load %arg5[%c0_12, %c0_13] : memref<1x128xf32, #tpu.memory_space<vmem>>, vector<1x128xf32>
      %14 = vector.broadcast %13 : vector<1x128xf32> to vector<256x128xf32>
      %15 = arith.addf %12, %14 : vector<256x128xf32>
      %c0_14 = arith.constant 0 : index
      %c0_15 = arith.constant 0 : index
      %16 = vector.load %arg6[%c0_14, %c0_15] : memref<256x128xf32, #tpu.memory_space<vmem>>, vector<256x128xf32>
      tpu.vector_store %arg6[%c0_14, %c0_15], %15 {strides = array<i32>} : memref<256x128xf32, #tpu.memory_space<vmem>>, vector<256x128xf32>,
    } else {
    }
    return
  }
  func.func @transform_0(%arg0: i32, %arg1: i32, %arg2: i32) -> (i32, i32) {
    %c0_i32 = arith.constant 0 : i32
    return %arg0, %arg2 : i32, i32
  }
  func.func @transform_1(%arg0: i32, %arg1: i32, %arg2: i32) -> (i32, i32) {
    %c0_i32 = arith.constant 0 : i32
    return %arg2, %arg1 : i32, i32
  }
  func.func @transform_2(%arg0: i32, %arg1: i32, %arg2: i32) -> (i32, i32) {
    %c0_i32 = arith.constant 0 : i32
    %c0_i32_0 = arith.constant 0 : i32
    return %c0_i32, %arg1 : i32, i32
  }
  func.func @transform_3(%arg0: i32, %arg1: i32, %arg2: i32) -> (i32, i32) {
    %c0_i32 = arith.constant 0 : i32
    return %arg0, %arg1 : i32, i32
  }
}

module attributes {stable_mosaic.version = 11 : i64} {
  func.func @_gemm_bias_act_kernel(%arg0: i32, %arg1: i32, %arg2: i32, %arg3: memref<512x128xbf16, #tpu.memory_space<vmem>>, %arg4: memref<128x128xbf16, #tpu.memory_space<vmem>>, %arg5: memref<1x128xf32, #tpu.memory_space<vmem>>, %arg6: memref<512x128xf32, #tpu.memory_space<vmem>>, %arg7: memref<512x128xf32, #tpu.memory_space<vmem>>) attributes {dimension_semantics = [#tpu.dimension_semantics<parallel>, #tpu.dimension_semantics<parallel>, #tpu.dimension_semantics<arbitrary>], iteration_bounds = array<i64: 8, 1, 1>, scalar_prefetch = 0 : i64, scratch_operands = 1 : i64, tpu.core_type = #tpu.core_type<tc>, window_params = [{transform_indices = @transform_0, window_bounds = array<i64: 512, 128>}, {transform_indices = @transform_1, window_bounds = array<i64: 128, 128>}, {transform_indices = @transform_2, window_bounds = array<i64: 1, 128>}, {transform_indices = @transform_3, window_bounds = array<i64: 512, 128>}]} {
    %c0_i32 = arith.constant 0 : i32
    %0 = arith.cmpi eq, %arg2, %c0_i32 : i32
    %1 = arith.extui %0 : i1 to i32
    %c0_i32_0 = arith.constant 0 : i32
    %2 = arith.cmpi ne, %1, %c0_i32_0 : i32
    scf.if %2 {
      %cst_10 = arith.constant 0.000000e+00 : f32
      %12 = vector.broadcast %cst_10 : f32 to vector<512x128xf32>
      %c0_11 = arith.constant 0 : index
      %c0_12 = arith.constant 0 : index
      %13 = vector.load %arg7[%c0_11, %c0_12] : memref<512x128xf32, #tpu.memory_space<vmem>>, vector<512x128xf32>
      tpu.vector_store %arg7[%c0_11, %c0_12], %12 {strides = array<i32>} : memref<512x128xf32, #tpu.memory_space<vmem>>, vector<512x128xf32>,
    } else {
    }
    %c0 = arith.constant 0 : index
    %c0_1 = arith.constant 0 : index
    %3 = vector.load %arg7[%c0, %c0_1] : memref<512x128xf32, #tpu.memory_space<vmem>>, vector<512x128xf32>
    %c0_2 = arith.constant 0 : index
    %c0_3 = arith.constant 0 : index
    %4 = vector.load %arg3[%c0_2, %c0_3] : memref<512x128xbf16, #tpu.memory_space<vmem>>, vector<512x128xbf16>
    %c0_4 = arith.constant 0 : index
    %c0_5 = arith.constant 0 : index
    %5 = vector.load %arg4[%c0_4, %c0_5] : memref<128x128xbf16, #tpu.memory_space<vmem>>, vector<128x128xbf16>
    %cst = arith.constant dense<0.000000e+00> : vector<512x128xf32>
    %6 = tpu.matmul %4, %5, %cst {dimension_numbers = #tpu.dot_dimension_numbers<[1], [0], [0], [1], [0, 0, 1, 1], [], []>} : vector<512x128xbf16>, vector<128x128xbf16>, vector<512x128xf32> -> vector<512x128xf32>
    %7 = arith.addf %3, %6 : vector<512x128xf32>
    %c0_6 = arith.constant 0 : index
    %c0_7 = arith.constant 0 : index
    %8 = vector.load %arg7[%c0_6, %c0_7] : memref<512x128xf32, #tpu.memory_space<vmem>>, vector<512x128xf32>
    tpu.vector_store %arg7[%c0_6, %c0_7], %7 {strides = array<i32>} : memref<512x128xf32, #tpu.memory_space<vmem>>, vector<512x128xf32>,
    %c0_i32_8 = arith.constant 0 : i32
    %9 = arith.cmpi eq, %arg2, %c0_i32_8 : i32
    %10 = arith.extui %9 : i1 to i32
    %c0_i32_9 = arith.constant 0 : i32
    %11 = arith.cmpi ne, %10, %c0_i32_9 : i32
    scf.if %11 {
      %c0_10 = arith.constant 0 : index
      %c0_11 = arith.constant 0 : index
      %12 = vector.load %arg7[%c0_10, %c0_11] : memref<512x128xf32, #tpu.memory_space<vmem>>, vector<512x128xf32>
      %c0_12 = arith.constant 0 : index
      %c0_13 = arith.constant 0 : index
      %13 = vector.load %arg5[%c0_12, %c0_13] : memref<1x128xf32, #tpu.memory_space<vmem>>, vector<1x128xf32>
      %14 = vector.broadcast %13 : vector<1x128xf32> to vector<512x128xf32>
      %15 = arith.addf %12, %14 : vector<512x128xf32>
      %16 = math.tanh %15 : vector<512x128xf32>
      %c0_14 = arith.constant 0 : index
      %c0_15 = arith.constant 0 : index
      %17 = vector.load %arg6[%c0_14, %c0_15] : memref<512x128xf32, #tpu.memory_space<vmem>>, vector<512x128xf32>
      tpu.vector_store %arg6[%c0_14, %c0_15], %16 {strides = array<i32>} : memref<512x128xf32, #tpu.memory_space<vmem>>, vector<512x128xf32>,
    } else {
    }
    return
  }
  func.func @transform_0(%arg0: i32, %arg1: i32, %arg2: i32) -> (i32, i32) {
    %c0_i32 = arith.constant 0 : i32
    return %arg0, %arg2 : i32, i32
  }
  func.func @transform_1(%arg0: i32, %arg1: i32, %arg2: i32) -> (i32, i32) {
    %c0_i32 = arith.constant 0 : i32
    return %arg2, %arg1 : i32, i32
  }
  func.func @transform_2(%arg0: i32, %arg1: i32, %arg2: i32) -> (i32, i32) {
    %c0_i32 = arith.constant 0 : i32
    %c0_i32_0 = arith.constant 0 : i32
    return %c0_i32, %arg1 : i32, i32
  }
  func.func @transform_3(%arg0: i32, %arg1: i32, %arg2: i32) -> (i32, i32) {
    %c0_i32 = arith.constant 0 : i32
    return %arg0, %arg1 : i32, i32
  }
}

</mosaic_0001>

<bundles_post_ra>
// kernel: layered_neural_renderer_forward.18
= control target key start
LH: loop header
LB: loop body
LE: loop exit
PB: predicated region body
PF: predicated region fallthrough
CT: control target
= control target key end

     0   :  { %8 = vsyncpa [#allocation4], 0  ;;  %s674_s0 = inlined_call_operand.vmem [shape: bf16[16,512], index: 0, kind: input, shape index: {}]   ;;  %s675_s1 = inlined_call_operand.hbm [shape: bf16[512,128], index: 1, kind: input, shape index: {}]   ;;  %s676_s2 = inlined_call_operand.hbm [shape: f32[1,128], index: 2, kind: input, shape index: {}]   ;;  %s677_s3 = inlined_call_operand.vmem [shape: f32[16,128], index: 3, kind: output, shape index: {}]  }
   0x1   :  { %9 = vsyncpa [#allocation6], 0  ;;  %s608_s12 = smov [#allocation3]   ;;  %s560_s16 = scalar_lea.hbm %s675_s1, 4096 }
   0x2   :  { %s17_s13 = sshll.u32 %s608_s12, 4  ;;  %p561_p0 = scmp.ne.s32.totalorder %s675_s1, %s560_s16  ;;  %s18_s13 = int_to_ptr.vmem [resolvable:$true] %s17_s13 }
   0x3   :  { %p564_p1 = scmp.lt.u32.totalorder %s560_s16, %s675_s1 }
   0x5   :  { %p566_p2 = pnand %p564_p1, %p561_p0 }
   0x7   :  { %569 = shalt.err (!%p566_p2)
}
   0x8   :  { %s570_s21 = scalar_lea.vmem %s18_s13, 4096  ;;  %p575_p4 = scmp.lt.s32.totalorder %s18_s13, %s18_s13 }
   0x9   :  { %p571_p3 = scmp.ne.s32.totalorder %s18_s13, %s570_s21  ;;  %p576_p5 = scmp.lt.s32.totalorder %s570_s21, %s570_s21 }
   0xb   :  { %p577_p6 = por %p576_p5, %p575_p4 }
   0xd   :  { %p578_p7 = pnand %p577_p6, %p571_p3 }
   0xf   :  { %581 = shalt.err (!%p578_p7)
}
  0x10   :  { %s609_s22 = smov 64   ;;  %s610_s23 = smov 4  }
  0x11   :  { %23 = dma.hbm_to_vmem [thread:$0]  %s675_s1, 4096, %s18_s13, [#allocation4], %s609_s22, %s609_s22, %s610_s23  }
  0x12   :  { %s611_s26 = smov [#allocation5]   ;;  %s582_s30 = scalar_lea.hbm %s676_s2, 16 }
  0x13   :  { %s30_s27 = sshll.u32 %s611_s26, 4  ;;  %p583_p8 = scmp.ne.s32.totalorder %s676_s2, %s582_s30  ;;  %s31_s27 = int_to_ptr.vmem [resolvable:$true] %s30_s27 }
  0x14   :  { %p586_p9 = scmp.lt.u32.totalorder %s582_s30, %s676_s2 }
  0x16   :  { %p588_p10 = pnand %p586_p9, %p583_p8 }
  0x18   :  { %591 = shalt.err (!%p588_p10)
}
  0x19   :  { %s592_s8 = scalar_lea.vmem %s31_s27, 16  ;;  %s596_s1 = scalar_lea.vmem %s31_s27, 32 }
  0x1a   :  { %p593_p11 = scmp.ne.s32.totalorder %s31_s27, %s592_s8  ;;  %p597_p12 = scmp.lt.s32.totalorder %s31_s27, %s31_s27 }
  0x1b   :  { %p598_p13 = scmp.lt.s32.totalorder %s596_s1, %s592_s8 }
  0x1d   :  { %p599_p0 = por %p598_p13, %p597_p12 }
  0x1f   :  { %p600_p1 = pnand %p599_p0, %p593_p11 }
  0x21   :  { %603 = shalt.err (!%p600_p1)
}
  0x22   :  { %33 = dma.hbm_to_vmem [thread:$0]  %s676_s2, 16, %s31_s27, [#allocation6]  }
  0x23   :  { %604 = dma.done.wait [#allocation4], 4096  }
  0x24   :  { %605 = vsyncadd [#allocation4], 4294963200 }
  0x25   :  { %606 = dma.done.wait [#allocation6], 16  }
  0x26   :  { %607 = vsyncadd [#allocation6], 4294967280  ;;  %v522_v0 = vld [vmem:[#allocation3 + $0x40] sm:$0xff]   ;;  %v526_v4 = vld [vmem:[#allocation3 + $0x48] sm:$0xff]  }
  0x27   :  { %v523_v1 = vld [vmem:[#allocation3 + $0xc0] sm:$0xff]   ;;  %474 = vmatprep.subr.bf16.mxu0 %v522_v0  ;;  %v527_v5 = vld [vmem:[#allocation3 + $0xc8] sm:$0xff]   ;;  %v530_v8 = vld [vmem:[#allocation3 + $0x50] sm:$0xff]  }
  0x28   :  { %v524_v2 = vld [vmem:[#allocation3] sm:$0xff]   ;;  %496 = vmatprep.subr.bf16.mxu1 %v523_v1  ;;  %v528_v6 = vld [vmem:[#allocation3 + $0x8] sm:$0xff]   ;;  %v531_v9 = vld [vmem:[#allocation3 + $0xd0] sm:$0xff]  }
  0x29   :  { %v525_v3 = vld [vmem:[#allocation3 + $0x80] sm:$0xff]   ;;  %475 = vmatpush3.bf16.msra.mxu0 %v524_v2  ;;  %v529_v7 = vld [vmem:[#allocation3 + $0x88] sm:$0xff]   ;;  %v532_v10 = vld [vmem:[#allocation3 + $0x10] sm:$0xff]  }
  0x2a   :  { %497 = vmatpush3.bf16.msra.mxu1 %v525_v3  ;;  %476 = vmatprep.subr.bf16.mxu0 %v526_v4  ;;  %v533_v11 = vld [vmem:[#allocation3 + $0x90] sm:$0xff]   ;;  %v534_v12 = vld [vmem:[#allocation3 + $0x58] sm:$0xff]   ;;  %v538_v16 = vld [vmem:[#allocation3 + $0x60] sm:$0xff]  }
  0x2b   :  { %498 = vmatprep.subr.bf16.mxu1 %v527_v5  ;;  %v535_v13 = vld [vmem:[#allocation3 + $0xd8] sm:$0xff]   ;;  %v539_v17 = vld [vmem:[#allocation3 + $0xe0] sm:$0xff]   ;;  %v542_v20 = vld [vmem:[#allocation3 + $0x68] sm:$0xff]  }
  0x2c   :  { %v536_v14 = vld [vmem:[#allocation3 + $0x18] sm:$0xff]   ;;  %v540_v18 = vld [vmem:[#allocation3 + $0x20] sm:$0xff]   ;;  %v543_v21 = vld [vmem:[#allocation3 + $0xe8] sm:$0xff]  }
  0x2d   :  { %477 = vmatpush3.bf16.msra.mxu0 %v528_v6  ;;  %v537_v15 = vld [vmem:[#allocation3 + $0x98] sm:$0xff]   ;;  %v541_v19 = vld [vmem:[#allocation3 + $0xa0] sm:$0xff]   ;;  %v544_v22 = vld [vmem:[#allocation3 + $0x28] sm:$0xff]  }
  0x2e   :  { %499 = vmatpush3.bf16.msra.mxu1 %v529_v7  ;;  %478 = vmatprep.subr.bf16.mxu0 %v530_v8  ;;  %v545_v23 = vld [vmem:[#allocation3 + $0xa8] sm:$0xff]   ;;  %v546_v24 = vld [vmem:[#allocation3 + $0x70] sm:$0xff]   ;;  %v550_v28 = vld [vmem:[#allocation3 + $0x78] sm:$0xff]  }
  0x2f   :  { %500 = vmatprep.subr.bf16.mxu1 %v531_v9  ;;  %v547_v25 = vld [vmem:[#allocation3 + $0xf0] sm:$0xff]   ;;  %v551_v29 = vld [vmem:[#allocation3 + $0xf8] sm:$0xff]   ;;  %v473_v45 = vld [vmem:[#allocation5] ss:$0 sm:$0xff] }
  0x30   :  { %v548_v26 = vld [vmem:[#allocation3 + $0x30] sm:$0xff]   ;;  %v552_v30 = vld [vmem:[#allocation3 + $0x38] sm:$0xff]  }
  0x31   :  { %479 = vmatpush3.bf16.msra.mxu0 %v532_v10  ;;  %v549_v27 = vld [vmem:[#allocation3 + $0xb0] sm:$0xff]   ;;  %v553_v31 = vld [vmem:[#allocation3 + $0xb8] sm:$0xff]  }
  0x32   :  { %501 = vmatpush3.bf16.msra.mxu1 %v533_v11  ;;  %480 = vmatprep.subr.bf16.mxu0 %v534_v12  ;;  %v554_v32 = vld [vmem:[%s674_s0] ss:$16 sps:$4 sm:$0xff]   ;;  %v556_v33 = vld [vmem:[%s674_s0 + $0x4] ss:$16 sps:$4 sm:$0xff]   ;;  %v557_v34 = vld [vmem:[%s674_s0 + $0x8] ss:$16 sps:$4 sm:$0xff]  }
  0x33   :  { %502 = vmatprep.subr.bf16.mxu1 %v535_v13  ;;  %v559_v35 = vld [vmem:[%s674_s0 + $0xc] ss:$16 sps:$4 sm:$0xff]   ;;  %361 = vmatprep.mubr.bf16.mxu0 %v556_v33 }
  0x34   :  { %402 = vmatprep.mubr.bf16.mxu1 %v559_v35 }
  0x35   :  { %481 = vmatpush3.bf16.msra.mxu0 %v536_v14 }
  0x36   :  { %503 = vmatpush3.bf16.msra.mxu1 %v537_v15  ;;  %482 = vmatprep.subr.bf16.mxu0 %v538_v16 }
  0x37   :  { %504 = vmatprep.subr.bf16.mxu1 %v539_v17 }
  0x39   :  { %483 = vmatpush3.bf16.msra.mxu0 %v540_v18 }
  0x3a   :  { %505 = vmatpush3.bf16.msra.mxu1 %v541_v19  ;;  %484 = vmatprep.subr.bf16.mxu0 %v542_v20 }
  0x3b   :  { %506 = vmatprep.subr.bf16.mxu1 %v543_v21 }
  0x3d   :  { %485 = vmatpush3.bf16.msra.mxu0 %v544_v22 }
  0x3e   :  { %507 = vmatpush3.bf16.msra.mxu1 %v545_v23  ;;  %486 = vmatprep.subr.bf16.mxu0 %v546_v24 }
  0x3f   :  { %508 = vmatprep.subr.bf16.mxu1 %v547_v25 }
  0x41   :  { %487 = vmatpush3.bf16.msra.mxu0 %v548_v26 }
  0x42   :  { %509 = vmatpush3.bf16.msra.mxu1 %v549_v27  ;;  %488 = vmatprep.subr.bf16.mxu0 %v550_v28 }
  0x43   :  { %510 = vmatprep.subr.bf16.mxu1 %v551_v29 }
  0x45   :  { %489 = vmatpush3.bf16.msra.mxu0 %v552_v30 }
  0x46   :  { %511 = vmatpush3.bf16.msra.mxu1 %v553_v31 }
  0x48   :  { %362 = vmatmul.mubr.bf16.vlgmr.msra.gmra.mrb[0].mxu0 %v554_v32 }
  0x49   :  { %403 = vmatmul.mubr.bf16.vlgmr.msra.gmra.mrb[0].mxu1 %v557_v34 }
 0x11b   :  { %v490_v36 = vpop.f32.mrb[0].mxu0 }
 0x11c   :  { %v512_v37 = vpop.f32.mrb[0].mxu1  ;;  %v491_v38 = vpop.f32.mrb[1].mxu0 }
 0x11d   :  { %v492_v39 = vadd.f32 %v491_v38, %v490_v36  ;;  %v513_v40 = vpop.f32.mrb[1].mxu1  ;;  %v493_v41 = vpop.f32.mrb[2].mxu0 }
 0x11e   :  { %v514_v42 = vadd.f32 %v513_v40, %v512_v37  ;;  %v515_v43 = vpop.f32.mrb[2].mxu1  ;;  %v494_v44 = vpop.f32.mrb[3].mxu0 }
 0x11f   :  { %v495_v46 = vadd.f32 %v494_v44, %v493_v41  ;;  %v516_v47 = vpop.f32.mrb[3].mxu1 }
 0x120   :  { %v405_v48 = vadd.f32 %v514_v42, %v492_v39  ;;  %v517_v49 = vadd.f32 %v516_v47, %v515_v43 }
 0x122   :  { %v427_v50 = vadd.f32 %v473_v45, %v405_v48  ;;  %v408_v51 = vadd.f32 %v517_v49, %v495_v46 }
 0x124   :  { %429 = vst [vmem:[%s677_s3] sm:$0xff] %v427_v50  ;;  %v428_v52 = vadd.f32 %v473_v45, %v408_v51 }
 0x126   :  { %430 = vst [vmem:[%s677_s3 + $0x8] sm:$0xff] %v428_v52 }
 0x127   :  { %435 = vsyncpa [#allocation4], 1 }
 0x128   :  { %436 = vsyncpa [#allocation6], 1 }

// kernel: layered_neural_renderer_forward.13
= control target key start
LH: loop header
LB: loop body
LE: loop exit
PB: predicated region body
PF: predicated region fallthrough
CT: control target
= control target key end

     0   :  { %s1804_s12 = smov 0   ;;  %s1806_s13 = smov 0   ;;  %s2034_s0 = inlined_call_operand.vmem [shape: bf16[1024,128], index: 0, kind: input, shape index: {}]   ;;  %s2035_s1 = inlined_call_operand.vmem [shape: bf16[128,128], index: 1, kind: input, shape index: {}]   ;;  %s2036_s2 = inlined_call_operand.vmem [shape: f32[1,128], index: 2, kind: input, shape index: {}]   ;;  %s2037_s3 = inlined_call_operand.vmem [shape: f32[1024,128], index: 3, kind: output, shape index: {}]  }
   0x1   :  { %s1808_s14 = smov 0  }
   0x2 LB: > { %s32_s15 = sadd.s32 1, %s1778_s13  ;;  %p1512_p0 = scmp.ge.s32.totalorder %s1782_s14, 1  ;;  %s1782_s14 = sphi %s1808_s14, %s13_s14   ;;  %s1778_s13 = sphi %s1806_s13, %s2039_s13   ;;  %s1774_s12 = sphi %s1804_s12, %s2038_s12  }
   0x3   : > { %p34_p1 = scmp.ge.s32.totalorder %s32_s15, 2  ;;  %p188_p2 = scmp.lt.s32.totalorder %s1782_s14, 3 }
   0x5   : > { %s2041_s15 = smov (%p34_p1, %s32_s15), 0  ;;  %p189_p3 = pnand %p1512_p0, %p188_p2 }
   0x6   : > { %v1720_v0 = vld [vmem:[%s2035_s1] sm:$0xff] (!%p189_p3)   ;;  %s1513_s18 = sshll.u32 (!%p189_p3), %s1774_s12, 6  ;;  %v1721_v1 = vld [vmem:[%s2035_s1 + $0x8] sm:$0xff] (!%p189_p3)   ;;  %v1722_v2 = vld [vmem:[%s2035_s1 + $0x10] sm:$0xff] (!%p189_p3)  }
   0x7   : > { %192 = sbr.rel (%p189_p3) target bundleno = 315 (0x13b), region = 32  ;;  %p230_p4 = scmp.lt.s32.totalorder (!%p189_p3), %s1513_s18, 127  ;;  %1600 = vmatprep.subr.bf16.mxu0 (!%p189_p3), %v1720_v0  ;;  %1680 = vmatprep.subr.bf16.mxu1 (!%p189_p3), %v1720_v0  ;;  %v1723_v3 = vld [vmem:[%s2035_s1 + $0x18] sm:$0xff] (!%p189_p3)   ;;  %v1724_v6 = vld [vmem:[%s2035_s1 + $0x20] sm:$0xff] (!%p189_p3)   ;;  %v1725_v7 = vld [vmem:[%s2035_s1 + $0x28] sm:$0xff] (!%p189_p3)  }
   0x8   : > { %1601 = vmatpush3.bf16.msra.mxu0 (!%p189_p3), %v1720_v0  ;;  %1688 = vmatpush3.bf16.msra.mxu1 (!%p189_p3), %v1720_v0  ;;  %v1726_v8 = vld [vmem:[%s2035_s1 + $0x30] sm:$0xff] (!%p189_p3)   ;;  %v1727_v9 = vld [vmem:[%s2035_s1 + $0x38] sm:$0xff] (!%p189_p3)   ;;  %v1889_v40 = vld [vmem:[%s2036_s2] ss:$0 sm:$0xff] (!%p189_p3) }
   0x9   : > { %1602 = vmatprep.subr.bf16.mxu0 (!%p189_p3), %v1721_v1  ;;  %1681 = vmatprep.subr.bf16.mxu1 (!%p189_p3), %v1721_v1 }
   0xc   : > { %1603 = vmatpush3.bf16.msra.mxu0 (!%p189_p3), %v1721_v1  ;;  %1689 = vmatpush3.bf16.msra.mxu1 (!%p189_p3), %v1721_v1 }
   0xd   : > { %1604 = vmatprep.subr.bf16.mxu0 (!%p189_p3), %v1722_v2  ;;  %1682 = vmatprep.subr.bf16.mxu1 (!%p189_p3), %v1722_v2 }
   0xe   : > { %s2043_s18 = smov (!%p230_p4, %s1513_s18), 127 }
   0xf   : > { %s1514_s23 = sshll.u32 %s2043_s18, 2  ;;  %s1516_s12 = sshll.u32 %s2043_s18, 3 }
  0x10   : > { %s1837_s26 = scalar_lea.vmem %s2034_s0, %s1514_s23  ;;  %1605 = vmatpush3.bf16.msra.mxu0 %v1722_v2  ;;  %1690 = vmatpush3.bf16.msra.mxu1 %v1722_v2  ;;  %s1897_s19 = scalar_lea.vmem %s2037_s3, %s1516_s12 }
  0x11   : > { %v1728_v4 = vld [vmem:[%s1837_s26] sm:$0xff]   ;;  %1606 = vmatprep.subr.bf16.mxu0 %v1723_v3  ;;  %1683 = vmatprep.subr.bf16.mxu1 %v1723_v3  ;;  %v1730_v10 = vld [vmem:[%s1837_s26 + $0x8] sm:$0xff]   ;;  %v1732_v12 = vld [vmem:[%s1837_s26 + $0x10] sm:$0xff]  }
  0x12   : > { %v1729_v5 = vld [vmem:[%s1837_s26 + $0x80] sm:$0xff]   ;;  %1616 = vmatprep.mubr.bf16.mxu0 %v1728_v4  ;;  %v1731_v11 = vld [vmem:[%s1837_s26 + $0x88] sm:$0xff]   ;;  %v1733_v13 = vld [vmem:[%s1837_s26 + $0x90] sm:$0xff]  }
  0x13   : > { %1648 = vmatprep.mubr.bf16.mxu1 %v1729_v5  ;;  %v1734_v14 = vld [vmem:[%s1837_s26 + $0x18] sm:$0xff]   ;;  %v1736_v16 = vld [vmem:[%s1837_s26 + $0x20] sm:$0xff]   ;;  %v1738_v18 = vld [vmem:[%s1837_s26 + $0x28] sm:$0xff]  }
  0x14   : > { %1607 = vmatpush3.bf16.msra.mxu0 %v1723_v3  ;;  %1691 = vmatpush3.bf16.msra.mxu1 %v1723_v3  ;;  %v1735_v15 = vld [vmem:[%s1837_s26 + $0x98] sm:$0xff]   ;;  %v1737_v17 = vld [vmem:[%s1837_s26 + $0xa0] sm:$0xff]   ;;  %v1739_v19 = vld [vmem:[%s1837_s26 + $0xa8] sm:$0xff]  }
  0x15   : > { %1608 = vmatprep.subr.bf16.mxu0 %v1724_v6  ;;  %1684 = vmatprep.subr.bf16.mxu1 %v1724_v6  ;;  %v1740_v20 = vld [vmem:[%s1837_s26 + $0x30] sm:$0xff]   ;;  %v1742_v22 = vld [vmem:[%s1837_s26 + $0x38] sm:$0xff]   ;;  %v1744_v24 = vld [vmem:[%s1837_s26 + $0x40] sm:$0xff]  }
  0x16   : > { %v1741_v21 = vld [vmem:[%s1837_s26 + $0xb0] sm:$0xff]   ;;  %v1743_v23 = vld [vmem:[%s1837_s26 + $0xb8] sm:$0xff]   ;;  %v1745_v25 = vld [vmem:[%s1837_s26 + $0xc0] sm:$0xff]  }
  0x17   : > { %v1746_v26 = vld [vmem:[%s1837_s26 + $0x48] sm:$0xff]   ;;  %v1748_v28 = vld [vmem:[%s1837_s26 + $0x50] sm:$0xff]   ;;  %v1750_v30 = vld [vmem:[%s1837_s26 + $0x58] sm:$0xff]  }
  0x18   : > { %1609 = vmatpush3.bf16.msra.mxu0 %v1724_v6  ;;  %1692 = vmatpush3.bf16.msra.mxu1 %v1724_v6  ;;  %v1747_v27 = vld [vmem:[%s1837_s26 + $0xc8] sm:$0xff]   ;;  %v1749_v29 = vld [vmem:[%s1837_s26 + $0xd0] sm:$0xff]   ;;  %v1751_v31 = vld [vmem:[%s1837_s26 + $0xd8] sm:$0xff]  }
  0x19   : > { %1610 = vmatprep.subr.bf16.mxu0 %v1725_v7  ;;  %1685 = vmatprep.subr.bf16.mxu1 %v1725_v7  ;;  %v1752_v32 = vld [vmem:[%s1837_s26 + $0x60] sm:$0xff]   ;;  %v1754_v34 = vld [vmem:[%s1837_s26 + $0x68] sm:$0xff]   ;;  %v1756_v36 = vld [vmem:[%s1837_s26 + $0x70] sm:$0xff]  }
  0x1a   : > { %v1753_v33 = vld [vmem:[%s1837_s26 + $0xe0] sm:$0xff]   ;;  %v1755_v35 = vld [vmem:[%s1837_s26 + $0xe8] sm:$0xff]   ;;  %v1757_v37 = vld [vmem:[%s1837_s26 + $0xf0] sm:$0xff]  }
  0x1b   : > { %v1758_v38 = vld [vmem:[%s1837_s26 + $0x78] sm:$0xff]  }
  0x1c   : > { %1611 = vmatpush3.bf16.msra.mxu0 %v1725_v7  ;;  %1693 = vmatpush3.bf16.msra.mxu1 %v1725_v7  ;;  %v1759_v39 = vld [vmem:[%s1837_s26 + $0xf8] sm:$0xff]  }
  0x1d   : > { %1612 = vmatprep.subr.bf16.mxu0 %v1726_v8  ;;  %1686 = vmatprep.subr.bf16.mxu1 %v1726_v8 }
  0x20   : > { %1613 = vmatpush3.bf16.msra.mxu0 %v1726_v8  ;;  %1694 = vmatpush3.bf16.msra.mxu1 %v1726_v8 }
  0x21   : > { %1614 = vmatprep.subr.bf16.mxu0 %v1727_v9  ;;  %1687 = vmatprep.subr.bf16.mxu1 %v1727_v9 }
  0x24   : > { %1615 = vmatpush3.bf16.msra.mxu0 %v1727_v9  ;;  %1695 = vmatpush3.bf16.msra.mxu1 %v1727_v9 }
  0x27   : > { %1617 = vmatmul.mubr.bf16.vlgmr.msra.gmra.mrb[0].mxu0 %v1730_v10  ;;  %1649 = vmatmul.mubr.bf16.vlgmr.msra.gmra.mrb[0].mxu1 %v1731_v11 }
  0x28   : > { %1620 = vmatprep.mubr.bf16.mxu0 %v1732_v12  ;;  %1652 = vmatprep.mubr.bf16.mxu1 %v1733_v13 }
  0x2f   : > { %1621 = vmatmul.mubr.bf16.gmra.mrb[4].mxu0 %v1734_v14  ;;  %1653 = vmatmul.mubr.bf16.gmra.mrb[4].mxu1 %v1735_v15 }
  0x30   : > { %1624 = vmatprep.mubr.bf16.mxu0 %v1736_v16  ;;  %1656 = vmatprep.mubr.bf16.mxu1 %v1737_v17 }
  0x37   : > { %1625 = vmatmul.mubr.bf16.gmra.mrb[8].mxu0 %v1738_v18  ;;  %1657 = vmatmul.mubr.bf16.gmra.mrb[8].mxu1 %v1739_v19 }
  0x38   : > { %1628 = vmatprep.mubr.bf16.mxu0 %v1740_v20  ;;  %1660 = vmatprep.mubr.bf16.mxu1 %v1741_v21 }
  0x3f   : > { %1629 = vmatmul.mubr.bf16.gmra.mrb[12].mxu0 %v1742_v22  ;;  %1661 = vmatmul.mubr.bf16.gmra.mrb[12].mxu1 %v1743_v23 }
  0x40   : > { %1632 = vmatprep.mubr.bf16.mxu0 %v1744_v24  ;;  %1664 = vmatprep.mubr.bf16.mxu1 %v1745_v25 }
  0x47   : > { %1633 = vmatmul.mubr.bf16.gmra.mrb[16].mxu0 %v1746_v26  ;;  %1665 = vmatmul.mubr.bf16.gmra.mrb[16].mxu1 %v1747_v27 }
  0x48   : > { %1636 = vmatprep.mubr.bf16.mxu0 %v1748_v28  ;;  %1668 = vmatprep.mubr.bf16.mxu1 %v1749_v29 }
  0x4f   : > { %1637 = vmatmul.mubr.bf16.gmra.mrb[20].mxu0 %v1750_v30  ;;  %1669 = vmatmul.mubr.bf16.gmra.mrb[20].mxu1 %v1751_v31 }
  0x50   : > { %1640 = vmatprep.mubr.bf16.mxu0 %v1752_v32  ;;  %1672 = vmatprep.mubr.bf16.mxu1 %v1753_v33 }
  0x57   : > { %1641 = vmatmul.mubr.bf16.gmra.mrb[24].mxu0 %v1754_v34  ;;  %1673 = vmatmul.mubr.bf16.gmra.mrb[24].mxu1 %v1755_v35 }
  0x58   : > { %1644 = vmatprep.mubr.bf16.mxu0 %v1756_v36  ;;  %1676 = vmatprep.mubr.bf16.mxu1 %v1757_v37 }
  0x5f   : > { %1645 = vmatmul.mubr.bf16.gmra.mrb[28].mxu0 %v1758_v38  ;;  %1677 = vmatmul.mubr.bf16.gmra.mrb[28].mxu1 %v1759_v39 }
  0xfa   : > { %v1618_v41 = vpop.f32.mrb[0].mxu0  ;;  %v1650_v42 = vpop.f32.mrb[0].mxu1 }
  0xfb   : > { %v1205_v43 = vadd.f32 %v1618_v41, %v1889_v40  ;;  %v1237_v44 = vadd.f32 %v1650_v42, %v1889_v40  ;;  %v746_v45 = vpop.f32.mrb[1].mxu0  ;;  %v874_v46 = vpop.f32.mrb[1].mxu1 }
  0xfc   : > { %v1203_v47 = vadd.f32 %v1889_v40, %v746_v45  ;;  %v1235_v48 = vadd.f32 %v1889_v40, %v874_v46  ;;  %v1619_v49 = vpop.f32.mrb[2].mxu0  ;;  %v1651_v50 = vpop.f32.mrb[2].mxu1 }
  0xfd   : > { %v1269_v51 = vmax.f32 %v1205_v43, 0.0  ;;  %v1301_v52 = vmax.f32 %v1237_v44, 0.0  ;;  %v1206_v53 = vadd.f32 %v1619_v49, %v1889_v40  ;;  %v1238_v54 = vadd.f32 %v1651_v50, %v1889_v40  ;;  %v749_v55 = vpop.f32.mrb[3].mxu0  ;;  %v877_v56 = vpop.f32.mrb[3].mxu1 }
  0xfe   : > { %v1267_v57 = vmax.f32 %v1203_v47, 0.0  ;;  %v1299_v58 = vmax.f32 %v1235_v48, 0.0  ;;  %v1204_v59 = vadd.f32 %v1889_v40, %v749_v55  ;;  %v1236_v60 = vadd.f32 %v1889_v40, %v877_v56 }
  0xff   : > { %1333 = vst [vmem:[%s1897_s19 + $0x10] sm:$0xff] %v1269_v51  ;;  %1365 = vst [vmem:[%s1897_s19 + $0x110] sm:$0xff] %v1301_v52  ;;  %v1270_v61 = vmax.f32 %v1206_v53, 0.0  ;;  %v1302_v62 = vmax.f32 %v1238_v54, 0.0 }
 0x100   : > { %1331 = vst [vmem:[%s1897_s19] sm:$0xff] %v1267_v57  ;;  %1363 = vst [vmem:[%s1897_s19 + $0x100] sm:$0xff] %v1299_v58  ;;  %v1268_v63 = vmax.f32 %v1204_v59, 0.0  ;;  %v1300_v0 = vmax.f32 %v1236_v60, 0.0 }
 0x101   : > { %1334 = vst [vmem:[%s1897_s19 + $0x18] sm:$0xff] %v1270_v61  ;;  %1366 = vst [vmem:[%s1897_s19 + $0x118] sm:$0xff] %v1302_v62 }
 0x102   : > { %1332 = vst [vmem:[%s1897_s19 + $0x8] sm:$0xff] %v1268_v63  ;;  %1364 = vst [vmem:[%s1897_s19 + $0x108] sm:$0xff] %v1300_v0  ;;  %v1622_v1 = vpop.f32.mrb[4].mxu0  ;;  %v1654_v2 = vpop.f32.mrb[4].mxu1 }
 0x103   : > { %v1209_v3 = vadd.f32 %v1622_v1, %v1889_v40  ;;  %v1241_v4 = vadd.f32 %v1654_v2, %v1889_v40  ;;  %v762_v5 = vpop.f32.mrb[5].mxu0  ;;  %v890_v6 = vpop.f32.mrb[5].mxu1 }
 0x104   : > { %v1207_v7 = vadd.f32 %v1889_v40, %v762_v5  ;;  %v1239_v8 = vadd.f32 %v1889_v40, %v890_v6  ;;  %v1623_v9 = vpop.f32.mrb[6].mxu0  ;;  %v1655_v10 = vpop.f32.mrb[6].mxu1 }
 0x105   : > { %v1273_v11 = vmax.f32 %v1209_v3, 0.0  ;;  %v1305_v12 = vmax.f32 %v1241_v4, 0.0  ;;  %v1210_v13 = vadd.f32 %v1623_v9, %v1889_v40  ;;  %v1242_v14 = vadd.f32 %v1655_v10, %v1889_v40  ;;  %v765_v15 = vpop.f32.mrb[7].mxu0  ;;  %v893_v16 = vpop.f32.mrb[7].mxu1 }
 0x106   : > { %v1271_v17 = vmax.f32 %v1207_v7, 0.0  ;;  %v1303_v18 = vmax.f32 %v1239_v8, 0.0  ;;  %v1208_v19 = vadd.f32 %v1889_v40, %v765_v15  ;;  %v1240_v20 = vadd.f32 %v1889_v40, %v893_v16 }
 0x107   : > { %1337 = vst [vmem:[%s1897_s19 + $0x30] sm:$0xff] %v1273_v11  ;;  %1369 = vst [vmem:[%s1897_s19 + $0x130] sm:$0xff] %v1305_v12  ;;  %v1274_v21 = vmax.f32 %v1210_v13, 0.0  ;;  %v1306_v22 = vmax.f32 %v1242_v14, 0.0 }
 0x108   : > { %1335 = vst [vmem:[%s1897_s19 + $0x20] sm:$0xff] %v1271_v17  ;;  %1367 = vst [vmem:[%s1897_s19 + $0x120] sm:$0xff] %v1303_v18  ;;  %v1272_v23 = vmax.f32 %v1208_v19, 0.0  ;;  %v1304_v24 = vmax.f32 %v1240_v20, 0.0 }
 0x109   : > { %1338 = vst [vmem:[%s1897_s19 + $0x38] sm:$0xff] %v1274_v21  ;;  %1370 = vst [vmem:[%s1897_s19 + $0x138] sm:$0xff] %v1306_v22 }
 0x10a   : > { %1336 = vst [vmem:[%s1897_s19 + $0x28] sm:$0xff] %v1272_v23  ;;  %1368 = vst [vmem:[%s1897_s19 + $0x128] sm:$0xff] %v1304_v24  ;;  %v1626_v25 = vpop.f32.mrb[8].mxu0  ;;  %v1658_v26 = vpop.f32.mrb[8].mxu1 }
 0x10b   : > { %v1213_v27 = vadd.f32 %v1626_v25, %v1889_v40  ;;  %v1245_v28 = vadd.f32 %v1658_v26, %v1889_v40  ;;  %v778_v29 = vpop.f32.mrb[9].mxu0  ;;  %v906_v30 = vpop.f32.mrb[9].mxu1 }
 0x10c   : > { %v1211_v31 = vadd.f32 %v1889_v40, %v778_v29  ;;  %v1243_v32 = vadd.f32 %v1889_v40, %v906_v30  ;;  %v1627_v33 = vpop.f32.mrb[10].mxu0  ;;  %v1659_v34 = vpop.f32.mrb[10].mxu1 }
 0x10d   : > { %v1277_v35 = vmax.f32 %v1213_v27, 0.0  ;;  %v1309_v36 = vmax.f32 %v1245_v28, 0.0  ;;  %v1214_v37 = vadd.f32 %v1627_v33, %v1889_v40  ;;  %v1246_v38 = vadd.f32 %v1659_v34, %v1889_v40  ;;  %v781_v39 = vpop.f32.mrb[11].mxu0  ;;  %v909_v41 = vpop.f32.mrb[11].mxu1 }
 0x10e   : > { %v1275_v42 = vmax.f32 %v1211_v31, 0.0  ;;  %v1307_v43 = vmax.f32 %v1243_v32, 0.0  ;;  %v1212_v44 = vadd.f32 %v1889_v40, %v781_v39  ;;  %v1244_v45 = vadd.f32 %v1889_v40, %v909_v41 }
 0x10f   : > { %1341 = vst [vmem:[%s1897_s19 + $0x50] sm:$0xff] %v1277_v35  ;;  %1373 = vst [vmem:[%s1897_s19 + $0x150] sm:$0xff] %v1309_v36  ;;  %v1278_v46 = vmax.f32 %v1214_v37, 0.0  ;;  %v1310_v47 = vmax.f32 %v1246_v38, 0.0 }
 0x110   : > { %1339 = vst [vmem:[%s1897_s19 + $0x40] sm:$0xff] %v1275_v42  ;;  %1371 = vst [vmem:[%s1897_s19 + $0x140] sm:$0xff] %v1307_v43  ;;  %v1276_v48 = vmax.f32 %v1212_v44, 0.0  ;;  %v1308_v49 = vmax.f32 %v1244_v45, 0.0 }
 0x111   : > { %1342 = vst [vmem:[%s1897_s19 + $0x58] sm:$0xff] %v1278_v46  ;;  %1374 = vst [vmem:[%s1897_s19 + $0x158] sm:$0xff] %v1310_v47 }
 0x112   : > { %1340 = vst [vmem:[%s1897_s19 + $0x48] sm:$0xff] %v1276_v48  ;;  %1372 = vst [vmem:[%s1897_s19 + $0x148] sm:$0xff] %v1308_v49  ;;  %v1630_v50 = vpop.f32.mrb[12].mxu0  ;;  %v1662_v51 = vpop.f32.mrb[12].mxu1 }
 0x113   : > { %v1217_v52 = vadd.f32 %v1630_v50, %v1889_v40  ;;  %v1249_v53 = vadd.f32 %v1662_v51, %v1889_v40  ;;  %v794_v54 = vpop.f32.mrb[13].mxu0  ;;  %v922_v55 = vpop.f32.mrb[13].mxu1 }
 0x114   : > { %v1215_v56 = vadd.f32 %v1889_v40, %v794_v54  ;;  %v1247_v57 = vadd.f32 %v1889_v40, %v922_v55  ;;  %v1631_v58 = vpop.f32.mrb[14].mxu0  ;;  %v1663_v59 = vpop.f32.mrb[14].mxu1 }
 0x115   : > { %v1281_v60 = vmax.f32 %v1217_v52, 0.0  ;;  %v1313_v61 = vmax.f32 %v1249_v53, 0.0  ;;  %v1218_v62 = vadd.f32 %v1631_v58, %v1889_v40  ;;  %v1250_v63 = vadd.f32 %v1663_v59, %v1889_v40  ;;  %v797_v0 = vpop.f32.mrb[15].mxu0  ;;  %v925_v1 = vpop.f32.mrb[15].mxu1 }
 0x116   : > { %v1279_v2 = vmax.f32 %v1215_v56, 0.0  ;;  %v1311_v3 = vmax.f32 %v1247_v57, 0.0  ;;  %v1216_v4 = vadd.f32 %v1889_v40, %v797_v0  ;;  %v1248_v5 = vadd.f32 %v1889_v40, %v925_v1 }
 0x117   : > { %1345 = vst [vmem:[%s1897_s19 + $0x70] sm:$0xff] %v1281_v60  ;;  %1377 = vst [vmem:[%s1897_s19 + $0x170] sm:$0xff] %v1313_v61  ;;  %v1282_v6 = vmax.f32 %v1218_v62, 0.0  ;;  %v1314_v7 = vmax.f32 %v1250_v63, 0.0 }
 0x118   : > { %1343 = vst [vmem:[%s1897_s19 + $0x60] sm:$0xff] %v1279_v2  ;;  %1375 = vst [vmem:[%s1897_s19 + $0x160] sm:$0xff] %v1311_v3  ;;  %v1280_v8 = vmax.f32 %v1216_v4, 0.0  ;;  %v1312_v9 = vmax.f32 %v1248_v5, 0.0 }
 0x119   : > { %1346 = vst [vmem:[%s1897_s19 + $0x78] sm:$0xff] %v1282_v6  ;;  %1378 = vst [vmem:[%s1897_s19 + $0x178] sm:$0xff] %v1314_v7 }
 0x11a   : > { %1344 = vst [vmem:[%s1897_s19 + $0x68] sm:$0xff] %v1280_v8  ;;  %1376 = vst [vmem:[%s1897_s19 + $0x168] sm:$0xff] %v1312_v9  ;;  %v1634_v10 = vpop.f32.mrb[16].mxu0  ;;  %v1666_v11 = vpop.f32.mrb[16].mxu1 }
 0x11b   : > { %v1221_v12 = vadd.f32 %v1634_v10, %v1889_v40  ;;  %v1253_v13 = vadd.f32 %v1666_v11, %v1889_v40  ;;  %v810_v14 = vpop.f32.mrb[17].mxu0  ;;  %v938_v15 = vpop.f32.mrb[17].mxu1 }
 0x11c   : > { %v1219_v16 = vadd.f32 %v1889_v40, %v810_v14  ;;  %v1251_v17 = vadd.f32 %v1889_v40, %v938_v15  ;;  %v1635_v18 = vpop.f32.mrb[18].mxu0  ;;  %v1667_v19 = vpop.f32.mrb[18].mxu1 }
 0x11d   : > { %v1285_v20 = vmax.f32 %v1221_v12, 0.0  ;;  %v1317_v21 = vmax.f32 %v1253_v13, 0.0  ;;  %v1222_v22 = vadd.f32 %v1635_v18, %v1889_v40  ;;  %v1254_v23 = vadd.f32 %v1667_v19, %v1889_v40  ;;  %v813_v24 = vpop.f32.mrb[19].mxu0  ;;  %v941_v25 = vpop.f32.mrb[19].mxu1 }
 0x11e   : > { %v1283_v26 = vmax.f32 %v1219_v16, 0.0  ;;  %v1315_v27 = vmax.f32 %v1251_v17, 0.0  ;;  %v1220_v28 = vadd.f32 %v1889_v40, %v813_v24  ;;  %v1252_v29 = vadd.f32 %v1889_v40, %v941_v25 }
 0x11f   : > { %1349 = vst [vmem:[%s1897_s19 + $0x90] sm:$0xff] %v1285_v20  ;;  %1381 = vst [vmem:[%s1897_s19 + $0x190] sm:$0xff] %v1317_v21  ;;  %v1286_v30 = vmax.f32 %v1222_v22, 0.0  ;;  %v1318_v31 = vmax.f32 %v1254_v23, 0.0 }
 0x120   : > { %1347 = vst [vmem:[%s1897_s19 + $0x80] sm:$0xff] %v1283_v26  ;;  %1379 = vst [vmem:[%s1897_s19 + $0x180] sm:$0xff] %v1315_v27  ;;  %v1284_v32 = vmax.f32 %v1220_v28, 0.0  ;;  %v1316_v33 = vmax.f32 %v1252_v29, 0.0 }
 0x121   : > { %1350 = vst [vmem:[%s1897_s19 + $0x98] sm:$0xff] %v1286_v30  ;;  %1382 = vst [vmem:[%s1897_s19 + $0x198] sm:$0xff] %v1318_v31 }
 0x122   : > { %1348 = vst [vmem:[%s1897_s19 + $0x88] sm:$0xff] %v1284_v32  ;;  %1380 = vst [vmem:[%s1897_s19 + $0x188] sm:$0xff] %v1316_v33  ;;  %v1638_v34 = vpop.f32.mrb[20].mxu0  ;;  %v1670_v35 = vpop.f32.mrb[20].mxu1 }
 0x123   : > { %v1225_v36 = vadd.f32 %v1638_v34, %v1889_v40  ;;  %v1257_v37 = vadd.f32 %v1670_v35, %v1889_v40  ;;  %v826_v38 = vpop.f32.mrb[21].mxu0  ;;  %v954_v39 = vpop.f32.mrb[21].mxu1 }
 0x124   : > { %v1223_v41 = vadd.f32 %v1889_v40, %v826_v38  ;;  %v1255_v42 = vadd.f32 %v1889_v40, %v954_v39  ;;  %v1639_v43 = vpop.f32.mrb[22].mxu0  ;;  %v1671_v44 = vpop.f32.mrb[22].mxu1 }
 0x125   : > { %v1289_v45 = vmax.f32 %v1225_v36, 0.0  ;;  %v1321_v46 = vmax.f32 %v1257_v37, 0.0  ;;  %v1226_v47 = vadd.f32 %v1639_v43, %v1889_v40  ;;  %v1258_v48 = vadd.f32 %v1671_v44, %v1889_v40  ;;  %v829_v49 = vpop.f32.mrb[23].mxu0  ;;  %v957_v50 = vpop.f32.mrb[23].mxu1 }
 0x126   : > { %v1287_v51 = vmax.f32 %v1223_v41, 0.0  ;;  %v1319_v52 = vmax.f32 %v1255_v42, 0.0  ;;  %v1224_v53 = vadd.f32 %v1889_v40, %v829_v49  ;;  %v1256_v54 = vadd.f32 %v1889_v40, %v957_v50 }
 0x127   : > { %1353 = vst [vmem:[%s1897_s19 + $0xb0] sm:$0xff] %v1289_v45  ;;  %1385 = vst [vmem:[%s1897_s19 + $0x1b0] sm:$0xff] %v1321_v46  ;;  %v1290_v55 = vmax.f32 %v1226_v47, 0.0  ;;  %v1322_v56 = vmax.f32 %v1258_v48, 0.0 }
 0x128   : > { %1351 = vst [vmem:[%s1897_s19 + $0xa0] sm:$0xff] %v1287_v51  ;;  %1383 = vst [vmem:[%s1897_s19 + $0x1a0] sm:$0xff] %v1319_v52  ;;  %v1288_v57 = vmax.f32 %v1224_v53, 0.0  ;;  %v1320_v58 = vmax.f32 %v1256_v54, 0.0 }
 0x129   : > { %1354 = vst [vmem:[%s1897_s19 + $0xb8] sm:$0xff] %v1290_v55  ;;  %1386 = vst [vmem:[%s1897_s19 + $0x1b8] sm:$0xff] %v1322_v56 }
 0x12a   : > { %1352 = vst [vmem:[%s1897_s19 + $0xa8] sm:$0xff] %v1288_v57  ;;  %1384 = vst [vmem:[%s1897_s19 + $0x1a8] sm:$0xff] %v1320_v58  ;;  %v1642_v59 = vpop.f32.mrb[24].mxu0  ;;  %v1674_v60 = vpop.f32.mrb[24].mxu1 }
 0x12b   : > { %v1229_v61 = vadd.f32 %v1642_v59, %v1889_v40  ;;  %v1261_v62 = vadd.f32 %v1674_v60, %v1889_v40  ;;  %v842_v63 = vpop.f32.mrb[25].mxu0  ;;  %v970_v0 = vpop.f32.mrb[25].mxu1 }
 0x12c   : > { %v1227_v1 = vadd.f32 %v1889_v40, %v842_v63  ;;  %v1259_v2 = vadd.f32 %v1889_v40, %v970_v0  ;;  %v1643_v3 = vpop.f32.mrb[26].mxu0  ;;  %v1675_v4 = vpop.f32.mrb[26].mxu1 }
 0x12d   : > { %v1293_v5 = vmax.f32 %v1229_v61, 0.0  ;;  %v1325_v6 = vmax.f32 %v1261_v62, 0.0  ;;  %v1230_v7 = vadd.f32 %v1643_v3, %v1889_v40  ;;  %v1262_v8 = vadd.f32 %v1675_v4, %v1889_v40  ;;  %v845_v9 = vpop.f32.mrb[27].mxu0  ;;  %v973_v10 = vpop.f32.mrb[27].mxu1 }
 0x12e   : > { %v1291_v11 = vmax.f32 %v1227_v1, 0.0  ;;  %v1323_v12 = vmax.f32 %v1259_v2, 0.0  ;;  %v1228_v13 = vadd.f32 %v1889_v40, %v845_v9  ;;  %v1260_v14 = vadd.f32 %v1889_v40, %v973_v10 }
 0x12f   : > { %1357 = vst [vmem:[%s1897_s19 + $0xd0] sm:$0xff] %v1293_v5  ;;  %1389 = vst [vmem:[%s1897_s19 + $0x1d0] sm:$0xff] %v1325_v6  ;;  %v1294_v15 = vmax.f32 %v1230_v7, 0.0  ;;  %v1326_v16 = vmax.f32 %v1262_v8, 0.0 }
 0x130   : > { %1355 = vst [vmem:[%s1897_s19 + $0xc0] sm:$0xff] %v1291_v11  ;;  %1387 = vst [vmem:[%s1897_s19 + $0x1c0] sm:$0xff] %v1323_v12  ;;  %v1292_v17 = vmax.f32 %v1228_v13, 0.0  ;;  %v1324_v18 = vmax.f32 %v1260_v14, 0.0 }
 0x131   : > { %1358 = vst [vmem:[%s1897_s19 + $0xd8] sm:$0xff] %v1294_v15  ;;  %1390 = vst [vmem:[%s1897_s19 + $0x1d8] sm:$0xff] %v1326_v16 }
 0x132   : > { %1356 = vst [vmem:[%s1897_s19 + $0xc8] sm:$0xff] %v1292_v17  ;;  %1388 = vst [vmem:[%s1897_s19 + $0x1c8] sm:$0xff] %v1324_v18  ;;  %v1646_v19 = vpop.f32.mrb[28].mxu0  ;;  %v1678_v20 = vpop.f32.mrb[28].mxu1 }
 0x133   : > { %v1233_v21 = vadd.f32 %v1646_v19, %v1889_v40  ;;  %v1265_v22 = vadd.f32 %v1678_v20, %v1889_v40  ;;  %v858_v23 = vpop.f32.mrb[29].mxu0  ;;  %v986_v24 = vpop.f32.mrb[29].mxu1 }
 0x134   : > { %v1231_v25 = vadd.f32 %v1889_v40, %v858_v23  ;;  %v1263_v26 = vadd.f32 %v1889_v40, %v986_v24  ;;  %v1647_v27 = vpop.f32.mrb[30].mxu0  ;;  %v1679_v28 = vpop.f32.mrb[30].mxu1 }
 0x135   : > { %v1297_v29 = vmax.f32 %v1233_v21, 0.0  ;;  %v1329_v30 = vmax.f32 %v1265_v22, 0.0  ;;  %v1234_v31 = vadd.f32 %v1647_v27, %v1889_v40  ;;  %v1266_v32 = vadd.f32 %v1679_v28, %v1889_v40  ;;  %v861_v33 = vpop.f32.mrb[31].mxu0  ;;  %v989_v34 = vpop.f32.mrb[31].mxu1 }
 0x136   : > { %v1295_v35 = vmax.f32 %v1231_v25, 0.0  ;;  %v1327_v36 = vmax.f32 %v1263_v26, 0.0  ;;  %v1232_v37 = vadd.f32 %v1889_v40, %v861_v33  ;;  %v1264_v38 = vadd.f32 %v1889_v40, %v989_v34 }
 0x137   : > { %1361 = vst [vmem:[%s1897_s19 + $0xf0] sm:$0xff] %v1297_v29  ;;  %1393 = vst [vmem:[%s1897_s19 + $0x1f0] sm:$0xff] %v1329_v30  ;;  %v1298_v39 = vmax.f32 %v1234_v31, 0.0  ;;  %v1330_v41 = vmax.f32 %v1266_v32, 0.0 }
 0x138   : > { %1359 = vst [vmem:[%s1897_s19 + $0xe0] sm:$0xff] %v1295_v35  ;;  %1391 = vst [vmem:[%s1897_s19 + $0x1e0] sm:$0xff] %v1327_v36  ;;  %v1296_v42 = vmax.f32 %v1232_v37, 0.0  ;;  %v1328_v43 = vmax.f32 %v1264_v38, 0.0 }
 0x139   : > { %1362 = vst [vmem:[%s1897_s19 + $0xf8] sm:$0xff] %v1298_v39  ;;  %1394 = vst [vmem:[%s1897_s19 + $0x1f8] sm:$0xff] %v1330_v41 }
 0x13a   : > { %1360 = vst [vmem:[%s1897_s19 + $0xe8] sm:$0xff] %v1296_v42  ;;  %1392 = vst [vmem:[%s1897_s19 + $0x1e8] sm:$0xff] %v1328_v43 }
 0x13b PF: > { %s13_s14 = sadd.s32 1, %s1782_s14   ;;  %s2038_s12 = smov %s1778_s13 }
 0x13c   : > { %p10_p5 = scmp.ge.s32.totalorder %s13_s14, 4   ;;  %s2039_s13 = smov %s2041_s15 }
 0x13e   :  { %12 = sbr.rel (!%p10_p5) target bundleno = 2 (0x2), region = 76 }

// kernel: layered_neural_renderer_forward.14
= control target key start
LH: loop header
LB: loop body
LE: loop exit
PB: predicated region body
PF: predicated region fallthrough
CT: control target
= control target key end

     0   :  { %s900_s12 = smov 0   ;;  %s902_s13 = smov 0   ;;  %s992_s0 = inlined_call_operand.vmem [shape: bf16[256,128], index: 0, kind: input, shape index: {}]   ;;  %s993_s1 = inlined_call_operand.vmem [shape: bf16[128,128], index: 1, kind: input, shape index: {}]   ;;  %s994_s2 = inlined_call_operand.vmem [shape: f32[1,128], index: 2, kind: input, shape index: {}]   ;;  %s995_s3 = inlined_call_operand.vmem [shape: f32[256,128], index: 3, kind: output, shape index: {}]  }
   0x1   :  { %s904_s14 = smov 0  }
   0x2 LB: > { %s32_s15 = sadd.s32 1, %s874_s13  ;;  %p728_p0 = scmp.ge.s32.totalorder %s878_s14, 1  ;;  %s878_s14 = sphi %s904_s14, %s13_s14   ;;  %s874_s13 = sphi %s902_s13, %s997_s13   ;;  %s870_s12 = sphi %s900_s12, %s996_s12  }
   0x3   : > { %p34_p1 = scmp.ge.s32.totalorder %s32_s15, 2  ;;  %p188_p2 = scmp.lt.s32.totalorder %s878_s14, 3 }
   0x5   : > { %s999_s15 = smov (%p34_p1, %s32_s15), 0  ;;  %p189_p3 = pnand %p728_p0, %p188_p2 }
   0x6   : > { %v840_v0 = vld [vmem:[%s993_s1] sm:$0xff] (!%p189_p3)   ;;  %s729_s18 = sshll.u32 (!%p189_p3), %s870_s12, 4  ;;  %v841_v1 = vld [vmem:[%s993_s1 + $0x8] sm:$0xff] (!%p189_p3)   ;;  %v842_v2 = vld [vmem:[%s993_s1 + $0x10] sm:$0xff] (!%p189_p3)  }
   0x7   : > { %192 = sbr.rel (%p189_p3) target bundleno = 265 (0x109), region = 32  ;;  %p230_p4 = scmp.lt.s32.totalorder (!%p189_p3), %s729_s18, 31  ;;  %768 = vmatprep.subr.bf16.mxu0 (!%p189_p3), %v840_v0  ;;  %800 = vmatprep.subr.bf16.mxu1 (!%p189_p3), %v840_v0  ;;  %v843_v3 = vld [vmem:[%s993_s1 + $0x18] sm:$0xff] (!%p189_p3)   ;;  %v844_v6 = vld [vmem:[%s993_s1 + $0x20] sm:$0xff] (!%p189_p3)   ;;  %v845_v7 = vld [vmem:[%s993_s1 + $0x28] sm:$0xff] (!%p189_p3)  }
   0x8   : > { %769 = vmatpush3.bf16.msra.mxu0 (!%p189_p3), %v840_v0  ;;  %808 = vmatpush3.bf16.msra.mxu1 (!%p189_p3), %v840_v0  ;;  %v846_v8 = vld [vmem:[%s993_s1 + $0x30] sm:$0xff] (!%p189_p3)   ;;  %v847_v9 = vld [vmem:[%s993_s1 + $0x38] sm:$0xff] (!%p189_p3)   ;;  %v749_v16 = vld [vmem:[%s994_s2] ss:$0 sm:$0xff] (!%p189_p3) }
   0x9   : > { %770 = vmatprep.subr.bf16.mxu0 (!%p189_p3), %v841_v1  ;;  %801 = vmatprep.subr.bf16.mxu1 (!%p189_p3), %v841_v1 }
   0xc   : > { %771 = vmatpush3.bf16.msra.mxu0 (!%p189_p3), %v841_v1  ;;  %809 = vmatpush3.bf16.msra.mxu1 (!%p189_p3), %v841_v1 }
   0xd   : > { %772 = vmatprep.subr.bf16.mxu0 (!%p189_p3), %v842_v2  ;;  %802 = vmatprep.subr.bf16.mxu1 (!%p189_p3), %v842_v2 }
   0xe   : > { %s1001_s18 = smov (!%p230_p4, %s729_s18), 31 }
   0xf   : > { %s730_s23 = sshll.u32 %s1001_s18, 2  ;;  %s732_s10 = sshll.u32 %s1001_s18, 3 }
  0x10   : > { %s933_s26 = scalar_lea.vmem %s992_s0, %s730_s23  ;;  %773 = vmatpush3.bf16.msra.mxu0 %v842_v2  ;;  %810 = vmatpush3.bf16.msra.mxu1 %v842_v2  ;;  %s965_s19 = scalar_lea.vmem %s995_s3, %s732_s10 }
  0x11   : > { %v848_v4 = vld [vmem:[%s933_s26] sm:$0xff]   ;;  %774 = vmatprep.subr.bf16.mxu0 %v843_v3  ;;  %803 = vmatprep.subr.bf16.mxu1 %v843_v3  ;;  %v850_v10 = vld [vmem:[%s933_s26 + $0x8] sm:$0xff]   ;;  %v852_v12 = vld [vmem:[%s933_s26 + $0x10] sm:$0xff]  }
  0x12   : > { %v849_v5 = vld [vmem:[%s933_s26 + $0x20] sm:$0xff]   ;;  %784 = vmatprep.mubr.bf16.mxu0 %v848_v4  ;;  %v851_v11 = vld [vmem:[%s933_s26 + $0x28] sm:$0xff]   ;;  %v853_v13 = vld [vmem:[%s933_s26 + $0x30] sm:$0xff]  }
  0x13   : > { %792 = vmatprep.mubr.bf16.mxu1 %v849_v5  ;;  %v854_v14 = vld [vmem:[%s933_s26 + $0x18] sm:$0xff]  }
  0x14   : > { %775 = vmatpush3.bf16.msra.mxu0 %v843_v3  ;;  %811 = vmatpush3.bf16.msra.mxu1 %v843_v3  ;;  %v855_v15 = vld [vmem:[%s933_s26 + $0x38] sm:$0xff]  }
  0x15   : > { %776 = vmatprep.subr.bf16.mxu0 %v844_v6  ;;  %804 = vmatprep.subr.bf16.mxu1 %v844_v6 }
  0x18   : > { %777 = vmatpush3.bf16.msra.mxu0 %v844_v6  ;;  %812 = vmatpush3.bf16.msra.mxu1 %v844_v6 }
  0x19   : > { %778 = vmatprep.subr.bf16.mxu0 %v845_v7  ;;  %805 = vmatprep.subr.bf16.mxu1 %v845_v7 }
  0x1c   : > { %779 = vmatpush3.bf16.msra.mxu0 %v845_v7  ;;  %813 = vmatpush3.bf16.msra.mxu1 %v845_v7 }
  0x1d   : > { %780 = vmatprep.subr.bf16.mxu0 %v846_v8  ;;  %806 = vmatprep.subr.bf16.mxu1 %v846_v8 }
  0x20   : > { %781 = vmatpush3.bf16.msra.mxu0 %v846_v8  ;;  %814 = vmatpush3.bf16.msra.mxu1 %v846_v8 }
  0x21   : > { %782 = vmatprep.subr.bf16.mxu0 %v847_v9  ;;  %807 = vmatprep.subr.bf16.mxu1 %v847_v9 }
  0x24   : > { %783 = vmatpush3.bf16.msra.mxu0 %v847_v9  ;;  %815 = vmatpush3.bf16.msra.mxu1 %v847_v9 }
  0x27   : > { %785 = vmatmul.mubr.bf16.vlgmr.msra.gmra.mrb[0].mxu0 %v850_v10  ;;  %793 = vmatmul.mubr.bf16.vlgmr.msra.gmra.mrb[0].mxu1 %v851_v11 }
  0x28   : > { %788 = vmatprep.mubr.bf16.mxu0 %v852_v12  ;;  %796 = vmatprep.mubr.bf16.mxu1 %v853_v13 }
  0x2f   : > { %789 = vmatmul.mubr.bf16.gmra.mrb[4].mxu0 %v854_v14  ;;  %797 = vmatmul.mubr.bf16.gmra.mrb[4].mxu1 %v855_v15 }
  0xfa   : > { %v786_v17 = vpop.f32.mrb[0].mxu0  ;;  %v794_v18 = vpop.f32.mrb[0].mxu1 }
  0xfb   : > { %v581_v19 = vadd.f32 %v786_v17, %v749_v16  ;;  %v589_v20 = vadd.f32 %v794_v18, %v749_v16  ;;  %v458_v21 = vpop.f32.mrb[1].mxu0  ;;  %v490_v22 = vpop.f32.mrb[1].mxu1 }
  0xfc   : > { %v579_v23 = vadd.f32 %v749_v16, %v458_v21  ;;  %v587_v24 = vadd.f32 %v749_v16, %v490_v22  ;;  %v787_v25 = vpop.f32.mrb[2].mxu0  ;;  %v795_v26 = vpop.f32.mrb[2].mxu1 }
  0xfd   : > { %597 = vst [vmem:[%s965_s19 + $0x10] sm:$0xff] %v581_v19  ;;  %605 = vst [vmem:[%s965_s19 + $0x50] sm:$0xff] %v589_v20  ;;  %v582_v27 = vadd.f32 %v787_v25, %v749_v16  ;;  %v590_v28 = vadd.f32 %v795_v26, %v749_v16  ;;  %v461_v29 = vpop.f32.mrb[3].mxu0  ;;  %v493_v30 = vpop.f32.mrb[3].mxu1 }
  0xfe   : > { %595 = vst [vmem:[%s965_s19] sm:$0xff] %v579_v23  ;;  %603 = vst [vmem:[%s965_s19 + $0x40] sm:$0xff] %v587_v24  ;;  %v580_v31 = vadd.f32 %v749_v16, %v461_v29  ;;  %v588_v32 = vadd.f32 %v749_v16, %v493_v30 }
  0xff   : > { %598 = vst [vmem:[%s965_s19 + $0x18] sm:$0xff] %v582_v27  ;;  %606 = vst [vmem:[%s965_s19 + $0x58] sm:$0xff] %v590_v28 }
 0x100   : > { %596 = vst [vmem:[%s965_s19 + $0x8] sm:$0xff] %v580_v31  ;;  %604 = vst [vmem:[%s965_s19 + $0x48] sm:$0xff] %v588_v32 }
 0x102   : > { %v790_v33 = vpop.f32.mrb[4].mxu0  ;;  %v798_v34 = vpop.f32.mrb[4].mxu1 }
 0x103   : > { %v585_v35 = vadd.f32 %v790_v33, %v749_v16  ;;  %v593_v36 = vadd.f32 %v798_v34, %v749_v16  ;;  %v474_v37 = vpop.f32.mrb[5].mxu0  ;;  %v506_v38 = vpop.f32.mrb[5].mxu1 }
 0x104   : > { %v583_v39 = vadd.f32 %v749_v16, %v474_v37  ;;  %v591_v40 = vadd.f32 %v749_v16, %v506_v38  ;;  %v791_v41 = vpop.f32.mrb[6].mxu0  ;;  %v799_v42 = vpop.f32.mrb[6].mxu1 }
 0x105   : > { %601 = vst [vmem:[%s965_s19 + $0x30] sm:$0xff] %v585_v35  ;;  %609 = vst [vmem:[%s965_s19 + $0x70] sm:$0xff] %v593_v36  ;;  %v586_v43 = vadd.f32 %v791_v41, %v749_v16  ;;  %v594_v44 = vadd.f32 %v799_v42, %v749_v16  ;;  %v477_v45 = vpop.f32.mrb[7].mxu0  ;;  %v509_v46 = vpop.f32.mrb[7].mxu1 }
 0x106   : > { %599 = vst [vmem:[%s965_s19 + $0x20] sm:$0xff] %v583_v39  ;;  %607 = vst [vmem:[%s965_s19 + $0x60] sm:$0xff] %v591_v40  ;;  %v584_v47 = vadd.f32 %v749_v16, %v477_v45  ;;  %v592_v48 = vadd.f32 %v749_v16, %v509_v46 }
 0x107   : > { %602 = vst [vmem:[%s965_s19 + $0x38] sm:$0xff] %v586_v43  ;;  %610 = vst [vmem:[%s965_s19 + $0x78] sm:$0xff] %v594_v44 }
 0x108   : > { %600 = vst [vmem:[%s965_s19 + $0x28] sm:$0xff] %v584_v47  ;;  %608 = vst [vmem:[%s965_s19 + $0x68] sm:$0xff] %v592_v48 }
 0x109 PF: > { %s13_s14 = sadd.s32 1, %s878_s14   ;;  %s996_s12 = smov %s874_s13 }
 0x10a   : > { %p10_p5 = scmp.ge.s32.totalorder %s13_s14, 4   ;;  %s997_s13 = smov %s999_s15 }
 0x10c   :  { %12 = sbr.rel (!%p10_p5) target bundleno = 2 (0x2), region = 76 }

// kernel: layered_neural_renderer_forward.15
= control target key start
LH: loop header
LB: loop body
LE: loop exit
PB: predicated region body
PF: predicated region fallthrough
CT: control target
= control target key end

     0   :  { %s558_s1 = inlined_call_operand.vmem [shape: bf16[256,128], index: 1, kind: input, shape index: {}]   ;;  %s559_s0 = inlined_call_operand.vmem [shape: bf16[64,256], index: 0, kind: input, shape index: {}]   ;;  %s560_s2 = inlined_call_operand.vmem [shape: f32[1,128], index: 2, kind: input, shape index: {}]   ;;  %s561_s3 = inlined_call_operand.vmem [shape: f32[64,128], index: 3, kind: output, shape index: {}]  }
   0x1   :  { %v411_v0 = vld [vmem:[%s558_s1 + $0x40] sm:$0xff]   ;;  %v413_v2 = vld [vmem:[%s558_s1 + $0x48] sm:$0xff]   ;;  %v415_v4 = vld [vmem:[%s558_s1 + $0x50] sm:$0xff]  }
   0x2   :  { %v412_v1 = vld [vmem:[%s558_s1] sm:$0xff]   ;;  %355 = vmatprep.subr.bf16.mxu0 %v411_v0  ;;  %395 = vmatprep.subr.bf16.mxu1 %v411_v0  ;;  %v414_v3 = vld [vmem:[%s558_s1 + $0x8] sm:$0xff]   ;;  %v416_v5 = vld [vmem:[%s558_s1 + $0x10] sm:$0xff]  }
   0x3   :  { %356 = vmatpush3.bf16.msra.mxu0 %v412_v1  ;;  %403 = vmatpush3.bf16.msra.mxu1 %v412_v1  ;;  %v417_v6 = vld [vmem:[%s558_s1 + $0x58] sm:$0xff]   ;;  %v419_v8 = vld [vmem:[%s558_s1 + $0x60] sm:$0xff]   ;;  %v421_v10 = vld [vmem:[%s558_s1 + $0x68] sm:$0xff]  }
   0x4   :  { %357 = vmatprep.subr.bf16.mxu0 %v413_v2  ;;  %396 = vmatprep.subr.bf16.mxu1 %v413_v2  ;;  %v418_v7 = vld [vmem:[%s558_s1 + $0x18] sm:$0xff]   ;;  %v420_v9 = vld [vmem:[%s558_s1 + $0x20] sm:$0xff]   ;;  %v422_v13 = vld [vmem:[%s558_s1 + $0x28] sm:$0xff]  }
   0x5   :  { %v429_v11 = vld [vmem:[%s559_s0 + $0x4] ss:$8 sps:$4 sm:$0xff]   ;;  %v423_v14 = vld [vmem:[%s558_s1 + $0x70] sm:$0xff]   ;;  %v425_v16 = vld [vmem:[%s558_s1 + $0x78] sm:$0xff]  }
   0x6   :  { %v432_v12 = vld [vmem:[%s559_s0 + $0x24] ss:$8 sps:$4 sm:$0xff]   ;;  %243 = vmatprep.mubr.bf16.mxu0 %v429_v11  ;;  %v424_v15 = vld [vmem:[%s558_s1 + $0x30] sm:$0xff]   ;;  %v426_v17 = vld [vmem:[%s558_s1 + $0x38] sm:$0xff]  }
   0x7   :  { %358 = vmatpush3.bf16.msra.mxu0 %v414_v3  ;;  %404 = vmatpush3.bf16.msra.mxu1 %v414_v3  ;;  %v427_v18 = vld [vmem:[%s559_s0] ss:$8 sps:$4 sm:$0xff]   ;;  %v433_v20 = vld [vmem:[%s559_s0 + $0x14] ss:$8 sps:$4 sm:$0xff]   ;;  %v437_v22 = vld [vmem:[%s559_s0 + $0x10] ss:$8 sps:$4 sm:$0xff]  }
   0x8   :  { %359 = vmatprep.subr.bf16.mxu0 %v415_v4  ;;  %397 = vmatprep.subr.bf16.mxu1 %v415_v4  ;;  %v430_v19 = vld [vmem:[%s559_s0 + $0x20] ss:$8 sps:$4 sm:$0xff]   ;;  %v435_v21 = vld [vmem:[%s559_s0 + $0x34] ss:$8 sps:$4 sm:$0xff]   ;;  %v438_v23 = vld [vmem:[%s559_s0 + $0x30] ss:$8 sps:$4 sm:$0xff]  }
   0x9   :  { %259 = vmatprep.mubr.bf16.mxu1 %v432_v12  ;;  %v354_v27 = vld [vmem:[%s560_s2] ss:$0 sm:$0xff] }
   0xb   :  { %360 = vmatpush3.bf16.msra.mxu0 %v416_v5  ;;  %405 = vmatpush3.bf16.msra.mxu1 %v416_v5 }
   0xc   :  { %361 = vmatprep.subr.bf16.mxu0 %v417_v6  ;;  %398 = vmatprep.subr.bf16.mxu1 %v417_v6 }
   0xf   :  { %362 = vmatpush3.bf16.msra.mxu0 %v418_v7  ;;  %406 = vmatpush3.bf16.msra.mxu1 %v418_v7 }
  0x10   :  { %363 = vmatprep.subr.bf16.mxu0 %v419_v8  ;;  %399 = vmatprep.subr.bf16.mxu1 %v419_v8 }
  0x13   :  { %364 = vmatpush3.bf16.msra.mxu0 %v420_v9  ;;  %407 = vmatpush3.bf16.msra.mxu1 %v420_v9 }
  0x14   :  { %365 = vmatprep.subr.bf16.mxu0 %v421_v10  ;;  %400 = vmatprep.subr.bf16.mxu1 %v421_v10 }
  0x17   :  { %366 = vmatpush3.bf16.msra.mxu0 %v422_v13  ;;  %408 = vmatpush3.bf16.msra.mxu1 %v422_v13 }
  0x18   :  { %367 = vmatprep.subr.bf16.mxu0 %v423_v14  ;;  %401 = vmatprep.subr.bf16.mxu1 %v423_v14 }
  0x1b   :  { %368 = vmatpush3.bf16.msra.mxu0 %v424_v15  ;;  %409 = vmatpush3.bf16.msra.mxu1 %v424_v15 }
  0x1c   :  { %369 = vmatprep.subr.bf16.mxu0 %v425_v16  ;;  %402 = vmatprep.subr.bf16.mxu1 %v425_v16 }
  0x1f   :  { %370 = vmatpush3.bf16.msra.mxu0 %v426_v17  ;;  %410 = vmatpush3.bf16.msra.mxu1 %v426_v17 }
  0x22   :  { %244 = vmatmul.mubr.bf16.vlgmr.msra.gmra.mrb[0].mxu0 %v427_v18  ;;  %260 = vmatmul.mubr.bf16.vlgmr.msra.gmra.mrb[0].mxu1 %v430_v19 }
  0x23   :  { %251 = vmatprep.mubr.bf16.mxu0 %v433_v20  ;;  %267 = vmatprep.mubr.bf16.mxu1 %v435_v21 }
  0x2a   :  { %252 = vmatmul.mubr.bf16.gmra.mrb[4].mxu0 %v437_v22  ;;  %268 = vmatmul.mubr.bf16.gmra.mrb[4].mxu1 %v438_v23 }
  0xf5   :  { %v371_v24 = vpop.f32.mrb[0].mxu0  ;;  %v383_v25 = vpop.f32.mrb[0].mxu1 }
  0xf6   :  { %v372_v26 = vpop.f32.mrb[1].mxu0  ;;  %v384_v28 = vpop.f32.mrb[1].mxu1 }
  0xf7   :  { %v373_v29 = vadd.f32 %v372_v26, %v371_v24  ;;  %v385_v30 = vadd.f32 %v384_v28, %v383_v25  ;;  %v374_v31 = vpop.f32.mrb[2].mxu0  ;;  %v386_v32 = vpop.f32.mrb[2].mxu1 }
  0xf8   :  { %v375_v33 = vpop.f32.mrb[3].mxu0  ;;  %v387_v34 = vpop.f32.mrb[3].mxu1 }
  0xf9   :  { %v310_v35 = vadd.f32 %v373_v29, %v354_v27  ;;  %v314_v36 = vadd.f32 %v385_v30, %v354_v27  ;;  %v376_v37 = vadd.f32 %v375_v33, %v374_v31  ;;  %v388_v38 = vadd.f32 %v387_v34, %v386_v32 }
  0xfb   :  { %318 = vst [vmem:[%s561_s3] sm:$0xff] %v310_v35  ;;  %322 = vst [vmem:[%s561_s3 + $0x20] sm:$0xff] %v314_v36  ;;  %v311_v39 = vadd.f32 %v376_v37, %v354_v27  ;;  %v315_v40 = vadd.f32 %v388_v38, %v354_v27 }
  0xfd   :  { %319 = vst [vmem:[%s561_s3 + $0x8] sm:$0xff] %v311_v39  ;;  %323 = vst [vmem:[%s561_s3 + $0x28] sm:$0xff] %v315_v40  ;;  %v377_v41 = vpop.f32.mrb[4].mxu0  ;;  %v389_v42 = vpop.f32.mrb[4].mxu1 }
  0xfe   :  { %v378_v43 = vpop.f32.mrb[5].mxu0  ;;  %v390_v44 = vpop.f32.mrb[5].mxu1 }
  0xff   :  { %v379_v45 = vadd.f32 %v378_v43, %v377_v41  ;;  %v391_v46 = vadd.f32 %v390_v44, %v389_v42  ;;  %v380_v47 = vpop.f32.mrb[6].mxu0  ;;  %v392_v48 = vpop.f32.mrb[6].mxu1 }
 0x100   :  { %v381_v49 = vpop.f32.mrb[7].mxu0  ;;  %v393_v50 = vpop.f32.mrb[7].mxu1 }
 0x101   :  { %v312_v51 = vadd.f32 %v379_v45, %v354_v27  ;;  %v316_v52 = vadd.f32 %v391_v46, %v354_v27  ;;  %v382_v53 = vadd.f32 %v381_v49, %v380_v47  ;;  %v394_v54 = vadd.f32 %v393_v50, %v392_v48 }
 0x103   :  { %320 = vst [vmem:[%s561_s3 + $0x10] sm:$0xff] %v312_v51  ;;  %324 = vst [vmem:[%s561_s3 + $0x30] sm:$0xff] %v316_v52  ;;  %v313_v55 = vadd.f32 %v382_v53, %v354_v27  ;;  %v317_v56 = vadd.f32 %v394_v54, %v354_v27 }
 0x105   :  { %321 = vst [vmem:[%s561_s3 + $0x18] sm:$0xff] %v313_v55  ;;  %325 = vst [vmem:[%s561_s3 + $0x38] sm:$0xff] %v317_v56 }

// kernel: layered_neural_renderer_forward.16
= control target key start
LH: loop header
LB: loop body
LE: loop exit
PB: predicated region body
PF: predicated region fallthrough
CT: control target
= control target key end

     0   :  { %s665_s1 = inlined_call_operand.vmem [shape: bf16[512,128], index: 1, kind: input, shape index: {}]   ;;  %s666_s0 = inlined_call_operand.vmem [shape: bf16[16,512], index: 0, kind: input, shape index: {}]   ;;  %s667_s2 = inlined_call_operand.vmem [shape: f32[1,128], index: 2, kind: input, shape index: {}]   ;;  %s668_s3 = inlined_call_operand.vmem [shape: f32[16,128], index: 3, kind: output, shape index: {}]  }
   0x1   :  { %v490_v0 = vld [vmem:[%s665_s1 + $0x40] sm:$0xff]   ;;  %v494_v4 = vld [vmem:[%s665_s1 + $0x48] sm:$0xff]   ;;  %v498_v8 = vld [vmem:[%s665_s1 + $0x50] sm:$0xff]  }
   0x2   :  { %v491_v1 = vld [vmem:[%s665_s1 + $0xc0] sm:$0xff]   ;;  %446 = vmatprep.subr.bf16.mxu0 %v490_v0  ;;  %v495_v5 = vld [vmem:[%s665_s1 + $0xc8] sm:$0xff]   ;;  %v499_v9 = vld [vmem:[%s665_s1 + $0xd0] sm:$0xff]  }
   0x3   :  { %v492_v2 = vld [vmem:[%s665_s1] sm:$0xff]   ;;  %468 = vmatprep.subr.bf16.mxu1 %v491_v1  ;;  %v496_v6 = vld [vmem:[%s665_s1 + $0x8] sm:$0xff]   ;;  %v500_v10 = vld [vmem:[%s665_s1 + $0x10] sm:$0xff]  }
   0x4   :  { %v493_v3 = vld [vmem:[%s665_s1 + $0x80] sm:$0xff]   ;;  %447 = vmatpush3.bf16.msra.mxu0 %v492_v2  ;;  %v497_v7 = vld [vmem:[%s665_s1 + $0x88] sm:$0xff]   ;;  %v501_v11 = vld [vmem:[%s665_s1 + $0x90] sm:$0xff]  }
   0x5   :  { %469 = vmatpush3.bf16.msra.mxu1 %v493_v3  ;;  %448 = vmatprep.subr.bf16.mxu0 %v494_v4  ;;  %v502_v12 = vld [vmem:[%s665_s1 + $0x58] sm:$0xff]   ;;  %v506_v16 = vld [vmem:[%s665_s1 + $0x60] sm:$0xff]   ;;  %v510_v20 = vld [vmem:[%s665_s1 + $0x68] sm:$0xff]  }
   0x6   :  { %470 = vmatprep.subr.bf16.mxu1 %v495_v5  ;;  %v503_v13 = vld [vmem:[%s665_s1 + $0xd8] sm:$0xff]   ;;  %v507_v17 = vld [vmem:[%s665_s1 + $0xe0] sm:$0xff]   ;;  %v511_v21 = vld [vmem:[%s665_s1 + $0xe8] sm:$0xff]  }
   0x7   :  { %v504_v14 = vld [vmem:[%s665_s1 + $0x18] sm:$0xff]   ;;  %v508_v18 = vld [vmem:[%s665_s1 + $0x20] sm:$0xff]   ;;  %v512_v22 = vld [vmem:[%s665_s1 + $0x28] sm:$0xff]  }
   0x8   :  { %449 = vmatpush3.bf16.msra.mxu0 %v496_v6  ;;  %v505_v15 = vld [vmem:[%s665_s1 + $0x98] sm:$0xff]   ;;  %v509_v19 = vld [vmem:[%s665_s1 + $0xa0] sm:$0xff]   ;;  %v513_v23 = vld [vmem:[%s665_s1 + $0xa8] sm:$0xff]  }
   0x9   :  { %471 = vmatpush3.bf16.msra.mxu1 %v497_v7  ;;  %450 = vmatprep.subr.bf16.mxu0 %v498_v8  ;;  %v514_v24 = vld [vmem:[%s665_s1 + $0x70] sm:$0xff]   ;;  %v518_v28 = vld [vmem:[%s665_s1 + $0x78] sm:$0xff]   ;;  %v445_v45 = vld [vmem:[%s667_s2] ss:$0 sm:$0xff] }
   0xa   :  { %472 = vmatprep.subr.bf16.mxu1 %v499_v9  ;;  %v515_v25 = vld [vmem:[%s665_s1 + $0xf0] sm:$0xff]   ;;  %v519_v29 = vld [vmem:[%s665_s1 + $0xf8] sm:$0xff]  }
   0xb   :  { %v516_v26 = vld [vmem:[%s665_s1 + $0x30] sm:$0xff]   ;;  %v520_v30 = vld [vmem:[%s665_s1 + $0x38] sm:$0xff]  }
   0xc   :  { %451 = vmatpush3.bf16.msra.mxu0 %v500_v10  ;;  %v517_v27 = vld [vmem:[%s665_s1 + $0xb0] sm:$0xff]   ;;  %v521_v31 = vld [vmem:[%s665_s1 + $0xb8] sm:$0xff]  }
   0xd   :  { %473 = vmatpush3.bf16.msra.mxu1 %v501_v11  ;;  %452 = vmatprep.subr.bf16.mxu0 %v502_v12  ;;  %v522_v32 = vld [vmem:[%s666_s0] ss:$16 sps:$4 sm:$0xff]   ;;  %v524_v33 = vld [vmem:[%s666_s0 + $0x4] ss:$16 sps:$4 sm:$0xff]   ;;  %v525_v34 = vld [vmem:[%s666_s0 + $0x8] ss:$16 sps:$4 sm:$0xff]  }
   0xe   :  { %474 = vmatprep.subr.bf16.mxu1 %v503_v13  ;;  %v527_v35 = vld [vmem:[%s666_s0 + $0xc] ss:$16 sps:$4 sm:$0xff]   ;;  %335 = vmatprep.mubr.bf16.mxu0 %v524_v33 }
   0xf   :  { %376 = vmatprep.mubr.bf16.mxu1 %v527_v35 }
  0x10   :  { %453 = vmatpush3.bf16.msra.mxu0 %v504_v14 }
  0x11   :  { %475 = vmatpush3.bf16.msra.mxu1 %v505_v15  ;;  %454 = vmatprep.subr.bf16.mxu0 %v506_v16 }
  0x12   :  { %476 = vmatprep.subr.bf16.mxu1 %v507_v17 }
  0x14   :  { %455 = vmatpush3.bf16.msra.mxu0 %v508_v18 }
  0x15   :  { %477 = vmatpush3.bf16.msra.mxu1 %v509_v19  ;;  %456 = vmatprep.subr.bf16.mxu0 %v510_v20 }
  0x16   :  { %478 = vmatprep.subr.bf16.mxu1 %v511_v21 }
  0x18   :  { %457 = vmatpush3.bf16.msra.mxu0 %v512_v22 }
  0x19   :  { %479 = vmatpush3.bf16.msra.mxu1 %v513_v23  ;;  %458 = vmatprep.subr.bf16.mxu0 %v514_v24 }
  0x1a   :  { %480 = vmatprep.subr.bf16.mxu1 %v515_v25 }
  0x1c   :  { %459 = vmatpush3.bf16.msra.mxu0 %v516_v26 }
  0x1d   :  { %481 = vmatpush3.bf16.msra.mxu1 %v517_v27  ;;  %460 = vmatprep.subr.bf16.mxu0 %v518_v28 }
  0x1e   :  { %482 = vmatprep.subr.bf16.mxu1 %v519_v29 }
  0x20   :  { %461 = vmatpush3.bf16.msra.mxu0 %v520_v30 }
  0x21   :  { %483 = vmatpush3.bf16.msra.mxu1 %v521_v31 }
  0x23   :  { %336 = vmatmul.mubr.bf16.vlgmr.msra.gmra.mrb[0].mxu0 %v522_v32 }
  0x24   :  { %377 = vmatmul.mubr.bf16.vlgmr.msra.gmra.mrb[0].mxu1 %v525_v34 }
  0xf6   :  { %v462_v36 = vpop.f32.mrb[0].mxu0 }
  0xf7   :  { %v484_v37 = vpop.f32.mrb[0].mxu1  ;;  %v463_v38 = vpop.f32.mrb[1].mxu0 }
  0xf8   :  { %v464_v39 = vadd.f32 %v463_v38, %v462_v36  ;;  %v485_v40 = vpop.f32.mrb[1].mxu1  ;;  %v465_v41 = vpop.f32.mrb[2].mxu0 }
  0xf9   :  { %v486_v42 = vadd.f32 %v485_v40, %v484_v37  ;;  %v487_v43 = vpop.f32.mrb[2].mxu1  ;;  %v466_v44 = vpop.f32.mrb[3].mxu0 }
  0xfa   :  { %v467_v46 = vadd.f32 %v466_v44, %v465_v41  ;;  %v488_v47 = vpop.f32.mrb[3].mxu1 }
  0xfb   :  { %v379_v48 = vadd.f32 %v486_v42, %v464_v39  ;;  %v489_v49 = vadd.f32 %v488_v47, %v487_v43 }
  0xfd   :  { %v401_v50 = vadd.f32 %v445_v45, %v379_v48  ;;  %v382_v51 = vadd.f32 %v489_v49, %v467_v46 }
  0xff   :  { %403 = vst [vmem:[%s668_s3] sm:$0xff] %v401_v50  ;;  %v402_v52 = vadd.f32 %v445_v45, %v382_v51 }
 0x101   :  { %404 = vst [vmem:[%s668_s3 + $0x8] sm:$0xff] %v402_v52 }

// kernel: layered_neural_renderer_forward.19
= control target key start
LH: loop header
LB: loop body
LE: loop exit
PB: predicated region body
PF: predicated region fallthrough
CT: control target
= control target key end

     0   :  { %s371_s1 = inlined_call_operand.vmem [shape: bf16[256,128], index: 1, kind: input, shape index: {}]   ;;  %s372_s0 = inlined_call_operand.vmem [shape: bf16[16,256], index: 0, kind: input, shape index: {}]   ;;  %s373_s2 = inlined_call_operand.vmem [shape: f32[1,128], index: 2, kind: input, shape index: {}]   ;;  %s374_s3 = inlined_call_operand.vmem [shape: f32[16,128], index: 3, kind: output, shape index: {}]  }
   0x1   :  { %v269_v0 = vld [vmem:[%s371_s1 + $0x40] sm:$0xff]   ;;  %v271_v2 = vld [vmem:[%s371_s1 + $0x48] sm:$0xff]   ;;  %v273_v4 = vld [vmem:[%s371_s1 + $0x50] sm:$0xff]  }
   0x2   :  { %v270_v1 = vld [vmem:[%s371_s1] sm:$0xff]   ;;  %247 = vmatprep.subr.bf16.mxu0 %v269_v0  ;;  %v272_v3 = vld [vmem:[%s371_s1 + $0x8] sm:$0xff]   ;;  %v274_v5 = vld [vmem:[%s371_s1 + $0x10] sm:$0xff]  }
   0x3   :  { %248 = vmatpush3.bf16.msra.mxu0 %v270_v1  ;;  %v275_v6 = vld [vmem:[%s371_s1 + $0x58] sm:$0xff]   ;;  %v277_v8 = vld [vmem:[%s371_s1 + $0x60] sm:$0xff]   ;;  %v279_v10 = vld [vmem:[%s371_s1 + $0x68] sm:$0xff]  }
   0x4   :  { %249 = vmatprep.subr.bf16.mxu0 %v271_v2  ;;  %v276_v7 = vld [vmem:[%s371_s1 + $0x18] sm:$0xff]   ;;  %v278_v9 = vld [vmem:[%s371_s1 + $0x20] sm:$0xff]   ;;  %v280_v12 = vld [vmem:[%s371_s1 + $0x28] sm:$0xff]  }
   0x5   :  { %v287_v11 = vld [vmem:[%s372_s0 + $0x4] ss:$8 sps:$4 sm:$0xff]   ;;  %v281_v13 = vld [vmem:[%s371_s1 + $0x70] sm:$0xff]   ;;  %v283_v15 = vld [vmem:[%s371_s1 + $0x78] sm:$0xff]  }
   0x6   :  { %195 = vmatprep.mubr.bf16.mxu0 %v287_v11  ;;  %v282_v14 = vld [vmem:[%s371_s1 + $0x30] sm:$0xff]   ;;  %v284_v16 = vld [vmem:[%s371_s1 + $0x38] sm:$0xff]   ;;  %v285_v17 = vld [vmem:[%s372_s0] ss:$8 sps:$4 sm:$0xff]  }
   0x7   :  { %250 = vmatpush3.bf16.msra.mxu0 %v272_v3  ;;  %v246_v20 = vld [vmem:[%s373_s2] ss:$0 sm:$0xff] }
   0x8   :  { %251 = vmatprep.subr.bf16.mxu0 %v273_v4 }
   0xb   :  { %252 = vmatpush3.bf16.msra.mxu0 %v274_v5 }
   0xc   :  { %253 = vmatprep.subr.bf16.mxu0 %v275_v6 }
   0xf   :  { %254 = vmatpush3.bf16.msra.mxu0 %v276_v7 }
  0x10   :  { %255 = vmatprep.subr.bf16.mxu0 %v277_v8 }
  0x13   :  { %256 = vmatpush3.bf16.msra.mxu0 %v278_v9 }
  0x14   :  { %257 = vmatprep.subr.bf16.mxu0 %v279_v10 }
  0x17   :  { %258 = vmatpush3.bf16.msra.mxu0 %v280_v12 }
  0x18   :  { %259 = vmatprep.subr.bf16.mxu0 %v281_v13 }
  0x1b   :  { %260 = vmatpush3.bf16.msra.mxu0 %v282_v14 }
  0x1c   :  { %261 = vmatprep.subr.bf16.mxu0 %v283_v15 }
  0x1f   :  { %262 = vmatpush3.bf16.msra.mxu0 %v284_v16 }
  0x22   :  { %196 = vmatmul.mubr.bf16.vlgmr.msra.gmra.mrb[0].mxu0 %v285_v17 }
  0xf5   :  { %v263_v18 = vpop.f32.mrb[0].mxu0 }
  0xf6   :  { %v264_v19 = vpop.f32.mrb[1].mxu0 }
  0xf7   :  { %v265_v21 = vadd.f32 %v264_v19, %v263_v18  ;;  %v266_v22 = vpop.f32.mrb[2].mxu0 }
  0xf8   :  { %v267_v23 = vpop.f32.mrb[3].mxu0 }
  0xf9   :  { %v220_v24 = vadd.f32 %v265_v21, %v246_v20  ;;  %v268_v25 = vadd.f32 %v267_v23, %v266_v22 }
  0xfb   :  { %222 = vst [vmem:[%s374_s3] sm:$0xff] %v220_v24  ;;  %v221_v26 = vadd.f32 %v268_v25, %v246_v20 }
  0xfd   :  { %223 = vst [vmem:[%s374_s3 + $0x8] sm:$0xff] %v221_v26 }

// kernel: layered_neural_renderer_forward.20
= control target key start
LH: loop header
LB: loop body
LE: loop exit
PB: predicated region body
PF: predicated region fallthrough
CT: control target
= control target key end

     0   :  { %s501_s1 = inlined_call_operand.vmem [shape: bf16[256,128], index: 1, kind: input, shape index: {}]   ;;  %s502_s0 = inlined_call_operand.vmem [shape: bf16[48,256], index: 0, kind: input, shape index: {}]   ;;  %s503_s2 = inlined_call_operand.vmem [shape: f32[1,128], index: 2, kind: input, shape index: {}]   ;;  %s504_s3 = inlined_call_operand.vmem [shape: f32[48,128], index: 3, kind: output, shape index: {}]  }
   0x1   :  { %v369_v0 = vld [vmem:[%s501_s1 + $0x40] sm:$0xff]   ;;  %v371_v2 = vld [vmem:[%s501_s1 + $0x48] sm:$0xff]   ;;  %v373_v4 = vld [vmem:[%s501_s1 + $0x50] sm:$0xff]  }
   0x2   :  { %v370_v1 = vld [vmem:[%s501_s1] sm:$0xff]   ;;  %353 = vmatprep.subr.bf16.mxu1 %v369_v0  ;;  %319 = vmatprep.subr.bf16.mxu0 %v369_v0  ;;  %v372_v3 = vld [vmem:[%s501_s1 + $0x8] sm:$0xff]   ;;  %v374_v5 = vld [vmem:[%s501_s1 + $0x10] sm:$0xff]  }
   0x3   :  { %361 = vmatpush3.bf16.msra.mxu1 %v370_v1  ;;  %320 = vmatpush3.bf16.msra.mxu0 %v370_v1  ;;  %v375_v6 = vld [vmem:[%s501_s1 + $0x58] sm:$0xff]   ;;  %v377_v8 = vld [vmem:[%s501_s1 + $0x60] sm:$0xff]   ;;  %v379_v10 = vld [vmem:[%s501_s1 + $0x68] sm:$0xff]  }
   0x4   :  { %354 = vmatprep.subr.bf16.mxu1 %v371_v2  ;;  %321 = vmatprep.subr.bf16.mxu0 %v371_v2  ;;  %v376_v7 = vld [vmem:[%s501_s1 + $0x18] sm:$0xff]   ;;  %v378_v9 = vld [vmem:[%s501_s1 + $0x20] sm:$0xff]   ;;  %v380_v13 = vld [vmem:[%s501_s1 + $0x28] sm:$0xff]  }
   0x5   :  { %v387_v11 = vld [vmem:[%s502_s0 + $0x14] ss:$8 sps:$4 sm:$0xff]   ;;  %v390_v12 = vld [vmem:[%s502_s0 + $0x4] ss:$8 sps:$4 sm:$0xff]   ;;  %v385_v18 = vld [vmem:[%s502_s0 + $0x10] ss:$8 sps:$4 sm:$0xff]  }
   0x6   :  { %v381_v14 = vld [vmem:[%s501_s1 + $0x70] sm:$0xff]   ;;  %235 = vmatprep.mubr.bf16.mxu1 %v387_v11  ;;  %227 = vmatprep.mubr.bf16.mxu0 %v390_v12  ;;  %v383_v16 = vld [vmem:[%s501_s1 + $0x78] sm:$0xff]   ;;  %v388_v19 = vld [vmem:[%s502_s0] ss:$8 sps:$4 sm:$0xff]  }
   0x7   :  { %362 = vmatpush3.bf16.msra.mxu1 %v372_v3  ;;  %322 = vmatpush3.bf16.msra.mxu0 %v372_v3  ;;  %v382_v15 = vld [vmem:[%s501_s1 + $0x30] sm:$0xff]   ;;  %v384_v17 = vld [vmem:[%s501_s1 + $0x38] sm:$0xff]   ;;  %v391_v20 = vld [vmem:[%s502_s0 + $0x24] ss:$8 sps:$4 sm:$0xff]  }
   0x8   :  { %355 = vmatprep.subr.bf16.mxu1 %v373_v4  ;;  %323 = vmatprep.subr.bf16.mxu0 %v373_v4  ;;  %v393_v21 = vld [vmem:[%s502_s0 + $0x20] ss:$8 sps:$4 sm:$0xff]  }
   0x9   :  { %v318_v25 = vld [vmem:[%s503_s2] ss:$0 sm:$0xff] }
   0xb   :  { %363 = vmatpush3.bf16.msra.mxu1 %v374_v5  ;;  %324 = vmatpush3.bf16.msra.mxu0 %v374_v5 }
   0xc   :  { %356 = vmatprep.subr.bf16.mxu1 %v375_v6  ;;  %325 = vmatprep.subr.bf16.mxu0 %v375_v6 }
   0xf   :  { %364 = vmatpush3.bf16.msra.mxu1 %v376_v7  ;;  %326 = vmatpush3.bf16.msra.mxu0 %v376_v7 }
  0x10   :  { %357 = vmatprep.subr.bf16.mxu1 %v377_v8  ;;  %327 = vmatprep.subr.bf16.mxu0 %v377_v8 }
  0x13   :  { %365 = vmatpush3.bf16.msra.mxu1 %v378_v9  ;;  %328 = vmatpush3.bf16.msra.mxu0 %v378_v9 }
  0x14   :  { %358 = vmatprep.subr.bf16.mxu1 %v379_v10  ;;  %329 = vmatprep.subr.bf16.mxu0 %v379_v10 }
  0x17   :  { %366 = vmatpush3.bf16.msra.mxu1 %v380_v13  ;;  %330 = vmatpush3.bf16.msra.mxu0 %v380_v13 }
  0x18   :  { %359 = vmatprep.subr.bf16.mxu1 %v381_v14  ;;  %331 = vmatprep.subr.bf16.mxu0 %v381_v14 }
  0x1b   :  { %367 = vmatpush3.bf16.msra.mxu1 %v382_v15  ;;  %332 = vmatpush3.bf16.msra.mxu0 %v382_v15 }
  0x1c   :  { %360 = vmatprep.subr.bf16.mxu1 %v383_v16  ;;  %333 = vmatprep.subr.bf16.mxu0 %v383_v16 }
  0x1f   :  { %368 = vmatpush3.bf16.msra.mxu1 %v384_v17  ;;  %334 = vmatpush3.bf16.msra.mxu0 %v384_v17 }
  0x22   :  { %236 = vmatmul.mubr.bf16.vlgmr.msra.gmra.mrb[0].mxu1 %v385_v18  ;;  %228 = vmatmul.mubr.bf16.vlgmr.msra.gmra.mrb[0].mxu0 %v388_v19 }
  0x23   :  { %243 = vmatprep.mubr.bf16.mxu1 %v391_v20 }
  0x2a   :  { %244 = vmatmul.mubr.bf16.gmra.mrb[4].mxu1 %v393_v21 }
  0xf5   :  { %v341_v22 = vpop.f32.mrb[0].mxu1  ;;  %v335_v23 = vpop.f32.mrb[0].mxu0 }
  0xf6   :  { %v342_v24 = vpop.f32.mrb[1].mxu1  ;;  %v336_v26 = vpop.f32.mrb[1].mxu0 }
  0xf7   :  { %v343_v27 = vadd.f32 %v342_v24, %v341_v22  ;;  %v344_v28 = vpop.f32.mrb[2].mxu1  ;;  %v337_v29 = vadd.f32 %v336_v26, %v335_v23  ;;  %v338_v30 = vpop.f32.mrb[2].mxu0 }
  0xf8   :  { %v345_v31 = vpop.f32.mrb[3].mxu1  ;;  %v339_v32 = vpop.f32.mrb[3].mxu0 }
  0xf9   :  { %v282_v33 = vadd.f32 %v343_v27, %v318_v25  ;;  %v346_v34 = vadd.f32 %v345_v31, %v344_v28  ;;  %v280_v35 = vadd.f32 %v337_v29, %v318_v25  ;;  %v340_v36 = vadd.f32 %v339_v32, %v338_v30 }
  0xfb   :  { %288 = vst [vmem:[%s504_s3 + $0x10] sm:$0xff] %v282_v33  ;;  %v283_v37 = vadd.f32 %v346_v34, %v318_v25  ;;  %286 = vst [vmem:[%s504_s3] sm:$0xff] %v280_v35  ;;  %v281_v38 = vadd.f32 %v340_v36, %v318_v25 }
  0xfd   :  { %289 = vst [vmem:[%s504_s3 + $0x18] sm:$0xff] %v283_v37  ;;  %287 = vst [vmem:[%s504_s3 + $0x8] sm:$0xff] %v281_v38  ;;  %v347_v39 = vpop.f32.mrb[4].mxu1 }
  0xfe   :  { %v348_v40 = vpop.f32.mrb[5].mxu1 }
  0xff   :  { %v349_v41 = vadd.f32 %v348_v40, %v347_v39  ;;  %v350_v42 = vpop.f32.mrb[6].mxu1 }
 0x100   :  { %v351_v43 = vpop.f32.mrb[7].mxu1 }
 0x101   :  { %v284_v44 = vadd.f32 %v349_v41, %v318_v25  ;;  %v352_v45 = vadd.f32 %v351_v43, %v350_v42 }
 0x103   :  { %290 = vst [vmem:[%s504_s3 + $0x20] sm:$0xff] %v284_v44  ;;  %v285_v46 = vadd.f32 %v352_v45, %v318_v25 }
 0x105   :  { %291 = vst [vmem:[%s504_s3 + $0x28] sm:$0xff] %v285_v46 }

// kernel: layered_neural_renderer_forward.21
= control target key start
LH: loop header
LB: loop body
LE: loop exit
PB: predicated region body
PF: predicated region fallthrough
CT: control target
= control target key end

     0   :  { %s745_s1 = inlined_call_operand.vmem [shape: bf16[256,128], index: 1, kind: input, shape index: {}]   ;;  %s746_s0 = inlined_call_operand.vmem [shape: bf16[112,256], index: 0, kind: input, shape index: {}]   ;;  %s747_s2 = inlined_call_operand.vmem [shape: f32[1,128], index: 2, kind: input, shape index: {}]   ;;  %s748_s3 = inlined_call_operand.vmem [shape: f32[112,128], index: 3, kind: output, shape index: {}]  }
   0x1   :  { %v537_v0 = vld [vmem:[%s745_s1 + $0x40] sm:$0xff]   ;;  %v539_v2 = vld [vmem:[%s745_s1 + $0x48] sm:$0xff]   ;;  %v541_v4 = vld [vmem:[%s745_s1 + $0x50] sm:$0xff]  }
   0x2   :  { %v538_v1 = vld [vmem:[%s745_s1] sm:$0xff]   ;;  %463 = vmatprep.subr.bf16.mxu0 %v537_v0  ;;  %521 = vmatprep.subr.bf16.mxu1 %v537_v0  ;;  %v540_v3 = vld [vmem:[%s745_s1 + $0x8] sm:$0xff]   ;;  %v542_v5 = vld [vmem:[%s745_s1 + $0x10] sm:$0xff]  }
   0x3   :  { %464 = vmatpush3.bf16.msra.mxu0 %v538_v1  ;;  %529 = vmatpush3.bf16.msra.mxu1 %v538_v1  ;;  %v543_v6 = vld [vmem:[%s745_s1 + $0x58] sm:$0xff]   ;;  %v545_v8 = vld [vmem:[%s745_s1 + $0x60] sm:$0xff]   ;;  %v547_v10 = vld [vmem:[%s745_s1 + $0x68] sm:$0xff]  }
   0x4   :  { %465 = vmatprep.subr.bf16.mxu0 %v539_v2  ;;  %522 = vmatprep.subr.bf16.mxu1 %v539_v2  ;;  %v544_v7 = vld [vmem:[%s745_s1 + $0x18] sm:$0xff]   ;;  %v546_v9 = vld [vmem:[%s745_s1 + $0x20] sm:$0xff]   ;;  %v548_v13 = vld [vmem:[%s745_s1 + $0x28] sm:$0xff]  }
   0x5   :  { %v555_v11 = vld [vmem:[%s746_s0 + $0x4] ss:$8 sps:$4 sm:$0xff]   ;;  %v549_v14 = vld [vmem:[%s745_s1 + $0x70] sm:$0xff]   ;;  %v551_v16 = vld [vmem:[%s745_s1 + $0x78] sm:$0xff]  }
   0x6   :  { %v558_v12 = vld [vmem:[%s746_s0 + $0x44] ss:$8 sps:$4 sm:$0xff]   ;;  %291 = vmatprep.mubr.bf16.mxu0 %v555_v11  ;;  %v550_v15 = vld [vmem:[%s745_s1 + $0x30] sm:$0xff]   ;;  %v552_v17 = vld [vmem:[%s745_s1 + $0x38] sm:$0xff]  }
   0x7   :  { %466 = vmatpush3.bf16.msra.mxu0 %v540_v3  ;;  %530 = vmatpush3.bf16.msra.mxu1 %v540_v3  ;;  %v553_v18 = vld [vmem:[%s746_s0] ss:$8 sps:$4 sm:$0xff]   ;;  %v559_v20 = vld [vmem:[%s746_s0 + $0x14] ss:$8 sps:$4 sm:$0xff]   ;;  %v561_v22 = vld [vmem:[%s746_s0 + $0x10] ss:$8 sps:$4 sm:$0xff]  }
   0x8   :  { %467 = vmatprep.subr.bf16.mxu0 %v541_v4  ;;  %523 = vmatprep.subr.bf16.mxu1 %v541_v4  ;;  %v556_v19 = vld [vmem:[%s746_s0 + $0x40] ss:$8 sps:$4 sm:$0xff]   ;;  %v562_v21 = vld [vmem:[%s746_s0 + $0x54] ss:$8 sps:$4 sm:$0xff]   ;;  %v564_v23 = vld [vmem:[%s746_s0 + $0x50] ss:$8 sps:$4 sm:$0xff]  }
   0x9   :  { %323 = vmatprep.mubr.bf16.mxu1 %v558_v12  ;;  %v565_v24 = vld [vmem:[%s746_s0 + $0x24] ss:$8 sps:$4 sm:$0xff]   ;;  %v567_v26 = vld [vmem:[%s746_s0 + $0x20] ss:$8 sps:$4 sm:$0xff]   ;;  %v571_v28 = vld [vmem:[%s746_s0 + $0x34] ss:$8 sps:$4 sm:$0xff]  }
   0xa   :  { %v568_v25 = vld [vmem:[%s746_s0 + $0x64] ss:$8 sps:$4 sm:$0xff]   ;;  %v570_v27 = vld [vmem:[%s746_s0 + $0x60] ss:$8 sps:$4 sm:$0xff]   ;;  %v573_v29 = vld [vmem:[%s746_s0 + $0x30] ss:$8 sps:$4 sm:$0xff]  }
   0xb   :  { %468 = vmatpush3.bf16.msra.mxu0 %v542_v5  ;;  %531 = vmatpush3.bf16.msra.mxu1 %v542_v5  ;;  %v687_v33 = vld [vmem:[%s747_s2] ss:$0 sm:$0xff] }
   0xc   :  { %469 = vmatprep.subr.bf16.mxu0 %v543_v6  ;;  %524 = vmatprep.subr.bf16.mxu1 %v543_v6 }
   0xf   :  { %470 = vmatpush3.bf16.msra.mxu0 %v544_v7  ;;  %532 = vmatpush3.bf16.msra.mxu1 %v544_v7 }
  0x10   :  { %471 = vmatprep.subr.bf16.mxu0 %v545_v8  ;;  %525 = vmatprep.subr.bf16.mxu1 %v545_v8 }
  0x13   :  { %472 = vmatpush3.bf16.msra.mxu0 %v546_v9  ;;  %533 = vmatpush3.bf16.msra.mxu1 %v546_v9 }
  0x14   :  { %473 = vmatprep.subr.bf16.mxu0 %v547_v10  ;;  %526 = vmatprep.subr.bf16.mxu1 %v547_v10 }
  0x17   :  { %474 = vmatpush3.bf16.msra.mxu0 %v548_v13  ;;  %534 = vmatpush3.bf16.msra.mxu1 %v548_v13 }
  0x18   :  { %475 = vmatprep.subr.bf16.mxu0 %v549_v14  ;;  %527 = vmatprep.subr.bf16.mxu1 %v549_v14 }
  0x1b   :  { %476 = vmatpush3.bf16.msra.mxu0 %v550_v15  ;;  %535 = vmatpush3.bf16.msra.mxu1 %v550_v15 }
  0x1c   :  { %477 = vmatprep.subr.bf16.mxu0 %v551_v16  ;;  %528 = vmatprep.subr.bf16.mxu1 %v551_v16 }
  0x1f   :  { %478 = vmatpush3.bf16.msra.mxu0 %v552_v17  ;;  %536 = vmatpush3.bf16.msra.mxu1 %v552_v17 }
  0x22   :  { %292 = vmatmul.mubr.bf16.vlgmr.msra.gmra.mrb[0].mxu0 %v553_v18  ;;  %324 = vmatmul.mubr.bf16.vlgmr.msra.gmra.mrb[0].mxu1 %v556_v19 }
  0x23   :  { %299 = vmatprep.mubr.bf16.mxu0 %v559_v20  ;;  %331 = vmatprep.mubr.bf16.mxu1 %v562_v21 }
  0x2a   :  { %300 = vmatmul.mubr.bf16.gmra.mrb[4].mxu0 %v561_v22  ;;  %332 = vmatmul.mubr.bf16.gmra.mrb[4].mxu1 %v564_v23 }
  0x2b   :  { %307 = vmatprep.mubr.bf16.mxu0 %v565_v24  ;;  %339 = vmatprep.mubr.bf16.mxu1 %v568_v25 }
  0x32   :  { %308 = vmatmul.mubr.bf16.gmra.mrb[8].mxu0 %v567_v26  ;;  %340 = vmatmul.mubr.bf16.gmra.mrb[8].mxu1 %v570_v27 }
  0x33   :  { %315 = vmatprep.mubr.bf16.mxu0 %v571_v28 }
  0x3a   :  { %316 = vmatmul.mubr.bf16.gmra.mrb[12].mxu0 %v573_v29 }
  0xf5   :  { %v479_v30 = vpop.f32.mrb[0].mxu0  ;;  %v503_v31 = vpop.f32.mrb[0].mxu1 }
  0xf6   :  { %v480_v32 = vpop.f32.mrb[1].mxu0  ;;  %v504_v34 = vpop.f32.mrb[1].mxu1 }
  0xf7   :  { %v481_v35 = vadd.f32 %v480_v32, %v479_v30  ;;  %v482_v36 = vpop.f32.mrb[2].mxu0  ;;  %v505_v37 = vadd.f32 %v504_v34, %v503_v31  ;;  %v506_v38 = vpop.f32.mrb[2].mxu1 }
  0xf8   :  { %v483_v39 = vpop.f32.mrb[3].mxu0  ;;  %v507_v40 = vpop.f32.mrb[3].mxu1 }
  0xf9   :  { %v400_v41 = vadd.f32 %v481_v35, %v687_v33  ;;  %v484_v42 = vadd.f32 %v483_v39, %v482_v36  ;;  %v408_v43 = vadd.f32 %v505_v37, %v687_v33  ;;  %v508_v44 = vadd.f32 %v507_v40, %v506_v38 }
  0xfb   :  { %414 = vst [vmem:[%s748_s3] sm:$0xff] %v400_v41  ;;  %v401_v45 = vadd.f32 %v484_v42, %v687_v33  ;;  %422 = vst [vmem:[%s748_s3 + $0x40] sm:$0xff] %v408_v43  ;;  %v409_v46 = vadd.f32 %v508_v44, %v687_v33 }
  0xfd   :  { %415 = vst [vmem:[%s748_s3 + $0x8] sm:$0xff] %v401_v45  ;;  %v485_v47 = vpop.f32.mrb[4].mxu0  ;;  %423 = vst [vmem:[%s748_s3 + $0x48] sm:$0xff] %v409_v46  ;;  %v509_v48 = vpop.f32.mrb[4].mxu1 }
  0xfe   :  { %v486_v49 = vpop.f32.mrb[5].mxu0  ;;  %v510_v50 = vpop.f32.mrb[5].mxu1 }
  0xff   :  { %v487_v51 = vadd.f32 %v486_v49, %v485_v47  ;;  %v488_v52 = vpop.f32.mrb[6].mxu0  ;;  %v511_v53 = vadd.f32 %v510_v50, %v509_v48  ;;  %v512_v54 = vpop.f32.mrb[6].mxu1 }
 0x100   :  { %v489_v55 = vpop.f32.mrb[7].mxu0  ;;  %v513_v56 = vpop.f32.mrb[7].mxu1 }
 0x101   :  { %v402_v57 = vadd.f32 %v487_v51, %v687_v33  ;;  %v490_v58 = vadd.f32 %v489_v55, %v488_v52  ;;  %v410_v59 = vadd.f32 %v511_v53, %v687_v33  ;;  %v514_v60 = vadd.f32 %v513_v56, %v512_v54 }
 0x103   :  { %416 = vst [vmem:[%s748_s3 + $0x10] sm:$0xff] %v402_v57  ;;  %v403_v61 = vadd.f32 %v490_v58, %v687_v33  ;;  %424 = vst [vmem:[%s748_s3 + $0x50] sm:$0xff] %v410_v59  ;;  %v411_v62 = vadd.f32 %v514_v60, %v687_v33 }
 0x105   :  { %417 = vst [vmem:[%s748_s3 + $0x18] sm:$0xff] %v403_v61  ;;  %v491_v63 = vpop.f32.mrb[8].mxu0  ;;  %425 = vst [vmem:[%s748_s3 + $0x58] sm:$0xff] %v411_v62  ;;  %v515_v0 = vpop.f32.mrb[8].mxu1 }
 0x106   :  { %v492_v1 = vpop.f32.mrb[9].mxu0  ;;  %v516_v2 = vpop.f32.mrb[9].mxu1 }
 0x107   :  { %v493_v3 = vadd.f32 %v492_v1, %v491_v63  ;;  %v494_v4 = vpop.f32.mrb[10].mxu0  ;;  %v517_v5 = vadd.f32 %v516_v2, %v515_v0  ;;  %v518_v6 = vpop.f32.mrb[10].mxu1 }
 0x108   :  { %v495_v7 = vpop.f32.mrb[11].mxu0  ;;  %v519_v8 = vpop.f32.mrb[11].mxu1 }
 0x109   :  { %v404_v9 = vadd.f32 %v493_v3, %v687_v33  ;;  %v496_v10 = vadd.f32 %v495_v7, %v494_v4  ;;  %v412_v11 = vadd.f32 %v517_v5, %v687_v33  ;;  %v520_v12 = vadd.f32 %v519_v8, %v518_v6 }
 0x10b   :  { %418 = vst [vmem:[%s748_s3 + $0x20] sm:$0xff] %v404_v9  ;;  %v405_v13 = vadd.f32 %v496_v10, %v687_v33  ;;  %426 = vst [vmem:[%s748_s3 + $0x60] sm:$0xff] %v412_v11  ;;  %v413_v14 = vadd.f32 %v520_v12, %v687_v33 }
 0x10d   :  { %419 = vst [vmem:[%s748_s3 + $0x28] sm:$0xff] %v405_v13  ;;  %v497_v15 = vpop.f32.mrb[12].mxu0  ;;  %427 = vst [vmem:[%s748_s3 + $0x68] sm:$0xff] %v413_v14 }
 0x10e   :  { %v498_v16 = vpop.f32.mrb[13].mxu0 }
 0x10f   :  { %v499_v17 = vadd.f32 %v498_v16, %v497_v15  ;;  %v500_v18 = vpop.f32.mrb[14].mxu0 }
 0x110   :  { %v501_v19 = vpop.f32.mrb[15].mxu0 }
 0x111   :  { %v406_v20 = vadd.f32 %v499_v17, %v687_v33  ;;  %v502_v21 = vadd.f32 %v501_v19, %v500_v18 }
 0x113   :  { %420 = vst [vmem:[%s748_s3 + $0x30] sm:$0xff] %v406_v20  ;;  %v407_v22 = vadd.f32 %v502_v21, %v687_v33 }
 0x115   :  { %421 = vst [vmem:[%s748_s3 + $0x38] sm:$0xff] %v407_v22 }

// kernel: layered_neural_renderer_forward.22
= control target key start
LH: loop header
LB: loop body
LE: loop exit
PB: predicated region body
PF: predicated region fallthrough
CT: control target
= control target key end

     0   :  { %s900_s12 = smov 0   ;;  %s902_s13 = smov 0   ;;  %s992_s0 = inlined_call_operand.vmem [shape: bf16[384,128], index: 0, kind: input, shape index: {}]   ;;  %s993_s1 = inlined_call_operand.vmem [shape: bf16[128,128], index: 1, kind: input, shape index: {}]   ;;  %s994_s2 = inlined_call_operand.vmem [shape: f32[1,128], index: 2, kind: input, shape index: {}]   ;;  %s995_s3 = inlined_call_operand.vmem [shape: f32[384,128], index: 3, kind: output, shape index: {}]  }
   0x1   :  { %s904_s14 = smov 0  }
   0x2 LB: > { %s32_s15 = sadd.s32 1, %s874_s13  ;;  %p728_p0 = scmp.ge.s32.totalorder %s878_s14, 1  ;;  %s878_s14 = sphi %s904_s14, %s13_s14   ;;  %s874_s13 = sphi %s902_s13, %s997_s13   ;;  %s870_s12 = sphi %s900_s12, %s996_s12  }
   0x3   : > { %p34_p1 = scmp.ge.s32.totalorder %s32_s15, 3  ;;  %p188_p2 = scmp.lt.s32.totalorder %s878_s14, 4 }
   0x5   : > { %s999_s15 = smov (%p34_p1, %s32_s15), 0  ;;  %p189_p3 = pnand %p728_p0, %p188_p2 }
   0x6   : > { %v840_v0 = vld [vmem:[%s993_s1] sm:$0xff] (!%p189_p3)   ;;  %s729_s18 = sshll.u32 (!%p189_p3), %s870_s12, 4  ;;  %v841_v1 = vld [vmem:[%s993_s1 + $0x8] sm:$0xff] (!%p189_p3)   ;;  %v842_v2 = vld [vmem:[%s993_s1 + $0x10] sm:$0xff] (!%p189_p3)  }
   0x7   : > { %192 = sbr.rel (%p189_p3) target bundleno = 265 (0x109), region = 32  ;;  %p230_p4 = scmp.lt.s32.totalorder (!%p189_p3), %s729_s18, 47  ;;  %768 = vmatprep.subr.bf16.mxu0 (!%p189_p3), %v840_v0  ;;  %800 = vmatprep.subr.bf16.mxu1 (!%p189_p3), %v840_v0  ;;  %v843_v3 = vld [vmem:[%s993_s1 + $0x18] sm:$0xff] (!%p189_p3)   ;;  %v844_v6 = vld [vmem:[%s993_s1 + $0x20] sm:$0xff] (!%p189_p3)   ;;  %v845_v7 = vld [vmem:[%s993_s1 + $0x28] sm:$0xff] (!%p189_p3)  }
   0x8   : > { %769 = vmatpush3.bf16.msra.mxu0 (!%p189_p3), %v840_v0  ;;  %808 = vmatpush3.bf16.msra.mxu1 (!%p189_p3), %v840_v0  ;;  %v846_v8 = vld [vmem:[%s993_s1 + $0x30] sm:$0xff] (!%p189_p3)   ;;  %v847_v9 = vld [vmem:[%s993_s1 + $0x38] sm:$0xff] (!%p189_p3)   ;;  %v749_v16 = vld [vmem:[%s994_s2] ss:$0 sm:$0xff] (!%p189_p3) }
   0x9   : > { %770 = vmatprep.subr.bf16.mxu0 (!%p189_p3), %v841_v1  ;;  %801 = vmatprep.subr.bf16.mxu1 (!%p189_p3), %v841_v1 }
   0xc   : > { %771 = vmatpush3.bf16.msra.mxu0 (!%p189_p3), %v841_v1  ;;  %809 = vmatpush3.bf16.msra.mxu1 (!%p189_p3), %v841_v1 }
   0xd   : > { %772 = vmatprep.subr.bf16.mxu0 (!%p189_p3), %v842_v2  ;;  %802 = vmatprep.subr.bf16.mxu1 (!%p189_p3), %v842_v2 }
   0xe   : > { %s1001_s18 = smov (!%p230_p4, %s729_s18), 47 }
   0xf   : > { %s730_s23 = sshll.u32 %s1001_s18, 2  ;;  %s732_s10 = sshll.u32 %s1001_s18, 3 }
  0x10   : > { %s933_s26 = scalar_lea.vmem %s992_s0, %s730_s23  ;;  %773 = vmatpush3.bf16.msra.mxu0 %v842_v2  ;;  %810 = vmatpush3.bf16.msra.mxu1 %v842_v2  ;;  %s965_s19 = scalar_lea.vmem %s995_s3, %s732_s10 }
  0x11   : > { %v848_v4 = vld [vmem:[%s933_s26] sm:$0xff]   ;;  %774 = vmatprep.subr.bf16.mxu0 %v843_v3  ;;  %803 = vmatprep.subr.bf16.mxu1 %v843_v3  ;;  %v850_v10 = vld [vmem:[%s933_s26 + $0x8] sm:$0xff]   ;;  %v852_v12 = vld [vmem:[%s933_s26 + $0x10] sm:$0xff]  }
  0x12   : > { %v849_v5 = vld [vmem:[%s933_s26 + $0x20] sm:$0xff]   ;;  %784 = vmatprep.mubr.bf16.mxu0 %v848_v4  ;;  %v851_v11 = vld [vmem:[%s933_s26 + $0x28] sm:$0xff]   ;;  %v853_v13 = vld [vmem:[%s933_s26 + $0x30] sm:$0xff]  }
  0x13   : > { %792 = vmatprep.mubr.bf16.mxu1 %v849_v5  ;;  %v854_v14 = vld [vmem:[%s933_s26 + $0x18] sm:$0xff]  }
  0x14   : > { %775 = vmatpush3.bf16.msra.mxu0 %v843_v3  ;;  %811 = vmatpush3.bf16.msra.mxu1 %v843_v3  ;;  %v855_v15 = vld [vmem:[%s933_s26 + $0x38] sm:$0xff]  }
  0x15   : > { %776 = vmatprep.subr.bf16.mxu0 %v844_v6  ;;  %804 = vmatprep.subr.bf16.mxu1 %v844_v6 }
  0x18   : > { %777 = vmatpush3.bf16.msra.mxu0 %v844_v6  ;;  %812 = vmatpush3.bf16.msra.mxu1 %v844_v6 }
  0x19   : > { %778 = vmatprep.subr.bf16.mxu0 %v845_v7  ;;  %805 = vmatprep.subr.bf16.mxu1 %v845_v7 }
  0x1c   : > { %779 = vmatpush3.bf16.msra.mxu0 %v845_v7  ;;  %813 = vmatpush3.bf16.msra.mxu1 %v845_v7 }
  0x1d   : > { %780 = vmatprep.subr.bf16.mxu0 %v846_v8  ;;  %806 = vmatprep.subr.bf16.mxu1 %v846_v8 }
  0x20   : > { %781 = vmatpush3.bf16.msra.mxu0 %v846_v8  ;;  %814 = vmatpush3.bf16.msra.mxu1 %v846_v8 }
  0x21   : > { %782 = vmatprep.subr.bf16.mxu0 %v847_v9  ;;  %807 = vmatprep.subr.bf16.mxu1 %v847_v9 }
  0x24   : > { %783 = vmatpush3.bf16.msra.mxu0 %v847_v9  ;;  %815 = vmatpush3.bf16.msra.mxu1 %v847_v9 }
  0x27   : > { %785 = vmatmul.mubr.bf16.vlgmr.msra.gmra.mrb[0].mxu0 %v850_v10  ;;  %793 = vmatmul.mubr.bf16.vlgmr.msra.gmra.mrb[0].mxu1 %v851_v11 }
  0x28   : > { %788 = vmatprep.mubr.bf16.mxu0 %v852_v12  ;;  %796 = vmatprep.mubr.bf16.mxu1 %v853_v13 }
  0x2f   : > { %789 = vmatmul.mubr.bf16.gmra.mrb[4].mxu0 %v854_v14  ;;  %797 = vmatmul.mubr.bf16.gmra.mrb[4].mxu1 %v855_v15 }
  0xfa   : > { %v786_v17 = vpop.f32.mrb[0].mxu0  ;;  %v794_v18 = vpop.f32.mrb[0].mxu1 }
  0xfb   : > { %v581_v19 = vadd.f32 %v786_v17, %v749_v16  ;;  %v589_v20 = vadd.f32 %v794_v18, %v749_v16  ;;  %v458_v21 = vpop.f32.mrb[1].mxu0  ;;  %v490_v22 = vpop.f32.mrb[1].mxu1 }
  0xfc   : > { %v579_v23 = vadd.f32 %v749_v16, %v458_v21  ;;  %v587_v24 = vadd.f32 %v749_v16, %v490_v22  ;;  %v787_v25 = vpop.f32.mrb[2].mxu0  ;;  %v795_v26 = vpop.f32.mrb[2].mxu1 }
  0xfd   : > { %597 = vst [vmem:[%s965_s19 + $0x10] sm:$0xff] %v581_v19  ;;  %605 = vst [vmem:[%s965_s19 + $0x50] sm:$0xff] %v589_v20  ;;  %v582_v27 = vadd.f32 %v787_v25, %v749_v16  ;;  %v590_v28 = vadd.f32 %v795_v26, %v749_v16  ;;  %v461_v29 = vpop.f32.mrb[3].mxu0  ;;  %v493_v30 = vpop.f32.mrb[3].mxu1 }
  0xfe   : > { %595 = vst [vmem:[%s965_s19] sm:$0xff] %v579_v23  ;;  %603 = vst [vmem:[%s965_s19 + $0x40] sm:$0xff] %v587_v24  ;;  %v580_v31 = vadd.f32 %v749_v16, %v461_v29  ;;  %v588_v32 = vadd.f32 %v749_v16, %v493_v30 }
  0xff   : > { %598 = vst [vmem:[%s965_s19 + $0x18] sm:$0xff] %v582_v27  ;;  %606 = vst [vmem:[%s965_s19 + $0x58] sm:$0xff] %v590_v28 }
 0x100   : > { %596 = vst [vmem:[%s965_s19 + $0x8] sm:$0xff] %v580_v31  ;;  %604 = vst [vmem:[%s965_s19 + $0x48] sm:$0xff] %v588_v32 }
 0x102   : > { %v790_v33 = vpop.f32.mrb[4].mxu0  ;;  %v798_v34 = vpop.f32.mrb[4].mxu1 }
 0x103   : > { %v585_v35 = vadd.f32 %v790_v33, %v749_v16  ;;  %v593_v36 = vadd.f32 %v798_v34, %v749_v16  ;;  %v474_v37 = vpop.f32.mrb[5].mxu0  ;;  %v506_v38 = vpop.f32.mrb[5].mxu1 }
 0x104   : > { %v583_v39 = vadd.f32 %v749_v16, %v474_v37  ;;  %v591_v40 = vadd.f32 %v749_v16, %v506_v38  ;;  %v791_v41 = vpop.f32.mrb[6].mxu0  ;;  %v799_v42 = vpop.f32.mrb[6].mxu1 }
 0x105   : > { %601 = vst [vmem:[%s965_s19 + $0x30] sm:$0xff] %v585_v35  ;;  %609 = vst [vmem:[%s965_s19 + $0x70] sm:$0xff] %v593_v36  ;;  %v586_v43 = vadd.f32 %v791_v41, %v749_v16  ;;  %v594_v44 = vadd.f32 %v799_v42, %v749_v16  ;;  %v477_v45 = vpop.f32.mrb[7].mxu0  ;;  %v509_v46 = vpop.f32.mrb[7].mxu1 }
 0x106   : > { %599 = vst [vmem:[%s965_s19 + $0x20] sm:$0xff] %v583_v39  ;;  %607 = vst [vmem:[%s965_s19 + $0x60] sm:$0xff] %v591_v40  ;;  %v584_v47 = vadd.f32 %v749_v16, %v477_v45  ;;  %v592_v48 = vadd.f32 %v749_v16, %v509_v46 }
 0x107   : > { %602 = vst [vmem:[%s965_s19 + $0x38] sm:$0xff] %v586_v43  ;;  %610 = vst [vmem:[%s965_s19 + $0x78] sm:$0xff] %v594_v44 }
 0x108   : > { %600 = vst [vmem:[%s965_s19 + $0x28] sm:$0xff] %v584_v47  ;;  %608 = vst [vmem:[%s965_s19 + $0x68] sm:$0xff] %v592_v48 }
 0x109 PF: > { %s13_s14 = sadd.s32 1, %s878_s14   ;;  %s996_s12 = smov %s874_s13 }
 0x10a   : > { %p10_p5 = scmp.ge.s32.totalorder %s13_s14, 5   ;;  %s997_s13 = smov %s999_s15 }
 0x10c   :  { %12 = sbr.rel (!%p10_p5) target bundleno = 2 (0x2), region = 76 }

// kernel: layered_neural_renderer_forward.23
= control target key start
LH: loop header
LB: loop body
LE: loop exit
PB: predicated region body
PF: predicated region fallthrough
CT: control target
= control target key end

     0   :  { %s1180_s12 = smov 0   ;;  %s1182_s13 = smov 0   ;;  %s1330_s0 = inlined_call_operand.vmem [shape: bf16[1280,128], index: 0, kind: input, shape index: {}]   ;;  %s1331_s1 = inlined_call_operand.vmem [shape: bf16[128,128], index: 1, kind: input, shape index: {}]   ;;  %s1332_s2 = inlined_call_operand.vmem [shape: f32[1,128], index: 2, kind: input, shape index: {}]   ;;  %s1333_s3 = inlined_call_operand.vmem [shape: f32[1280,128], index: 3, kind: output, shape index: {}]  }
   0x1   :  { %s1184_s14 = smov 0  }
   0x2 LB: > { %s32_s15 = sadd.s32 1, %s1154_s13  ;;  %p968_p0 = scmp.ge.s32.totalorder %s1158_s14, 1  ;;  %s1158_s14 = sphi %s1184_s14, %s13_s14   ;;  %s1154_s13 = sphi %s1182_s13, %s1335_s13   ;;  %s1150_s12 = sphi %s1180_s12, %s1334_s12  }
   0x3   : > { %p34_p1 = scmp.ge.s32.totalorder %s32_s15, 5  ;;  %p188_p2 = scmp.lt.s32.totalorder %s1158_s14, 6 }
   0x5   : > { %s1337_s15 = smov (%p34_p1, %s32_s15), 0  ;;  %p189_p3 = pnand %p968_p0, %p188_p2 }
   0x6   : > { %v1112_v0 = vld [vmem:[%s1331_s1] sm:$0xff] (!%p189_p3)   ;;  %s969_s18 = sshll.u32 (!%p189_p3), %s1150_s12, 5  ;;  %v1113_v1 = vld [vmem:[%s1331_s1 + $0x8] sm:$0xff] (!%p189_p3)   ;;  %v1114_v2 = vld [vmem:[%s1331_s1 + $0x10] sm:$0xff] (!%p189_p3)  }
   0x7   : > { %192 = sbr.rel (%p189_p3) target bundleno = 281 (0x119), region = 32  ;;  %p230_p4 = scmp.lt.s32.totalorder (!%p189_p3), %s969_s18, 159  ;;  %1024 = vmatprep.subr.bf16.mxu0 (!%p189_p3), %v1112_v0  ;;  %1072 = vmatprep.subr.bf16.mxu1 (!%p189_p3), %v1112_v0  ;;  %v1115_v3 = vld [vmem:[%s1331_s1 + $0x18] sm:$0xff] (!%p189_p3)   ;;  %v1116_v6 = vld [vmem:[%s1331_s1 + $0x20] sm:$0xff] (!%p189_p3)   ;;  %v1117_v7 = vld [vmem:[%s1331_s1 + $0x28] sm:$0xff] (!%p189_p3)  }
   0x8   : > { %1025 = vmatpush3.bf16.msra.mxu0 (!%p189_p3), %v1112_v0  ;;  %1080 = vmatpush3.bf16.msra.mxu1 (!%p189_p3), %v1112_v0  ;;  %v1118_v8 = vld [vmem:[%s1331_s1 + $0x30] sm:$0xff] (!%p189_p3)   ;;  %v1119_v9 = vld [vmem:[%s1331_s1 + $0x38] sm:$0xff] (!%p189_p3)   ;;  %v1250_v24 = vld [vmem:[%s1332_s2] ss:$0 sm:$0xff] (!%p189_p3) }
   0x9   : > { %1026 = vmatprep.subr.bf16.mxu0 (!%p189_p3), %v1113_v1  ;;  %1073 = vmatprep.subr.bf16.mxu1 (!%p189_p3), %v1113_v1 }
   0xc   : > { %1027 = vmatpush3.bf16.msra.mxu0 (!%p189_p3), %v1113_v1  ;;  %1081 = vmatpush3.bf16.msra.mxu1 (!%p189_p3), %v1113_v1 }
   0xd   : > { %1028 = vmatprep.subr.bf16.mxu0 (!%p189_p3), %v1114_v2  ;;  %1074 = vmatprep.subr.bf16.mxu1 (!%p189_p3), %v1114_v2 }
   0xe   : > { %s1339_s18 = smov (!%p230_p4, %s969_s18), 159 }
   0xf   : > { %s970_s23 = sshll.u32 %s1339_s18, 2  ;;  %s972_s10 = sshll.u32 %s1339_s18, 3 }
  0x10   : > { %s1213_s26 = scalar_lea.vmem %s1330_s0, %s970_s23  ;;  %1029 = vmatpush3.bf16.msra.mxu0 %v1114_v2  ;;  %1082 = vmatpush3.bf16.msra.mxu1 %v1114_v2  ;;  %s1255_s19 = scalar_lea.vmem %s1333_s3, %s972_s10 }
  0x11   : > { %v1120_v4 = vld [vmem:[%s1213_s26] sm:$0xff]   ;;  %1030 = vmatprep.subr.bf16.mxu0 %v1115_v3  ;;  %1075 = vmatprep.subr.bf16.mxu1 %v1115_v3  ;;  %v1122_v10 = vld [vmem:[%s1213_s26 + $0x8] sm:$0xff]   ;;  %v1124_v12 = vld [vmem:[%s1213_s26 + $0x10] sm:$0xff]  }
  0x12   : > { %v1121_v5 = vld [vmem:[%s1213_s26 + $0x40] sm:$0xff]   ;;  %1040 = vmatprep.mubr.bf16.mxu0 %v1120_v4  ;;  %v1123_v11 = vld [vmem:[%s1213_s26 + $0x48] sm:$0xff]   ;;  %v1125_v13 = vld [vmem:[%s1213_s26 + $0x50] sm:$0xff]  }
  0x13   : > { %1056 = vmatprep.mubr.bf16.mxu1 %v1121_v5  ;;  %v1126_v14 = vld [vmem:[%s1213_s26 + $0x18] sm:$0xff]   ;;  %v1128_v16 = vld [vmem:[%s1213_s26 + $0x20] sm:$0xff]   ;;  %v1130_v18 = vld [vmem:[%s1213_s26 + $0x28] sm:$0xff]  }
  0x14   : > { %1031 = vmatpush3.bf16.msra.mxu0 %v1115_v3  ;;  %1083 = vmatpush3.bf16.msra.mxu1 %v1115_v3  ;;  %v1127_v15 = vld [vmem:[%s1213_s26 + $0x58] sm:$0xff]   ;;  %v1129_v17 = vld [vmem:[%s1213_s26 + $0x60] sm:$0xff]   ;;  %v1131_v19 = vld [vmem:[%s1213_s26 + $0x68] sm:$0xff]  }
  0x15   : > { %1032 = vmatprep.subr.bf16.mxu0 %v1116_v6  ;;  %1076 = vmatprep.subr.bf16.mxu1 %v1116_v6  ;;  %v1132_v20 = vld [vmem:[%s1213_s26 + $0x30] sm:$0xff]   ;;  %v1134_v22 = vld [vmem:[%s1213_s26 + $0x38] sm:$0xff]  }
  0x16   : > { %v1133_v21 = vld [vmem:[%s1213_s26 + $0x70] sm:$0xff]   ;;  %v1135_v23 = vld [vmem:[%s1213_s26 + $0x78] sm:$0xff]  }
  0x18   : > { %1033 = vmatpush3.bf16.msra.mxu0 %v1116_v6  ;;  %1084 = vmatpush3.bf16.msra.mxu1 %v1116_v6 }
  0x19   : > { %1034 = vmatprep.subr.bf16.mxu0 %v1117_v7  ;;  %1077 = vmatprep.subr.bf16.mxu1 %v1117_v7 }
  0x1c   : > { %1035 = vmatpush3.bf16.msra.mxu0 %v1117_v7  ;;  %1085 = vmatpush3.bf16.msra.mxu1 %v1117_v7 }
  0x1d   : > { %1036 = vmatprep.subr.bf16.mxu0 %v1118_v8  ;;  %1078 = vmatprep.subr.bf16.mxu1 %v1118_v8 }
  0x20   : > { %1037 = vmatpush3.bf16.msra.mxu0 %v1118_v8  ;;  %1086 = vmatpush3.bf16.msra.mxu1 %v1118_v8 }
  0x21   : > { %1038 = vmatprep.subr.bf16.mxu0 %v1119_v9  ;;  %1079 = vmatprep.subr.bf16.mxu1 %v1119_v9 }
  0x24   : > { %1039 = vmatpush3.bf16.msra.mxu0 %v1119_v9  ;;  %1087 = vmatpush3.bf16.msra.mxu1 %v1119_v9 }
  0x27   : > { %1041 = vmatmul.mubr.bf16.vlgmr.msra.gmra.mrb[0].mxu0 %v1122_v10  ;;  %1057 = vmatmul.mubr.bf16.vlgmr.msra.gmra.mrb[0].mxu1 %v1123_v11 }
  0x28   : > { %1044 = vmatprep.mubr.bf16.mxu0 %v1124_v12  ;;  %1060 = vmatprep.mubr.bf16.mxu1 %v1125_v13 }
  0x2f   : > { %1045 = vmatmul.mubr.bf16.gmra.mrb[4].mxu0 %v1126_v14  ;;  %1061 = vmatmul.mubr.bf16.gmra.mrb[4].mxu1 %v1127_v15 }
  0x30   : > { %1048 = vmatprep.mubr.bf16.mxu0 %v1128_v16  ;;  %1064 = vmatprep.mubr.bf16.mxu1 %v1129_v17 }
  0x37   : > { %1049 = vmatmul.mubr.bf16.gmra.mrb[8].mxu0 %v1130_v18  ;;  %1065 = vmatmul.mubr.bf16.gmra.mrb[8].mxu1 %v1131_v19 }
  0x38   : > { %1052 = vmatprep.mubr.bf16.mxu0 %v1132_v20  ;;  %1068 = vmatprep.mubr.bf16.mxu1 %v1133_v21 }
  0x3f   : > { %1053 = vmatmul.mubr.bf16.gmra.mrb[12].mxu0 %v1134_v22  ;;  %1069 = vmatmul.mubr.bf16.gmra.mrb[12].mxu1 %v1135_v23 }
  0xfa   : > { %v1042_v25 = vpop.f32.mrb[0].mxu0  ;;  %v1058_v26 = vpop.f32.mrb[0].mxu1 }
  0xfb   : > { %v789_v27 = vadd.f32 %v1042_v25, %v1250_v24  ;;  %v805_v28 = vadd.f32 %v1058_v26, %v1250_v24  ;;  %v554_v29 = vpop.f32.mrb[1].mxu0  ;;  %v618_v30 = vpop.f32.mrb[1].mxu1 }
  0xfc   : > { %v787_v31 = vadd.f32 %v1250_v24, %v554_v29  ;;  %v803_v32 = vadd.f32 %v1250_v24, %v618_v30  ;;  %v1043_v33 = vpop.f32.mrb[2].mxu0  ;;  %v1059_v34 = vpop.f32.mrb[2].mxu1 }
  0xfd   : > { %821 = vst [vmem:[%s1255_s19 + $0x10] sm:$0xff] %v789_v27  ;;  %837 = vst [vmem:[%s1255_s19 + $0x90] sm:$0xff] %v805_v28  ;;  %v790_v35 = vadd.f32 %v1043_v33, %v1250_v24  ;;  %v806_v36 = vadd.f32 %v1059_v34, %v1250_v24  ;;  %v557_v37 = vpop.f32.mrb[3].mxu0  ;;  %v621_v38 = vpop.f32.mrb[3].mxu1 }
  0xfe   : > { %819 = vst [vmem:[%s1255_s19] sm:$0xff] %v787_v31  ;;  %835 = vst [vmem:[%s1255_s19 + $0x80] sm:$0xff] %v803_v32  ;;  %v788_v39 = vadd.f32 %v1250_v24, %v557_v37  ;;  %v804_v40 = vadd.f32 %v1250_v24, %v621_v38 }
  0xff   : > { %822 = vst [vmem:[%s1255_s19 + $0x18] sm:$0xff] %v790_v35  ;;  %838 = vst [vmem:[%s1255_s19 + $0x98] sm:$0xff] %v806_v36 }
 0x100   : > { %820 = vst [vmem:[%s1255_s19 + $0x8] sm:$0xff] %v788_v39  ;;  %836 = vst [vmem:[%s1255_s19 + $0x88] sm:$0xff] %v804_v40 }
 0x102   : > { %v1046_v41 = vpop.f32.mrb[4].mxu0  ;;  %v1062_v42 = vpop.f32.mrb[4].mxu1 }
 0x103   : > { %v793_v43 = vadd.f32 %v1046_v41, %v1250_v24  ;;  %v809_v44 = vadd.f32 %v1062_v42, %v1250_v24  ;;  %v570_v45 = vpop.f32.mrb[5].mxu0  ;;  %v634_v46 = vpop.f32.mrb[5].mxu1 }
 0x104   : > { %v791_v47 = vadd.f32 %v1250_v24, %v570_v45  ;;  %v807_v48 = vadd.f32 %v1250_v24, %v634_v46  ;;  %v1047_v49 = vpop.f32.mrb[6].mxu0  ;;  %v1063_v50 = vpop.f32.mrb[6].mxu1 }
 0x105   : > { %825 = vst [vmem:[%s1255_s19 + $0x30] sm:$0xff] %v793_v43  ;;  %841 = vst [vmem:[%s1255_s19 + $0xb0] sm:$0xff] %v809_v44  ;;  %v794_v51 = vadd.f32 %v1047_v49, %v1250_v24  ;;  %v810_v52 = vadd.f32 %v1063_v50, %v1250_v24  ;;  %v573_v53 = vpop.f32.mrb[7].mxu0  ;;  %v637_v54 = vpop.f32.mrb[7].mxu1 }
 0x106   : > { %823 = vst [vmem:[%s1255_s19 + $0x20] sm:$0xff] %v791_v47  ;;  %839 = vst [vmem:[%s1255_s19 + $0xa0] sm:$0xff] %v807_v48  ;;  %v792_v55 = vadd.f32 %v1250_v24, %v573_v53  ;;  %v808_v56 = vadd.f32 %v1250_v24, %v637_v54 }
 0x107   : > { %826 = vst [vmem:[%s1255_s19 + $0x38] sm:$0xff] %v794_v51  ;;  %842 = vst [vmem:[%s1255_s19 + $0xb8] sm:$0xff] %v810_v52 }
 0x108   : > { %824 = vst [vmem:[%s1255_s19 + $0x28] sm:$0xff] %v792_v55  ;;  %840 = vst [vmem:[%s1255_s19 + $0xa8] sm:$0xff] %v808_v56 }
 0x10a   : > { %v1050_v57 = vpop.f32.mrb[8].mxu0  ;;  %v1066_v58 = vpop.f32.mrb[8].mxu1 }
 0x10b   : > { %v797_v59 = vadd.f32 %v1050_v57, %v1250_v24  ;;  %v813_v60 = vadd.f32 %v1066_v58, %v1250_v24  ;;  %v586_v61 = vpop.f32.mrb[9].mxu0  ;;  %v650_v62 = vpop.f32.mrb[9].mxu1 }
 0x10c   : > { %v795_v63 = vadd.f32 %v1250_v24, %v586_v61  ;;  %v811_v0 = vadd.f32 %v1250_v24, %v650_v62  ;;  %v1051_v1 = vpop.f32.mrb[10].mxu0  ;;  %v1067_v2 = vpop.f32.mrb[10].mxu1 }
 0x10d   : > { %829 = vst [vmem:[%s1255_s19 + $0x50] sm:$0xff] %v797_v59  ;;  %845 = vst [vmem:[%s1255_s19 + $0xd0] sm:$0xff] %v813_v60  ;;  %v798_v3 = vadd.f32 %v1051_v1, %v1250_v24  ;;  %v814_v4 = vadd.f32 %v1067_v2, %v1250_v24  ;;  %v589_v5 = vpop.f32.mrb[11].mxu0  ;;  %v653_v6 = vpop.f32.mrb[11].mxu1 }
 0x10e   : > { %827 = vst [vmem:[%s1255_s19 + $0x40] sm:$0xff] %v795_v63  ;;  %843 = vst [vmem:[%s1255_s19 + $0xc0] sm:$0xff] %v811_v0  ;;  %v796_v7 = vadd.f32 %v1250_v24, %v589_v5  ;;  %v812_v8 = vadd.f32 %v1250_v24, %v653_v6 }
 0x10f   : > { %830 = vst [vmem:[%s1255_s19 + $0x58] sm:$0xff] %v798_v3  ;;  %846 = vst [vmem:[%s1255_s19 + $0xd8] sm:$0xff] %v814_v4 }
 0x110   : > { %828 = vst [vmem:[%s1255_s19 + $0x48] sm:$0xff] %v796_v7  ;;  %844 = vst [vmem:[%s1255_s19 + $0xc8] sm:$0xff] %v812_v8 }
 0x112   : > { %v1054_v9 = vpop.f32.mrb[12].mxu0  ;;  %v1070_v10 = vpop.f32.mrb[12].mxu1 }
 0x113   : > { %v801_v11 = vadd.f32 %v1054_v9, %v1250_v24  ;;  %v817_v12 = vadd.f32 %v1070_v10, %v1250_v24  ;;  %v602_v13 = vpop.f32.mrb[13].mxu0  ;;  %v666_v14 = vpop.f32.mrb[13].mxu1 }
 0x114   : > { %v799_v15 = vadd.f32 %v1250_v24, %v602_v13  ;;  %v815_v16 = vadd.f32 %v1250_v24, %v666_v14  ;;  %v1055_v17 = vpop.f32.mrb[14].mxu0  ;;  %v1071_v18 = vpop.f32.mrb[14].mxu1 }
 0x115   : > { %833 = vst [vmem:[%s1255_s19 + $0x70] sm:$0xff] %v801_v11  ;;  %849 = vst [vmem:[%s1255_s19 + $0xf0] sm:$0xff] %v817_v12  ;;  %v802_v19 = vadd.f32 %v1055_v17, %v1250_v24  ;;  %v818_v20 = vadd.f32 %v1071_v18, %v1250_v24  ;;  %v605_v21 = vpop.f32.mrb[15].mxu0  ;;  %v669_v22 = vpop.f32.mrb[15].mxu1 }
 0x116   : > { %831 = vst [vmem:[%s1255_s19 + $0x60] sm:$0xff] %v799_v15  ;;  %847 = vst [vmem:[%s1255_s19 + $0xe0] sm:$0xff] %v815_v16  ;;  %v800_v23 = vadd.f32 %v1250_v24, %v605_v21  ;;  %v816_v25 = vadd.f32 %v1250_v24, %v669_v22 }
 0x117   : > { %834 = vst [vmem:[%s1255_s19 + $0x78] sm:$0xff] %v802_v19  ;;  %850 = vst [vmem:[%s1255_s19 + $0xf8] sm:$0xff] %v818_v20 }
 0x118   : > { %832 = vst [vmem:[%s1255_s19 + $0x68] sm:$0xff] %v800_v23  ;;  %848 = vst [vmem:[%s1255_s19 + $0xe8] sm:$0xff] %v816_v25 }
 0x119 PF: > { %s13_s14 = sadd.s32 1, %s1158_s14   ;;  %s1334_s12 = smov %s1154_s13 }
 0x11a   : > { %p10_p5 = scmp.ge.s32.totalorder %s13_s14, 7   ;;  %s1335_s13 = smov %s1337_s15 }
 0x11c   :  { %12 = sbr.rel (!%p10_p5) target bundleno = 2 (0x2), region = 76 }

// kernel: layered_neural_renderer_forward.24
= control target key start
LH: loop header
LB: loop body
LE: loop exit
PB: predicated region body
PF: predicated region fallthrough
CT: control target
= control target key end

     0   :  { %s1932_s12 = smov 0   ;;  %s1934_s13 = smov 0   ;;  %s2162_s0 = inlined_call_operand.vmem [shape: bf16[4096,128], index: 0, kind: input, shape index: {}]   ;;  %s2163_s1 = inlined_call_operand.vmem [shape: bf16[128,128], index: 1, kind: input, shape index: {}]   ;;  %s2164_s2 = inlined_call_operand.vmem [shape: f32[1,128], index: 2, kind: input, shape index: {}]   ;;  %s2165_s3 = inlined_call_operand.vmem [shape: f32[4096,128], index: 3, kind: output, shape index: {}]  }
   0x1   :  { %s1936_s14 = smov 0  }
   0x2 LB: > { %s32_s15 = sadd.s32 1, %s1906_s13  ;;  %p1512_p0 = scmp.ge.s32.totalorder %s1910_s14, 1  ;;  %s1910_s14 = sphi %s1936_s14, %s13_s14   ;;  %s1906_s13 = sphi %s1934_s13, %s2167_s13   ;;  %s1902_s12 = sphi %s1932_s12, %s2166_s12  }
   0x3   : > { %p34_p1 = scmp.ge.s32.totalorder %s32_s15, 8  ;;  %p188_p2 = scmp.lt.s32.totalorder %s1910_s14, 9 }
   0x5   : > { %s2169_s15 = smov (%p34_p1, %s32_s15), 0  ;;  %p189_p3 = pnand %p1512_p0, %p188_p2 }
   0x6   : > { %v1720_v0 = vld [vmem:[%s2163_s1] sm:$0xff] (!%p189_p3)   ;;  %s1513_s18 = sshll.u32 (!%p189_p3), %s1902_s12, 6  ;;  %v1721_v1 = vld [vmem:[%s2163_s1 + $0x8] sm:$0xff] (!%p189_p3)   ;;  %v1722_v2 = vld [vmem:[%s2163_s1 + $0x10] sm:$0xff] (!%p189_p3)  }
   0x7   : > { %192 = sbr.rel (%p189_p3) target bundleno = 331 (0x14b), region = 32  ;;  %p230_p4 = scmp.lt.s32.totalorder (!%p189_p3), %s1513_s18, 511  ;;  %1600 = vmatprep.subr.bf16.mxu0 (!%p189_p3), %v1720_v0  ;;  %1680 = vmatprep.subr.bf16.mxu1 (!%p189_p3), %v1720_v0  ;;  %v1723_v3 = vld [vmem:[%s2163_s1 + $0x18] sm:$0xff] (!%p189_p3)   ;;  %v1724_v6 = vld [vmem:[%s2163_s1 + $0x20] sm:$0xff] (!%p189_p3)   ;;  %v1725_v7 = vld [vmem:[%s2163_s1 + $0x28] sm:$0xff] (!%p189_p3)  }
   0x8   : > { %1601 = vmatpush3.bf16.msra.mxu0 (!%p189_p3), %v1720_v0  ;;  %1688 = vmatpush3.bf16.msra.mxu1 (!%p189_p3), %v1720_v0  ;;  %v1726_v8 = vld [vmem:[%s2163_s1 + $0x30] sm:$0xff] (!%p189_p3)   ;;  %v1727_v9 = vld [vmem:[%s2163_s1 + $0x38] sm:$0xff] (!%p189_p3)   ;;  %v2017_v40 = vld [vmem:[%s2164_s2] ss:$0 sm:$0xff] (!%p189_p3) }
   0x9   : > { %1602 = vmatprep.subr.bf16.mxu0 (!%p189_p3), %v1721_v1  ;;  %1681 = vmatprep.subr.bf16.mxu1 (!%p189_p3), %v1721_v1 }
   0xc   : > { %1603 = vmatpush3.bf16.msra.mxu0 (!%p189_p3), %v1721_v1  ;;  %1689 = vmatpush3.bf16.msra.mxu1 (!%p189_p3), %v1721_v1 }
   0xd   : > { %1604 = vmatprep.subr.bf16.mxu0 (!%p189_p3), %v1722_v2  ;;  %1682 = vmatprep.subr.bf16.mxu1 (!%p189_p3), %v1722_v2 }
   0xe   : > { %s2171_s18 = smov (!%p230_p4, %s1513_s18), 511 }
   0xf   : > { %s1514_s23 = sshll.u32 %s2171_s18, 2  ;;  %s1516_s12 = sshll.u32 %s2171_s18, 3 }
  0x10   : > { %s1965_s26 = scalar_lea.vmem %s2162_s0, %s1514_s23  ;;  %1605 = vmatpush3.bf16.msra.mxu0 %v1722_v2  ;;  %1690 = vmatpush3.bf16.msra.mxu1 %v1722_v2  ;;  %s2035_s18 = scalar_lea.vmem %s2165_s3, %s1516_s12 }
  0x11   : > { %v1728_v4 = vld [vmem:[%s1965_s26] sm:$0xff]   ;;  %1606 = vmatprep.subr.bf16.mxu0 %v1723_v3  ;;  %1683 = vmatprep.subr.bf16.mxu1 %v1723_v3  ;;  %v1730_v10 = vld [vmem:[%s1965_s26 + $0x8] sm:$0xff]   ;;  %v1732_v12 = vld [vmem:[%s1965_s26 + $0x10] sm:$0xff]  }
  0x12   : > { %v1729_v5 = vld [vmem:[%s1965_s26 + $0x80] sm:$0xff]   ;;  %1616 = vmatprep.mubr.bf16.mxu0 %v1728_v4  ;;  %v1731_v11 = vld [vmem:[%s1965_s26 + $0x88] sm:$0xff]   ;;  %v1733_v13 = vld [vmem:[%s1965_s26 + $0x90] sm:$0xff]  }
  0x13   : > { %1648 = vmatprep.mubr.bf16.mxu1 %v1729_v5  ;;  %v1734_v14 = vld [vmem:[%s1965_s26 + $0x18] sm:$0xff]   ;;  %v1736_v16 = vld [vmem:[%s1965_s26 + $0x20] sm:$0xff]   ;;  %v1738_v18 = vld [vmem:[%s1965_s26 + $0x28] sm:$0xff]  }
  0x14   : > { %1607 = vmatpush3.bf16.msra.mxu0 %v1723_v3  ;;  %1691 = vmatpush3.bf16.msra.mxu1 %v1723_v3  ;;  %v1735_v15 = vld [vmem:[%s1965_s26 + $0x98] sm:$0xff]   ;;  %v1737_v17 = vld [vmem:[%s1965_s26 + $0xa0] sm:$0xff]   ;;  %v1739_v19 = vld [vmem:[%s1965_s26 + $0xa8] sm:$0xff]  }
  0x15   : > { %1608 = vmatprep.subr.bf16.mxu0 %v1724_v6  ;;  %1684 = vmatprep.subr.bf16.mxu1 %v1724_v6  ;;  %v1740_v20 = vld [vmem:[%s1965_s26 + $0x30] sm:$0xff]   ;;  %v1742_v22 = vld [vmem:[%s1965_s26 + $0x38] sm:$0xff]   ;;  %v1744_v24 = vld [vmem:[%s1965_s26 + $0x40] sm:$0xff]  }
  0x16   : > { %v1741_v21 = vld [vmem:[%s1965_s26 + $0xb0] sm:$0xff]   ;;  %v1743_v23 = vld [vmem:[%s1965_s26 + $0xb8] sm:$0xff]   ;;  %v1745_v25 = vld [vmem:[%s1965_s26 + $0xc0] sm:$0xff]  }
  0x17   : > { %v1746_v26 = vld [vmem:[%s1965_s26 + $0x48] sm:$0xff]   ;;  %v1748_v28 = vld [vmem:[%s1965_s26 + $0x50] sm:$0xff]   ;;  %v1750_v30 = vld [vmem:[%s1965_s26 + $0x58] sm:$0xff]  }
  0x18   : > { %1609 = vmatpush3.bf16.msra.mxu0 %v1724_v6  ;;  %1692 = vmatpush3.bf16.msra.mxu1 %v1724_v6  ;;  %v1747_v27 = vld [vmem:[%s1965_s26 + $0xc8] sm:$0xff]   ;;  %v1749_v29 = vld [vmem:[%s1965_s26 + $0xd0] sm:$0xff]   ;;  %v1751_v31 = vld [vmem:[%s1965_s26 + $0xd8] sm:$0xff]  }
  0x19   : > { %1610 = vmatprep.subr.bf16.mxu0 %v1725_v7  ;;  %1685 = vmatprep.subr.bf16.mxu1 %v1725_v7  ;;  %v1752_v32 = vld [vmem:[%s1965_s26 + $0x60] sm:$0xff]   ;;  %v1754_v34 = vld [vmem:[%s1965_s26 + $0x68] sm:$0xff]   ;;  %v1756_v36 = vld [vmem:[%s1965_s26 + $0x70] sm:$0xff]  }
  0x1a   : > { %v1753_v33 = vld [vmem:[%s1965_s26 + $0xe0] sm:$0xff]   ;;  %v1755_v35 = vld [vmem:[%s1965_s26 + $0xe8] sm:$0xff]   ;;  %v1757_v37 = vld [vmem:[%s1965_s26 + $0xf0] sm:$0xff]  }
  0x1b   : > { %v1758_v38 = vld [vmem:[%s1965_s26 + $0x78] sm:$0xff]  }
  0x1c   : > { %1611 = vmatpush3.bf16.msra.mxu0 %v1725_v7  ;;  %1693 = vmatpush3.bf16.msra.mxu1 %v1725_v7  ;;  %v1759_v39 = vld [vmem:[%s1965_s26 + $0xf8] sm:$0xff]  }
  0x1d   : > { %1612 = vmatprep.subr.bf16.mxu0 %v1726_v8  ;;  %1686 = vmatprep.subr.bf16.mxu1 %v1726_v8 }
  0x20   : > { %1613 = vmatpush3.bf16.msra.mxu0 %v1726_v8  ;;  %1694 = vmatpush3.bf16.msra.mxu1 %v1726_v8 }
  0x21   : > { %1614 = vmatprep.subr.bf16.mxu0 %v1727_v9  ;;  %1687 = vmatprep.subr.bf16.mxu1 %v1727_v9 }
  0x24   : > { %1615 = vmatpush3.bf16.msra.mxu0 %v1727_v9  ;;  %1695 = vmatpush3.bf16.msra.mxu1 %v1727_v9 }
  0x27   : > { %1617 = vmatmul.mubr.bf16.vlgmr.msra.gmra.mrb[0].mxu0 %v1730_v10  ;;  %1649 = vmatmul.mubr.bf16.vlgmr.msra.gmra.mrb[0].mxu1 %v1731_v11 }
  0x28   : > { %1620 = vmatprep.mubr.bf16.mxu0 %v1732_v12  ;;  %1652 = vmatprep.mubr.bf16.mxu1 %v1733_v13 }
  0x2f   : > { %1621 = vmatmul.mubr.bf16.gmra.mrb[4].mxu0 %v1734_v14  ;;  %1653 = vmatmul.mubr.bf16.gmra.mrb[4].mxu1 %v1735_v15 }
  0x30   : > { %1624 = vmatprep.mubr.bf16.mxu0 %v1736_v16  ;;  %1656 = vmatprep.mubr.bf16.mxu1 %v1737_v17 }
  0x37   : > { %1625 = vmatmul.mubr.bf16.gmra.mrb[8].mxu0 %v1738_v18  ;;  %1657 = vmatmul.mubr.bf16.gmra.mrb[8].mxu1 %v1739_v19 }
  0x38   : > { %1628 = vmatprep.mubr.bf16.mxu0 %v1740_v20  ;;  %1660 = vmatprep.mubr.bf16.mxu1 %v1741_v21 }
  0x3f   : > { %1629 = vmatmul.mubr.bf16.gmra.mrb[12].mxu0 %v1742_v22  ;;  %1661 = vmatmul.mubr.bf16.gmra.mrb[12].mxu1 %v1743_v23 }
  0x40   : > { %1632 = vmatprep.mubr.bf16.mxu0 %v1744_v24  ;;  %1664 = vmatprep.mubr.bf16.mxu1 %v1745_v25 }
  0x47   : > { %1633 = vmatmul.mubr.bf16.gmra.mrb[16].mxu0 %v1746_v26  ;;  %1665 = vmatmul.mubr.bf16.gmra.mrb[16].mxu1 %v1747_v27 }
  0x48   : > { %1636 = vmatprep.mubr.bf16.mxu0 %v1748_v28  ;;  %1668 = vmatprep.mubr.bf16.mxu1 %v1749_v29 }
  0x4f   : > { %1637 = vmatmul.mubr.bf16.gmra.mrb[20].mxu0 %v1750_v30  ;;  %1669 = vmatmul.mubr.bf16.gmra.mrb[20].mxu1 %v1751_v31 }
  0x50   : > { %1640 = vmatprep.mubr.bf16.mxu0 %v1752_v32  ;;  %1672 = vmatprep.mubr.bf16.mxu1 %v1753_v33 }
  0x57   : > { %1641 = vmatmul.mubr.bf16.gmra.mrb[24].mxu0 %v1754_v34  ;;  %1673 = vmatmul.mubr.bf16.gmra.mrb[24].mxu1 %v1755_v35 }
  0x58   : > { %1644 = vmatprep.mubr.bf16.mxu0 %v1756_v36  ;;  %1676 = vmatprep.mubr.bf16.mxu1 %v1757_v37 }
  0x5f   : > { %1645 = vmatmul.mubr.bf16.gmra.mrb[28].mxu0 %v1758_v38  ;;  %1677 = vmatmul.mubr.bf16.gmra.mrb[28].mxu1 %v1759_v39 }
  0xfa   : > { %v1618_v41 = vpop.f32.mrb[0].mxu0  ;;  %v1650_v42 = vpop.f32.mrb[0].mxu1 }
  0xfb   : > { %v1205_v43 = vadd.f32 %v1618_v41, %v2017_v40  ;;  %v1237_v44 = vadd.f32 %v1650_v42, %v2017_v40  ;;  %v746_v45 = vpop.f32.mrb[1].mxu0  ;;  %v874_v46 = vpop.f32.mrb[1].mxu1 }
  0xfc   : > { %v1203_v47 = vadd.f32 %v2017_v40, %v746_v45  ;;  %v1235_v48 = vadd.f32 %v2017_v40, %v874_v46  ;;  %v1619_v49 = vpop.f32.mrb[2].mxu0  ;;  %v1651_v50 = vpop.f32.mrb[2].mxu1 }
  0xfd   : > { %1760 = vtanh.f32 %v1205_v43  ;;  %v1206_v51 = vadd.f32 %v1619_v49, %v2017_v40  ;;  %v749_v52 = vpop.f32.mrb[3].mxu0  ;;  %v877_v53 = vpop.f32.mrb[3].mxu1  ;;  %v1238_v54 = vadd.f32 %v1651_v50, %v2017_v40 }
  0xfe   : > { %1762 = vtanh.f32 %v1237_v44  ;;  %v1204_v55 = vadd.f32 %v2017_v40, %v749_v52  ;;  %v1236_v56 = vadd.f32 %v2017_v40, %v877_v53 }
  0xff   : > { %1764 = vtanh.f32 %v1203_v47 }
 0x100   : > { %1766 = vtanh.f32 %v1235_v48 }
 0x101   : > { %1768 = vtanh.f32 %v1206_v51 }
 0x102   : > { %1770 = vtanh.f32 %v1238_v54  ;;  %v1622_v57 = vpop.f32.mrb[4].mxu0  ;;  %v1654_v58 = vpop.f32.mrb[4].mxu1 }
 0x103   : > { %1772 = vtanh.f32 %v1204_v55  ;;  %v1209_v59 = vadd.f32 %v1622_v57, %v2017_v40  ;;  %v1241_v60 = vadd.f32 %v1654_v58, %v2017_v40  ;;  %v762_v61 = vpop.f32.mrb[5].mxu0  ;;  %v890_v62 = vpop.f32.mrb[5].mxu1 }
 0x104   : > { %1774 = vtanh.f32 %v1236_v56  ;;  %v1207_v63 = vadd.f32 %v2017_v40, %v762_v61  ;;  %v1239_v0 = vadd.f32 %v2017_v40, %v890_v62  ;;  %v1623_v1 = vpop.f32.mrb[6].mxu0  ;;  %v1655_v2 = vpop.f32.mrb[6].mxu1 }
 0x105   : > { %1776 = vtanh.f32 %v1209_v59  ;;  %v1210_v3 = vadd.f32 %v1623_v1, %v2017_v40  ;;  %v765_v4 = vpop.f32.mrb[7].mxu0  ;;  %v893_v5 = vpop.f32.mrb[7].mxu1  ;;  %v1242_v6 = vadd.f32 %v1655_v2, %v2017_v40 }
 0x106   : > { %1778 = vtanh.f32 %v1241_v60  ;;  %v1208_v8 = vadd.f32 %v2017_v40, %v765_v4  ;;  %v1240_v10 = vadd.f32 %v2017_v40, %v893_v5 }
 0x107   : > { %v1761_v7 = vpop.eup %1760  ;;  %1780 = vtanh.f32 %v1207_v63 }
 0x108   : > { %v1763_v9 = vpop.eup %1762  ;;  %1333 = vst [vmem:[%s2035_s18 + $0x10] sm:$0xff] %v1761_v7  ;;  %1782 = vtanh.f32 %v1239_v0 }
 0x109   : > { %v1765_v11 = vpop.eup %1764  ;;  %1365 = vst [vmem:[%s2035_s18 + $0x110] sm:$0xff] %v1763_v9  ;;  %1784 = vtanh.f32 %v1210_v3 }
 0x10a   : > { %v1767_v12 = vpop.eup %1766  ;;  %1331 = vst [vmem:[%s2035_s18] sm:$0xff] %v1765_v11  ;;  %1786 = vtanh.f32 %v1242_v6  ;;  %v1626_v13 = vpop.f32.mrb[8].mxu0 }
 0x10b   : > { %v1658_v14 = vpop.f32.mrb[8].mxu1  ;;  %v1769_v15 = vpop.eup %1768  ;;  %1363 = vst [vmem:[%s2035_s18 + $0x100] sm:$0xff] %v1767_v12  ;;  %1788 = vtanh.f32 %v1208_v8  ;;  %v1213_v16 = vadd.f32 %v1626_v13, %v2017_v40 }
 0x10c   : > { %v1245_v17 = vadd.f32 %v1658_v14, %v2017_v40  ;;  %v778_v18 = vpop.f32.mrb[9].mxu0  ;;  %v906_v19 = vpop.f32.mrb[9].mxu1  ;;  %1334 = vst [vmem:[%s2035_s18 + $0x18] sm:$0xff] %v1769_v15  ;;  %1790 = vtanh.f32 %v1240_v10 }
 0x10d   : > { %v1771_v20 = vpop.eup %1770  ;;  %v1211_v21 = vadd.f32 %v2017_v40, %v778_v18  ;;  %v1243_v22 = vadd.f32 %v2017_v40, %v906_v19  ;;  %v1627_v23 = vpop.f32.mrb[10].mxu0  ;;  %1792 = vtanh.f32 %v1213_v16 }
 0x10e   : > { %v1659_v24 = vpop.f32.mrb[10].mxu1  ;;  %v1773_v25 = vpop.eup %1772  ;;  %1366 = vst [vmem:[%s2035_s18 + $0x118] sm:$0xff] %v1771_v20  ;;  %v1214_v26 = vadd.f32 %v1627_v23, %v2017_v40  ;;  %1794 = vtanh.f32 %v1245_v17 }
 0x10f   : > { %v781_v27 = vpop.f32.mrb[11].mxu0  ;;  %v909_v28 = vpop.f32.mrb[11].mxu1  ;;  %1332 = vst [vmem:[%s2035_s18 + $0x8] sm:$0xff] %v1773_v25  ;;  %v1246_v30 = vadd.f32 %v1659_v24, %v2017_v40  ;;  %1796 = vtanh.f32 %v1211_v21 }
 0x110   : > { %v1775_v29 = vpop.eup %1774  ;;  %v1212_v32 = vadd.f32 %v2017_v40, %v781_v27  ;;  %1798 = vtanh.f32 %v1243_v22  ;;  %v1244_v34 = vadd.f32 %v2017_v40, %v909_v28 }
 0x111   : > { %v1777_v31 = vpop.eup %1776  ;;  %1364 = vst [vmem:[%s2035_s18 + $0x108] sm:$0xff] %v1775_v29  ;;  %1800 = vtanh.f32 %v1214_v26 }
 0x112   : > { %v1779_v33 = vpop.eup %1778  ;;  %1337 = vst [vmem:[%s2035_s18 + $0x30] sm:$0xff] %v1777_v31  ;;  %1802 = vtanh.f32 %v1246_v30  ;;  %v1630_v37 = vpop.f32.mrb[12].mxu0 }
 0x113   : > { %v1781_v35 = vpop.eup %1780  ;;  %1369 = vst [vmem:[%s2035_s18 + $0x130] sm:$0xff] %v1779_v33  ;;  %v1662_v38 = vpop.f32.mrb[12].mxu1  ;;  %1804 = vtanh.f32 %v1212_v32  ;;  %v1217_v41 = vadd.f32 %v1630_v37, %v2017_v40 }
 0x114   : > { %v1783_v36 = vpop.eup %1782  ;;  %1335 = vst [vmem:[%s2035_s18 + $0x20] sm:$0xff] %v1781_v35  ;;  %v1249_v42 = vadd.f32 %v1662_v38, %v2017_v40  ;;  %v794_v43 = vpop.f32.mrb[13].mxu0  ;;  %1806 = vtanh.f32 %v1244_v34 }
 0x115   : > { %v1785_v39 = vpop.eup %1784  ;;  %1367 = vst [vmem:[%s2035_s18 + $0x120] sm:$0xff] %v1783_v36  ;;  %v922_v44 = vpop.f32.mrb[13].mxu1  ;;  %v1215_v46 = vadd.f32 %v2017_v40, %v794_v43  ;;  %1808 = vtanh.f32 %v1217_v41 }
 0x116   : > { %v1787_v45 = vpop.eup %1786  ;;  %1338 = vst [vmem:[%s2035_s18 + $0x38] sm:$0xff] %v1785_v39  ;;  %v1247_v47 = vadd.f32 %v2017_v40, %v922_v44  ;;  %v1631_v48 = vpop.f32.mrb[14].mxu0  ;;  %1810 = vtanh.f32 %v1249_v42 }
 0x117   : > { %v1663_v49 = vpop.f32.mrb[14].mxu1  ;;  %v1789_v50 = vpop.eup %1788  ;;  %1370 = vst [vmem:[%s2035_s18 + $0x138] sm:$0xff] %v1787_v45  ;;  %v1218_v51 = vadd.f32 %v1631_v48, %v2017_v40  ;;  %1812 = vtanh.f32 %v1215_v46 }
 0x118   : > { %v797_v52 = vpop.f32.mrb[15].mxu0  ;;  %v925_v53 = vpop.f32.mrb[15].mxu1  ;;  %1336 = vst [vmem:[%s2035_s18 + $0x28] sm:$0xff] %v1789_v50  ;;  %v1250_v55 = vadd.f32 %v1663_v49, %v2017_v40  ;;  %1814 = vtanh.f32 %v1247_v47 }
 0x119   : > { %v1791_v54 = vpop.eup %1790  ;;  %v1216_v57 = vadd.f32 %v2017_v40, %v797_v52  ;;  %v1248_v59 = vadd.f32 %v2017_v40, %v925_v53  ;;  %1816 = vtanh.f32 %v1218_v51 }
 0x11a   : > { %v1793_v56 = vpop.eup %1792  ;;  %1368 = vst [vmem:[%s2035_s18 + $0x128] sm:$0xff] %v1791_v54  ;;  %1818 = vtanh.f32 %v1250_v55  ;;  %v1634_v62 = vpop.f32.mrb[16].mxu0 }
 0x11b   : > { %v1795_v58 = vpop.eup %1794  ;;  %1341 = vst [vmem:[%s2035_s18 + $0x50] sm:$0xff] %v1793_v56  ;;  %v1666_v63 = vpop.f32.mrb[16].mxu1  ;;  %1820 = vtanh.f32 %v1216_v57  ;;  %v1221_v1 = vadd.f32 %v1634_v62, %v2017_v40 }
 0x11c   : > { %v1797_v60 = vpop.eup %1796  ;;  %1373 = vst [vmem:[%s2035_s18 + $0x150] sm:$0xff] %v1795_v58  ;;  %v1253_v2 = vadd.f32 %v1666_v63, %v2017_v40  ;;  %v810_v3 = vpop.f32.mrb[17].mxu0  ;;  %1822 = vtanh.f32 %v1248_v59 }
 0x11d   : > { %v1799_v61 = vpop.eup %1798  ;;  %1339 = vst [vmem:[%s2035_s18 + $0x40] sm:$0xff] %v1797_v60  ;;  %v938_v4 = vpop.f32.mrb[17].mxu1  ;;  %v1219_v6 = vadd.f32 %v2017_v40, %v810_v3  ;;  %1824 = vtanh.f32 %v1221_v1 }
 0x11e   : > { %v1801_v0 = vpop.eup %1800  ;;  %1371 = vst [vmem:[%s2035_s18 + $0x140] sm:$0xff] %v1799_v61  ;;  %v1251_v7 = vadd.f32 %v2017_v40, %v938_v4  ;;  %v1635_v8 = vpop.f32.mrb[18].mxu0  ;;  %1826 = vtanh.f32 %v1253_v2 }
 0x11f   : > { %v1803_v5 = vpop.eup %1802  ;;  %1342 = vst [vmem:[%s2035_s18 + $0x58] sm:$0xff] %v1801_v0  ;;  %v1667_v9 = vpop.f32.mrb[18].mxu1  ;;  %v1222_v11 = vadd.f32 %v1635_v8, %v2017_v40  ;;  %1828 = vtanh.f32 %v1219_v6 }
 0x120   : > { %v1805_v10 = vpop.eup %1804  ;;  %1374 = vst [vmem:[%s2035_s18 + $0x158] sm:$0xff] %v1803_v5  ;;  %v813_v12 = vpop.f32.mrb[19].mxu0  ;;  %v1254_v15 = vadd.f32 %v1667_v9, %v2017_v40  ;;  %1830 = vtanh.f32 %v1251_v7 }
 0x121   : > { %v941_v13 = vpop.f32.mrb[19].mxu1  ;;  %v1807_v14 = vpop.eup %1806  ;;  %1340 = vst [vmem:[%s2035_s18 + $0x48] sm:$0xff] %v1805_v10  ;;  %v1220_v17 = vadd.f32 %v2017_v40, %v813_v12  ;;  %1832 = vtanh.f32 %v1222_v11 }
 0x122   : > { %v1809_v16 = vpop.eup %1808  ;;  %1372 = vst [vmem:[%s2035_s18 + $0x148] sm:$0xff] %v1807_v14  ;;  %v1252_v19 = vadd.f32 %v2017_v40, %v941_v13  ;;  %1834 = vtanh.f32 %v1254_v15  ;;  %v1638_v22 = vpop.f32.mrb[20].mxu0 }
 0x123   : > { %v1811_v18 = vpop.eup %1810  ;;  %1345 = vst [vmem:[%s2035_s18 + $0x70] sm:$0xff] %v1809_v16  ;;  %v1670_v23 = vpop.f32.mrb[20].mxu1  ;;  %1836 = vtanh.f32 %v1220_v17  ;;  %v1225_v25 = vadd.f32 %v1638_v22, %v2017_v40 }
 0x124   : > { %v1813_v20 = vpop.eup %1812  ;;  %1377 = vst [vmem:[%s2035_s18 + $0x170] sm:$0xff] %v1811_v18  ;;  %v1257_v26 = vadd.f32 %v1670_v23, %v2017_v40  ;;  %v826_v27 = vpop.f32.mrb[21].mxu0  ;;  %1838 = vtanh.f32 %v1252_v19 }
 0x125   : > { %v1815_v21 = vpop.eup %1814  ;;  %1343 = vst [vmem:[%s2035_s18 + $0x60] sm:$0xff] %v1813_v20  ;;  %v954_v28 = vpop.f32.mrb[21].mxu1  ;;  %v1223_v30 = vadd.f32 %v2017_v40, %v826_v27  ;;  %1840 = vtanh.f32 %v1225_v25 }
 0x126   : > { %v1817_v24 = vpop.eup %1816  ;;  %1375 = vst [vmem:[%s2035_s18 + $0x160] sm:$0xff] %v1815_v21  ;;  %v1255_v31 = vadd.f32 %v2017_v40, %v954_v28  ;;  %v1639_v32 = vpop.f32.mrb[22].mxu0  ;;  %1842 = vtanh.f32 %v1257_v26 }
 0x127   : > { %v1819_v29 = vpop.eup %1818  ;;  %1346 = vst [vmem:[%s2035_s18 + $0x78] sm:$0xff] %v1817_v24  ;;  %v1671_v33 = vpop.f32.mrb[22].mxu1  ;;  %v1226_v35 = vadd.f32 %v1639_v32, %v2017_v40  ;;  %1844 = vtanh.f32 %v1223_v30 }
 0x128   : > { %v1821_v34 = vpop.eup %1820  ;;  %1378 = vst [vmem:[%s2035_s18 + $0x178] sm:$0xff] %v1819_v29  ;;  %v829_v36 = vpop.f32.mrb[23].mxu0  ;;  %v1258_v39 = vadd.f32 %v1671_v33, %v2017_v40  ;;  %1846 = vtanh.f32 %v1255_v31 }
 0x129   : > { %v957_v37 = vpop.f32.mrb[23].mxu1  ;;  %v1823_v38 = vpop.eup %1822  ;;  %1344 = vst [vmem:[%s2035_s18 + $0x68] sm:$0xff] %v1821_v34  ;;  %v1224_v42 = vadd.f32 %v2017_v40, %v829_v36  ;;  %1848 = vtanh.f32 %v1226_v35 }
 0x12a   : > { %v1825_v41 = vpop.eup %1824  ;;  %1376 = vst [vmem:[%s2035_s18 + $0x168] sm:$0xff] %v1823_v38  ;;  %v1256_v44 = vadd.f32 %v2017_v40, %v957_v37  ;;  %1850 = vtanh.f32 %v1258_v39  ;;  %v1642_v47 = vpop.f32.mrb[24].mxu0 }
 0x12b   : > { %v1827_v43 = vpop.eup %1826  ;;  %1349 = vst [vmem:[%s2035_s18 + $0x90] sm:$0xff] %v1825_v41  ;;  %v1674_v48 = vpop.f32.mrb[24].mxu1  ;;  %1852 = vtanh.f32 %v1224_v42  ;;  %v1229_v50 = vadd.f32 %v1642_v47, %v2017_v40 }
 0x12c   : > { %v1829_v45 = vpop.eup %1828  ;;  %1381 = vst [vmem:[%s2035_s18 + $0x190] sm:$0xff] %v1827_v43  ;;  %v1261_v51 = vadd.f32 %v1674_v48, %v2017_v40  ;;  %v842_v52 = vpop.f32.mrb[25].mxu0  ;;  %1854 = vtanh.f32 %v1256_v44 }
 0x12d   : > { %v1831_v46 = vpop.eup %1830  ;;  %1347 = vst [vmem:[%s2035_s18 + $0x80] sm:$0xff] %v1829_v45  ;;  %v970_v53 = vpop.f32.mrb[25].mxu1  ;;  %v1227_v55 = vadd.f32 %v2017_v40, %v842_v52  ;;  %1856 = vtanh.f32 %v1229_v50 }
 0x12e   : > { %v1833_v49 = vpop.eup %1832  ;;  %1379 = vst [vmem:[%s2035_s18 + $0x180] sm:$0xff] %v1831_v46  ;;  %v1259_v56 = vadd.f32 %v2017_v40, %v970_v53  ;;  %v1643_v57 = vpop.f32.mrb[26].mxu0  ;;  %1858 = vtanh.f32 %v1261_v51 }
 0x12f   : > { %v1835_v54 = vpop.eup %1834  ;;  %1350 = vst [vmem:[%s2035_s18 + $0x98] sm:$0xff] %v1833_v49  ;;  %v1675_v58 = vpop.f32.mrb[26].mxu1  ;;  %v1230_v60 = vadd.f32 %v1643_v57, %v2017_v40  ;;  %1860 = vtanh.f32 %v1227_v55 }
 0x130   : > { %v1837_v59 = vpop.eup %1836  ;;  %1382 = vst [vmem:[%s2035_s18 + $0x198] sm:$0xff] %v1835_v54  ;;  %v845_v61 = vpop.f32.mrb[27].mxu0  ;;  %v1262_v0 = vadd.f32 %v1675_v58, %v2017_v40  ;;  %1862 = vtanh.f32 %v1259_v56 }
 0x131   : > { %v973_v62 = vpop.f32.mrb[27].mxu1  ;;  %v1839_v63 = vpop.eup %1838  ;;  %1348 = vst [vmem:[%s2035_s18 + $0x88] sm:$0xff] %v1837_v59  ;;  %v1228_v2 = vadd.f32 %v2017_v40, %v845_v61  ;;  %1864 = vtanh.f32 %v1230_v60 }
 0x132   : > { %v1841_v1 = vpop.eup %1840  ;;  %1380 = vst [vmem:[%s2035_s18 + $0x188] sm:$0xff] %v1839_v63  ;;  %v1260_v4 = vadd.f32 %v2017_v40, %v973_v62  ;;  %1866 = vtanh.f32 %v1262_v0  ;;  %v1646_v7 = vpop.f32.mrb[28].mxu0 }
 0x133   : > { %v1843_v3 = vpop.eup %1842  ;;  %1353 = vst [vmem:[%s2035_s18 + $0xb0] sm:$0xff] %v1841_v1  ;;  %v1678_v8 = vpop.f32.mrb[28].mxu1  ;;  %1868 = vtanh.f32 %v1228_v2  ;;  %v1233_v10 = vadd.f32 %v1646_v7, %v2017_v40 }
 0x134   : > { %v1845_v5 = vpop.eup %1844  ;;  %1385 = vst [vmem:[%s2035_s18 + $0x1b0] sm:$0xff] %v1843_v3  ;;  %v1265_v11 = vadd.f32 %v1678_v8, %v2017_v40  ;;  %v858_v12 = vpop.f32.mrb[29].mxu0  ;;  %1870 = vtanh.f32 %v1260_v4 }
 0x135   : > { %v1847_v6 = vpop.eup %1846  ;;  %1351 = vst [vmem:[%s2035_s18 + $0xa0] sm:$0xff] %v1845_v5  ;;  %v986_v13 = vpop.f32.mrb[29].mxu1  ;;  %v1231_v15 = vadd.f32 %v2017_v40, %v858_v12  ;;  %1872 = vtanh.f32 %v1233_v10 }
 0x136   : > { %v1849_v9 = vpop.eup %1848  ;;  %1383 = vst [vmem:[%s2035_s18 + $0x1a0] sm:$0xff] %v1847_v6  ;;  %v1263_v16 = vadd.f32 %v2017_v40, %v986_v13  ;;  %v1647_v17 = vpop.f32.mrb[30].mxu0  ;;  %1874 = vtanh.f32 %v1265_v11 }
 0x137   : > { %v1851_v14 = vpop.eup %1850  ;;  %1354 = vst [vmem:[%s2035_s18 + $0xb8] sm:$0xff] %v1849_v9  ;;  %v1679_v18 = vpop.f32.mrb[30].mxu1  ;;  %v1234_v20 = vadd.f32 %v1647_v17, %v2017_v40  ;;  %1876 = vtanh.f32 %v1231_v15 }
 0x138   : > { %v1853_v19 = vpop.eup %1852  ;;  %1386 = vst [vmem:[%s2035_s18 + $0x1b8] sm:$0xff] %v1851_v14  ;;  %v861_v21 = vpop.f32.mrb[31].mxu0  ;;  %v1266_v24 = vadd.f32 %v1679_v18, %v2017_v40  ;;  %1878 = vtanh.f32 %v1263_v16 }
 0x139   : > { %v989_v22 = vpop.f32.mrb[31].mxu1  ;;  %v1855_v23 = vpop.eup %1854  ;;  %1352 = vst [vmem:[%s2035_s18 + $0xa8] sm:$0xff] %v1853_v19  ;;  %v1232_v26 = vadd.f32 %v2017_v40, %v861_v21  ;;  %1880 = vtanh.f32 %v1234_v20 }
 0x13a   : > { %v1857_v25 = vpop.eup %1856  ;;  %1384 = vst [vmem:[%s2035_s18 + $0x1a8] sm:$0xff] %v1855_v23  ;;  %v1264_v28 = vadd.f32 %v2017_v40, %v989_v22  ;;  %1882 = vtanh.f32 %v1266_v24 }
 0x13b   : > { %v1859_v27 = vpop.eup %1858  ;;  %1357 = vst [vmem:[%s2035_s18 + $0xd0] sm:$0xff] %v1857_v25  ;;  %1884 = vtanh.f32 %v1232_v26 }
 0x13c   : > { %v1861_v29 = vpop.eup %1860  ;;  %1389 = vst [vmem:[%s2035_s18 + $0x1d0] sm:$0xff] %v1859_v27  ;;  %1886 = vtanh.f32 %v1264_v28 }
 0x13d   : > { %v1863_v30 = vpop.eup %1862  ;;  %1355 = vst [vmem:[%s2035_s18 + $0xc0] sm:$0xff] %v1861_v29 }
 0x13e   : > { %v1865_v31 = vpop.eup %1864  ;;  %1387 = vst [vmem:[%s2035_s18 + $0x1c0] sm:$0xff] %v1863_v30 }
 0x13f   : > { %v1867_v32 = vpop.eup %1866  ;;  %1358 = vst [vmem:[%s2035_s18 + $0xd8] sm:$0xff] %v1865_v31 }
 0x140   : > { %v1869_v40 = vpop.eup %1868  ;;  %1390 = vst [vmem:[%s2035_s18 + $0x1d8] sm:$0xff] %v1867_v32 }
 0x141   : > { %v1871_v33 = vpop.eup %1870  ;;  %1356 = vst [vmem:[%s2035_s18 + $0xc8] sm:$0xff] %v1869_v40 }
 0x142   : > { %v1873_v34 = vpop.eup %1872  ;;  %1388 = vst [vmem:[%s2035_s18 + $0x1c8] sm:$0xff] %v1871_v33 }
 0x143   : > { %v1875_v35 = vpop.eup %1874  ;;  %1361 = vst [vmem:[%s2035_s18 + $0xf0] sm:$0xff] %v1873_v34 }
 0x144   : > { %v1877_v36 = vpop.eup %1876  ;;  %1393 = vst [vmem:[%s2035_s18 + $0x1f0] sm:$0xff] %v1875_v35 }
 0x145   : > { %v1879_v37 = vpop.eup %1878  ;;  %1359 = vst [vmem:[%s2035_s18 + $0xe0] sm:$0xff] %v1877_v36 }
 0x146   : > { %v1881_v38 = vpop.eup %1880  ;;  %1391 = vst [vmem:[%s2035_s18 + $0x1e0] sm:$0xff] %v1879_v37 }
 0x147   : > { %v1883_v39 = vpop.eup %1882  ;;  %1362 = vst [vmem:[%s2035_s18 + $0xf8] sm:$0xff] %v1881_v38 }
 0x148   : > { %v1885_v41 = vpop.eup %1884  ;;  %1394 = vst [vmem:[%s2035_s18 + $0x1f8] sm:$0xff] %v1883_v39 }
 0x149   : > { %v1887_v42 = vpop.eup %1886  ;;  %1360 = vst [vmem:[%s2035_s18 + $0xe8] sm:$0xff] %v1885_v41 }
 0x14a   : > { %1392 = vst [vmem:[%s2035_s18 + $0x1e8] sm:$0xff] %v1887_v42 }
 0x14b PF: > { %s13_s14 = sadd.s32 1, %s1910_s14   ;;  %s2166_s12 = smov %s1906_s13 }
 0x14c   : > { %p10_p5 = scmp.ge.s32.totalorder %s13_s14, 10   ;;  %s2167_s13 = smov %s2169_s15 }
 0x14e   :  { %12 = sbr.rel (!%p10_p5) target bundleno = 2 (0x2), region = 76 }

</bundles_post_ra>
